<compile_context>
chip_gen: v7x
topology: tpu7x:2x2x1
jax: 0.10.0
libtpu: 0.0.40
codegen_flags: <defaults>
</compile_context>

<pallas_src>
import math

import jax
import jax.numpy as jnp
from jax.experimental import pallas as pl
from jax.experimental.pallas import tpu as pltpu

# ----------------------------- configuration (small, synthetic) -------------
B = 2              # batch
S = 16             # sequence length
H = 32             # BERT hidden size (== GlobalPointer "embedding_size")
N_HEADS = 2        # BERT attention heads
DH = H // N_HEADS  # per-head dim
FFN = 64           # BERT intermediate size
N_LAYERS = 2       # BERT encoder layers
VOCAB = 100
MAX_POS = 64
N_TYPES = 2
LN_EPS = 1e-12

C_SIZE = 9         # GlobalPointer entity classes ("heads")
GP_HS = 8          # GlobalPointer head_size (even, needed for RoPE)
GP_W = 2 * C_SIZE * GP_HS   # width of the GlobalPointer dense projection (144)
NEG = -1e12        # sequence_masking '-inf' value in the reference impl


# ----------------------------- in-kernel helpers ----------------------------
def _layer_norm(x, g, b):
    mu = jnp.mean(x, axis=-1, keepdims=True)
    var = jnp.mean(jnp.square(x - mu), axis=-1, keepdims=True)
    return (x - mu) * jax.lax.rsqrt(var + LN_EPS) * g + b


def _gelu(x):
    # TODO(synk): HF BERT default is exact erf-GELU; tanh approximation kept
    # for a Mosaic-friendly EUP lowering (weights are synthetic anyway).
    c = 0.7978845608028654
    return 0.5 * x * (1.0 + jnp.tanh(c * (x + 0.044715 * x * x * x)))


# ----------------------------- fused forward kernel -------------------------
def fused_forward_kernel(x_ref, attn_bias_ref, padk_ref, padq_ref,
                         wqkv_ref, bqkv_ref, wo_ref, bo_ref,
                         ln1g_ref, ln1b_ref, w1_ref, b1_ref,
                         w2_ref, b2_ref, ln2g_ref, ln2b_ref,
                         gpw_ref, gpb_ref, gpwr_ref, gpbr_ref,
                         cos_ref, sin_ref, out_ref):
    f32 = jnp.float32
    x = x_ref[0]                   # (S, H) embeddings for this batch element
    attn_bias = attn_bias_ref[0]   # (1, S) additive mask: (1 - m) * -1e4

    inv_sqrt_dh = 1.0 / math.sqrt(DH)

    # ------------------ BERT encoder: N_LAYERS fused layers -----------------
    for l in range(N_LAYERS):      # static unroll (N_LAYERS = 2)
        # merged QKV projection: one (S,H) @ (H,3H) matmul
        qkv = jnp.dot(x, wqkv_ref[l], preferred_element_type=f32) + bqkv_ref[l]
        q3 = jnp.stack([qkv[:, h * DH:(h + 1) * DH]
                        for h in range(N_HEADS)], axis=0)           # (nh,S,DH)
        k3 = jnp.stack([qkv[:, H + h * DH:H + (h + 1) * DH]
                        for h in range(N_HEADS)], axis=0)
        v3 = jnp.stack([qkv[:, 2 * H + h * DH:2 * H + (h + 1) * DH]
                        for h in range(N_HEADS)], axis=0)

        s = jnp.einsum('hsd,htd->hst', q3, k3,
                       preferred_element_type=f32) * inv_sqrt_dh    # (nh,S,S)
        s = s + attn_bias                                           # key padding
        s = s - jnp.max(s, axis=-1, keepdims=True)
        p = jnp.exp(s)
        p = p * pl.reciprocal(jnp.sum(p, axis=-1, keepdims=True), approx=True)
        ctx = jnp.einsum('hst,htd->hsd', p, v3,
                         preferred_element_type=f32)                # (nh,S,DH)

        ctx_cat = jnp.concatenate([ctx[h] for h in range(N_HEADS)], axis=-1)
        attn_out = jnp.dot(ctx_cat, wo_ref[l],
                           preferred_element_type=f32) + bo_ref[l]  # (S, H)

        h1 = _layer_norm(x + attn_out, ln1g_ref[l], ln1b_ref[l])
        ff = _gelu(jnp.dot(h1, w1_ref[l], preferred_element_type=f32) + b1_ref[l])
        ff = jnp.dot(ff, w2_ref[l], preferred_element_type=f32) + b2_ref[l]
        x = _layer_norm(h1 + ff, ln2g_ref[l], ln2b_ref[l])

    # ------------------ GlobalPointer head ----------------------------------
    # qk  = dense(x);  qk2 = dense(x) @ blockdiag(rot)   (rot folded into W on host)
    qk = jnp.dot(x, gpw_ref[...], preferred_element_type=f32) + gpb_ref[...]
    qk2 = jnp.dot(x, gpwr_ref[...], preferred_element_type=f32) + gpbr_ref[...]
    qk = qk * cos_ref[...] + qk2 * sin_ref[...]   # RoPE for all classes' q & k at once

    q3 = jnp.stack([qk[:, c * 2 * GP_HS: c * 2 * GP_HS + GP_HS]
                    for c in range(C_SIZE)], axis=0)                # (C,S,GP_HS)
    k3 = jnp.stack([qk[:, c * 2 * GP_HS + GP_HS: (c + 1) * 2 * GP_HS]
                    for c in range(C_SIZE)], axis=0)
    logits = jnp.einsum('csd,ctd->cst', q3, k3,
                        preferred_element_type=f32)                 # (C,S,S)

    # padding mask on BOTH query rows and key cols (reference sequence_masking
    # on dims 2 and 3), then strict-lower-triangle mask, then scale.
    padq = padq_ref[0]            # (S, 1)
    padk = padk_ref[0]            # (1, S)
    logits = logits * padq + NEG * (1.0 - padq)
    logits = logits * padk + NEG * (1.0 - padk)
    row = jax.lax.broadcasted_iota(jnp.int32, (S, S), 0)
    col = jax.lax.broadcasted_iota(jnp.int32, (S, S), 1)
    tril = (row > col).astype(f32)                # torch.tril(ones, -1)
    logits = logits - tril * 1e12
    out_ref[0] = logits * (1.0 / math.sqrt(GP_HS))


# ----------------------------- pallas_call wrapper ---------------------------
def _const_spec(shape):
    zeros = (0,) * len(shape)
    return pl.BlockSpec(shape, lambda b, _z=zeros: _z)


def fused_forward(x, attn_bias, padk, padq, p):
    weights = [p["wqkv"], p["bqkv"], p["wo"], p["bo"],
               p["ln1g"], p["ln1b"], p["w1"], p["b1"],
               p["w2"], p["b2"], p["ln2g"], p["ln2b"],
               p["gp_w"], p["gp_b"], p["gp_w_rot"], p["gp_b_rot"],
               p["cos_full"], p["sin_full"]]
    in_specs = [pl.BlockSpec((1, S, H), lambda b: (b, 0, 0)),
                pl.BlockSpec((1, 1, S), lambda b: (b, 0, 0)),
                pl.BlockSpec((1, 1, S), lambda b: (b, 0, 0)),
                pl.BlockSpec((1, S, 1), lambda b: (b, 0, 0))]
    in_specs += [_const_spec(w.shape) for w in weights]
    return pl.pallas_call(
        fused_forward_kernel,
        out_shape=jax.ShapeDtypeStruct((B, C_SIZE, S, S), jnp.float32),
        grid=(B,),
        in_specs=in_specs,
        out_specs=pl.BlockSpec((1, C_SIZE, S, S), lambda b: (b, 0, 0, 0)),
        compiler_params=pltpu.CompilerParams(dimension_semantics=("parallel",)),
    )(x, attn_bias, padk, padq, *weights)


# ----------------------------- plain-JAX glue --------------------------------
def bert_embeddings(input_ids, token_type_ids, p):
    emb = (p["word_emb"][input_ids]
           + p["pos_emb"][:S][None, :, :]
           + p["type_emb"][token_type_ids])
    mu = jnp.mean(emb, axis=-1, keepdims=True)
    var = jnp.mean(jnp.square(emb - mu), axis=-1, keepdims=True)
    return (emb - mu) * jax.lax.rsqrt(var + LN_EPS) * p["emb_ln_g"] + p["emb_ln_b"]


def global_pointer_net(input_ids, attention_mask, token_type_ids, params):
    x = bert_embeddings(input_ids, token_type_ids, params)
    maskf = attention_mask.astype(jnp.float32)
    attn_bias = ((1.0 - maskf) * -10000.0)[:, None, :]   # (B, 1, S) for BERT attn
    padk = maskf[:, None, :]                             # (B, 1, S) key-dim pad mask
    padq = maskf[:, :, None]                             # (B, S, 1) query-dim pad mask
    return fused_forward(x, attn_bias, padk, padq, params)


def init_params(key):
    keys = iter(jax.random.split(key, 32))

    def nrm(shape, scale=0.02):
        return scale * jax.random.normal(next(keys), shape, dtype=jnp.float32)

    params = {
        "word_emb": nrm((VOCAB, H)),
        "pos_emb": nrm((MAX_POS, H)),
        "type_emb": nrm((N_TYPES, H)),
        "emb_ln_g": jnp.ones((H,), jnp.float32),
        "emb_ln_b": jnp.zeros((H,), jnp.float32),
        # BERT encoder weights, stacked on a leading layer axis; QKV merged.
        "wqkv": nrm((N_LAYERS, H, 3 * H)),
        "bqkv": jnp.zeros((N_LAYERS, 1, 3 * H), jnp.float32),
        "wo": nrm((N_LAYERS, H, H)),
        "bo": jnp.zeros((N_LAYERS, 1, H), jnp.float32),
        "ln1g": jnp.ones((N_LAYERS, 1, H), jnp.float32),
        "ln1b": jnp.zeros((N_LAYERS, 1, H), jnp.float32),
        "w1": nrm((N_LAYERS, H, FFN)),
        "b1": jnp.zeros((N_LAYERS, 1, FFN), jnp.float32),
        "w2": nrm((N_LAYERS, FFN, H)),
        "b2": jnp.zeros((N_LAYERS, 1, H), jnp.float32),
        "ln2g": jnp.ones((N_LAYERS, 1, H), jnp.float32),
        "ln2b": jnp.zeros((N_LAYERS, 1, H), jnp.float32),
        # GlobalPointer dense projection.
        "gp_w": nrm((H, GP_W)),
        "gp_b": nrm((1, GP_W)),
    }

    # RoPE sinusoidal tables (repeat_interleave(2) applied), tiled to the full
    # projection width so RoPE is a single elementwise pass in-kernel.
    pos = jnp.arange(S, dtype=jnp.float32)[:, None]
    idx = jnp.arange(GP_HS // 2, dtype=jnp.float32)
    theta = jnp.power(10000.0, -2.0 * idx / GP_HS)
    ang = pos * theta                                        # (S, GP_HS//2)
    sin_pos = jnp.repeat(jnp.sin(ang), 2, axis=-1)           # (S, GP_HS)
    cos_pos = jnp.repeat(jnp.cos(ang), 2, axis=-1)
    params["sin_full"] = jnp.tile(sin_pos, (1, 2 * C_SIZE))  # (S, 144)
    params["cos_full"] = jnp.tile(cos_pos, (1, 2 * C_SIZE))

    # Pair-rotation (t2[2i] = -t[2i+1], t2[2i+1] = t[2i]) as a matrix, made
    # block-diagonal over all 2*C_SIZE chunks and folded into the dense
    # weights host-side, so the kernel never does per-class rot matmuls.
    ar = jnp.arange(GP_HS)
    rot = jnp.zeros((GP_HS, GP_HS), jnp.float32)
    rot = rot.at[ar[1::2], ar[::2]].set(-1.0)
    rot = rot.at[ar[::2], ar[1::2]].set(1.0)
    rot_full = jnp.kron(jnp.eye(2 * C_SIZE, dtype=jnp.float32), rot)  # (144,144)
    params["gp_w_rot"] = params["gp_w"] @ rot_full
    params["gp_b_rot"] = params["gp_b"] @ rot_full
    return params


# ----------------------------- demo ------------------------------------------
if __name__ == "__main__":
    key = jax.random.PRNGKey(0)
    k_params, k_ids = jax.random.split(key)
    params = init_params(k_params)

    input_ids = jax.random.randint(k_ids, (B, S), 0, VOCAB, dtype=jnp.int32)
    attention_mask = jnp.array(
        [[1] * S, [1] * (S - 4) + [0] * 4], dtype=jnp.int32)      # second row padded
    token_type_ids = jnp.concatenate(
        [jnp.zeros((B, S // 2), jnp.int32), jnp.ones((B, S // 2), jnp.int32)], axis=1)

    logits = global_pointer_net(input_ids, attention_mask, token_type_ids, params)
    logits = jax.block_until_ready(logits)

    assert logits.shape == (B, C_SIZE, S, S), logits.shape
    assert logits.dtype == jnp.float32
    assert bool(jnp.all(jnp.isfinite(logits)))
    print("KERNEL_OK")
</pallas_src>

<mosaic_0001>
module attributes {stable_mosaic.version = 11 : i64} {
  func.func @fused_forward_kernel(%arg0: i32, %arg1: memref<1x16x32xf32, #tpu.memory_space<vmem>>, %arg2: memref<1x1x16xf32, #tpu.memory_space<vmem>>, %arg3: memref<1x1x16xf32, #tpu.memory_space<vmem>>, %arg4: memref<1x16x1xf32, #tpu.memory_space<vmem>>, %arg5: memref<2x32x96xf32, #tpu.memory_space<vmem>>, %arg6: memref<2x1x96xf32, #tpu.memory_space<vmem>>, %arg7: memref<2x32x32xf32, #tpu.memory_space<vmem>>, %arg8: memref<2x1x32xf32, #tpu.memory_space<vmem>>, %arg9: memref<2x1x32xf32, #tpu.memory_space<vmem>>, %arg10: memref<2x1x32xf32, #tpu.memory_space<vmem>>, %arg11: memref<2x32x64xf32, #tpu.memory_space<vmem>>, %arg12: memref<2x1x64xf32, #tpu.memory_space<vmem>>, %arg13: memref<2x64x32xf32, #tpu.memory_space<vmem>>, %arg14: memref<2x1x32xf32, #tpu.memory_space<vmem>>, %arg15: memref<2x1x32xf32, #tpu.memory_space<vmem>>, %arg16: memref<2x1x32xf32, #tpu.memory_space<vmem>>, %arg17: memref<32x144xf32, #tpu.memory_space<vmem>>, %arg18: memref<1x144xf32, #tpu.memory_space<vmem>>, %arg19: memref<32x144xf32, #tpu.memory_space<vmem>>, %arg20: memref<1x144xf32, #tpu.memory_space<vmem>>, %arg21: memref<16x144xf32, #tpu.memory_space<vmem>>, %arg22: memref<16x144xf32, #tpu.memory_space<vmem>>, %arg23: memref<1x9x16x16xf32, #tpu.memory_space<vmem>>) attributes {dimension_semantics = [#tpu.dimension_semantics<parallel>], iteration_bounds = array<i64: 2>, scalar_prefetch = 0 : i64, scratch_operands = 0 : i64, tpu.core_type = #tpu.core_type<tc>, window_params = [{transform_indices = @transform_0, window_bounds = array<i64: 1, 16, 32>}, {transform_indices = @transform_1, window_bounds = array<i64: 1, 1, 16>}, {transform_indices = @transform_2, window_bounds = array<i64: 1, 1, 16>}, {transform_indices = @transform_3, window_bounds = array<i64: 1, 16, 1>}, {pipeline_mode = #tpu.pipeline_mode<synchronous>, transform_indices = @transform_4, window_bounds = array<i64: 2, 32, 96>}, {pipeline_mode = #tpu.pipeline_mode<synchronous>, transform_indices = @transform_5, window_bounds = array<i64: 2, 1, 96>}, {pipeline_mode = #tpu.pipeline_mode<synchronous>, transform_indices = @transform_6, window_bounds = array<i64: 2, 32, 32>}, {pipeline_mode = #tpu.pipeline_mode<synchronous>, transform_indices = @transform_7, window_bounds = array<i64: 2, 1, 32>}, {pipeline_mode = #tpu.pipeline_mode<synchronous>, transform_indices = @transform_8, window_bounds = array<i64: 2, 1, 32>}, {pipeline_mode = #tpu.pipeline_mode<synchronous>, transform_indices = @transform_9, window_bounds = array<i64: 2, 1, 32>}, {pipeline_mode = #tpu.pipeline_mode<synchronous>, transform_indices = @transform_10, window_bounds = array<i64: 2, 32, 64>}, {pipeline_mode = #tpu.pipeline_mode<synchronous>, transform_indices = @transform_11, window_bounds = array<i64: 2, 1, 64>}, {pipeline_mode = #tpu.pipeline_mode<synchronous>, transform_indices = @transform_12, window_bounds = array<i64: 2, 64, 32>}, {pipeline_mode = #tpu.pipeline_mode<synchronous>, transform_indices = @transform_13, window_bounds = array<i64: 2, 1, 32>}, {pipeline_mode = #tpu.pipeline_mode<synchronous>, transform_indices = @transform_14, window_bounds = array<i64: 2, 1, 32>}, {pipeline_mode = #tpu.pipeline_mode<synchronous>, transform_indices = @transform_15, window_bounds = array<i64: 2, 1, 32>}, {pipeline_mode = #tpu.pipeline_mode<synchronous>, transform_indices = @transform_16, window_bounds = array<i64: 32, 144>}, {pipeline_mode = #tpu.pipeline_mode<synchronous>, transform_indices = @transform_17, window_bounds = array<i64: 1, 144>}, {pipeline_mode = #tpu.pipeline_mode<synchronous>, transform_indices = @transform_18, window_bounds = array<i64: 32, 144>}, {pipeline_mode = #tpu.pipeline_mode<synchronous>, transform_indices = @transform_19, window_bounds = array<i64: 1, 144>}, {pipeline_mode = #tpu.pipeline_mode<synchronous>, transform_indices = @transform_20, window_bounds = array<i64: 16, 144>}, {pipeline_mode = #tpu.pipeline_mode<synchronous>, transform_indices = @transform_21, window_bounds = array<i64: 16, 144>}, {transform_indices = @transform_22, window_bounds = array<i64: 1, 9, 16, 16>}]} {
    %c0 = arith.constant 0 : index
    %c0_0 = arith.constant 0 : index
    %c0_1 = arith.constant 0 : index
    %0 = vector.load %arg1[%c0, %c0_0, %c0_1] : memref<1x16x32xf32, #tpu.memory_space<vmem>>, vector<1x16x32xf32>
    %1 = vector.shape_cast %0 : vector<1x16x32xf32> to vector<16x32xf32>
    %c0_2 = arith.constant 0 : index
    %c0_3 = arith.constant 0 : index
    %c0_4 = arith.constant 0 : index
    %2 = vector.load %arg2[%c0_2, %c0_3, %c0_4] : memref<1x1x16xf32, #tpu.memory_space<vmem>>, vector<1x1x16xf32>
    %3 = vector.shape_cast %2 : vector<1x1x16xf32> to vector<1x16xf32>
    %c0_5 = arith.constant 0 : index
    %c0_6 = arith.constant 0 : index
    %c0_7 = arith.constant 0 : index
    %4 = vector.load %arg5[%c0_5, %c0_6, %c0_7] : memref<2x32x96xf32, #tpu.memory_space<vmem>>, vector<1x32x96xf32>
    %5 = vector.shape_cast %4 : vector<1x32x96xf32> to vector<32x96xf32>
    %cst = arith.constant dense<0.000000e+00> : vector<16x96xf32>
    %6 = tpu.matmul %1, %5, %cst {dimension_numbers = #tpu.dot_dimension_numbers<[1], [0], [0], [1], [0, 0, 1, 1], [], []>} : vector<16x32xf32>, vector<32x96xf32>, vector<16x96xf32> -> vector<16x96xf32>
    %c0_8 = arith.constant 0 : index
    %c0_9 = arith.constant 0 : index
    %c0_10 = arith.constant 0 : index
    %7 = vector.load %arg6[%c0_8, %c0_9, %c0_10] : memref<2x1x96xf32, #tpu.memory_space<vmem>>, vector<1x1x96xf32>
    %8 = vector.shape_cast %7 : vector<1x1x96xf32> to vector<1x96xf32>
    %9 = vector.broadcast %8 : vector<1x96xf32> to vector<16x96xf32>
    %10 = arith.addf %6, %9 : vector<16x96xf32>
    %11 = vector.extract_strided_slice %10 {offsets = [0, 0], sizes = [16, 16], strides = [1, 1]} : vector<16x96xf32> to vector<16x16xf32>
    %12 = vector.extract_strided_slice %10 {offsets = [0, 16], sizes = [16, 16], strides = [1, 1]} : vector<16x96xf32> to vector<16x16xf32>
    %13 = vector.shape_cast %11 : vector<16x16xf32> to vector<1x16x16xf32>
    %14 = vector.shape_cast %12 : vector<16x16xf32> to vector<1x16x16xf32>
    %15 = tpu.concatenate %13, %14 in 0 : vector<1x16x16xf32>, vector<1x16x16xf32> -> vector<2x16x16xf32>
    %16 = vector.extract_strided_slice %10 {offsets = [0, 32], sizes = [16, 16], strides = [1, 1]} : vector<16x96xf32> to vector<16x16xf32>
    %17 = vector.extract_strided_slice %10 {offsets = [0, 48], sizes = [16, 16], strides = [1, 1]} : vector<16x96xf32> to vector<16x16xf32>
    %18 = vector.shape_cast %16 : vector<16x16xf32> to vector<1x16x16xf32>
    %19 = vector.shape_cast %17 : vector<16x16xf32> to vector<1x16x16xf32>
    %20 = tpu.concatenate %18, %19 in 0 : vector<1x16x16xf32>, vector<1x16x16xf32> -> vector<2x16x16xf32>
    %21 = vector.extract_strided_slice %10 {offsets = [0, 64], sizes = [16, 16], strides = [1, 1]} : vector<16x96xf32> to vector<16x16xf32>
    %22 = vector.extract_strided_slice %10 {offsets = [0, 80], sizes = [16, 16], strides = [1, 1]} : vector<16x96xf32> to vector<16x16xf32>
    %23 = vector.shape_cast %21 : vector<16x16xf32> to vector<1x16x16xf32>
    %24 = vector.shape_cast %22 : vector<16x16xf32> to vector<1x16x16xf32>
    %25 = tpu.concatenate %23, %24 in 0 : vector<1x16x16xf32>, vector<1x16x16xf32> -> vector<2x16x16xf32>
    "tpu.trace_start"() <{level = 10 : i32, message = "hsd,htd->hst"}> : () -> ()
    %cst_11 = arith.constant dense<0.000000e+00> : vector<2x16x16xf32>
    %26 = tpu.matmul %15, %20, %cst_11 {dimension_numbers = #tpu.dot_dimension_numbers<[2], [2], [1], [1], [0, 0, 0, 1, 1, 1], [0], [0]>} : vector<2x16x16xf32>, vector<2x16x16xf32>, vector<2x16x16xf32> -> vector<2x16x16xf32>
    "tpu.trace_stop"() : () -> ()
    %cst_12 = arith.constant 2.500000e-01 : f32
    %27 = vector.broadcast %cst_12 : f32 to vector<2x16x16xf32>
    %28 = arith.mulf %26, %27 : vector<2x16x16xf32>
    %29 = vector.shape_cast %3 : vector<1x16xf32> to vector<1x1x16xf32>
    %30 = vector.broadcast %29 : vector<1x1x16xf32> to vector<2x16x16xf32>
    %31 = arith.addf %28, %30 : vector<2x16x16xf32>
    %cst_13 = arith.constant dense<0xFF800000> : vector<2x16xf32>
    %32 = vector.multi_reduction <maximumf>, %31, %cst_13 [2] : vector<2x16x16xf32> to vector<2x16xf32>
    %33 = vector.shape_cast %32 : vector<2x16xf32> to vector<2x16x1xf32>
    %34 = vector.broadcast %33 : vector<2x16x1xf32> to vector<2x16x16xf32>
    %35 = arith.subf %31, %34 : vector<2x16x16xf32>
    %36 = math.exp %35 : vector<2x16x16xf32>
    %cst_14 = arith.constant dense<0.000000e+00> : vector<2x16xf32>
    %37 = vector.multi_reduction <add>, %36, %cst_14 [2] : vector<2x16x16xf32> to vector<2x16xf32>
    %38 = vector.shape_cast %37 : vector<2x16xf32> to vector<2x16x1xf32>
    %39 = tpu.reciprocal %38 {approx = true} : vector<2x16x1xf32> -> vector<2x16x1xf32>
    %40 = vector.broadcast %39 : vector<2x16x1xf32> to vector<2x16x16xf32>
    %41 = arith.mulf %36, %40 : vector<2x16x16xf32>
    "tpu.trace_start"() <{level = 10 : i32, message = "hst,htd->hsd"}> : () -> ()
    %cst_15 = arith.constant dense<0.000000e+00> : vector<2x16x16xf32>
    %42 = tpu.matmul %41, %25, %cst_15 {dimension_numbers = #tpu.dot_dimension_numbers<[2], [1], [1], [2], [0, 0, 0, 1, 1, 2], [0], [0]>} : vector<2x16x16xf32>, vector<2x16x16xf32>, vector<2x16x16xf32> -> vector<2x16x16xf32>
    "tpu.trace_stop"() : () -> ()
    %43 = vector.extract_strided_slice %42 {offsets = [0, 0, 0], sizes = [1, 16, 16], strides = [1, 1, 1]} : vector<2x16x16xf32> to vector<1x16x16xf32>
    %44 = vector.shape_cast %43 : vector<1x16x16xf32> to vector<16x16xf32>
    %45 = vector.extract_strided_slice %42 {offsets = [1, 0, 0], sizes = [1, 16, 16], strides = [1, 1, 1]} : vector<2x16x16xf32> to vector<1x16x16xf32>
    %46 = vector.shape_cast %45 : vector<1x16x16xf32> to vector<16x16xf32>
    %47 = tpu.concatenate %44, %46 in 1 : vector<16x16xf32>, vector<16x16xf32> -> vector<16x32xf32>
    %c0_16 = arith.constant 0 : index
    %c0_17 = arith.constant 0 : index
    %c0_18 = arith.constant 0 : index
    %48 = vector.load %arg7[%c0_16, %c0_17, %c0_18] : memref<2x32x32xf32, #tpu.memory_space<vmem>>, vector<1x32x32xf32>
    %49 = vector.shape_cast %48 : vector<1x32x32xf32> to vector<32x32xf32>
    %cst_19 = arith.constant dense<0.000000e+00> : vector<16x32xf32>
    %50 = tpu.matmul %47, %49, %cst_19 {dimension_numbers = #tpu.dot_dimension_numbers<[1], [0], [0], [1], [0, 0, 1, 1], [], []>} : vector<16x32xf32>, vector<32x32xf32>, vector<16x32xf32> -> vector<16x32xf32>
    %c0_20 = arith.constant 0 : index
    %c0_21 = arith.constant 0 : index
    %c0_22 = arith.constant 0 : index
    %51 = vector.load %arg8[%c0_20, %c0_21, %c0_22] : memref<2x1x32xf32, #tpu.memory_space<vmem>>, vector<1x1x32xf32>
    %52 = vector.shape_cast %51 : vector<1x1x32xf32> to vector<1x32xf32>
    %53 = vector.broadcast %52 : vector<1x32xf32> to vector<16x32xf32>
    %54 = arith.addf %50, %53 : vector<16x32xf32>
    %55 = arith.addf %1, %54 : vector<16x32xf32>
    %c0_23 = arith.constant 0 : index
    %c0_24 = arith.constant 0 : index
    %c0_25 = arith.constant 0 : index
    %56 = vector.load %arg9[%c0_23, %c0_24, %c0_25] : memref<2x1x32xf32, #tpu.memory_space<vmem>>, vector<1x1x32xf32>
    %57 = vector.shape_cast %56 : vector<1x1x32xf32> to vector<1x32xf32>
    %c0_26 = arith.constant 0 : index
    %c0_27 = arith.constant 0 : index
    %c0_28 = arith.constant 0 : index
    %58 = vector.load %arg10[%c0_26, %c0_27, %c0_28] : memref<2x1x32xf32, #tpu.memory_space<vmem>>, vector<1x1x32xf32>
    %59 = vector.shape_cast %58 : vector<1x1x32xf32> to vector<1x32xf32>
    %cst_29 = arith.constant dense<0.000000e+00> : vector<16xf32>
    %60 = vector.multi_reduction <add>, %55, %cst_29 [1] : vector<16x32xf32> to vector<16xf32>
    %61 = vector.shape_cast %60 : vector<16xf32> to vector<16x1xf32>
    %cst_30 = arith.constant 3.200000e+01 : f32
    %62 = vector.broadcast %cst_30 : f32 to vector<16x1xf32>
    %63 = arith.divf %61, %62 : vector<16x1xf32>
    %64 = vector.broadcast %63 : vector<16x1xf32> to vector<16x32xf32>
    %65 = arith.subf %55, %64 : vector<16x32xf32>
    %66 = arith.mulf %65, %65 : vector<16x32xf32>
    %cst_31 = arith.constant dense<0.000000e+00> : vector<16xf32>
    %67 = vector.multi_reduction <add>, %66, %cst_31 [1] : vector<16x32xf32> to vector<16xf32>
    %68 = vector.shape_cast %67 : vector<16xf32> to vector<16x1xf32>
    %cst_32 = arith.constant 3.200000e+01 : f32
    %69 = vector.broadcast %cst_32 : f32 to vector<16x1xf32>
    %70 = arith.divf %68, %69 : vector<16x1xf32>
    %71 = vector.broadcast %63 : vector<16x1xf32> to vector<16x32xf32>
    %72 = arith.subf %55, %71 : vector<16x32xf32>
    %cst_33 = arith.constant 9.99999996E-13 : f32
    %73 = vector.broadcast %cst_33 : f32 to vector<16x1xf32>
    %74 = arith.addf %70, %73 : vector<16x1xf32>
    %75 = math.rsqrt %74 : vector<16x1xf32>
    %76 = vector.broadcast %75 : vector<16x1xf32> to vector<16x32xf32>
    %77 = arith.mulf %72, %76 : vector<16x32xf32>
    %78 = vector.broadcast %57 : vector<1x32xf32> to vector<16x32xf32>
    %79 = arith.mulf %77, %78 : vector<16x32xf32>
    %80 = vector.broadcast %59 : vector<1x32xf32> to vector<16x32xf32>
    %81 = arith.addf %79, %80 : vector<16x32xf32>
    %c0_34 = arith.constant 0 : index
    %c0_35 = arith.constant 0 : index
    %c0_36 = arith.constant 0 : index
    %82 = vector.load %arg11[%c0_34, %c0_35, %c0_36] : memref<2x32x64xf32, #tpu.memory_space<vmem>>, vector<1x32x64xf32>
    %83 = vector.shape_cast %82 : vector<1x32x64xf32> to vector<32x64xf32>
    %cst_37 = arith.constant dense<0.000000e+00> : vector<16x64xf32>
    %84 = tpu.matmul %81, %83, %cst_37 {dimension_numbers = #tpu.dot_dimension_numbers<[1], [0], [0], [1], [0, 0, 1, 1], [], []>} : vector<16x32xf32>, vector<32x64xf32>, vector<16x64xf32> -> vector<16x64xf32>
    %c0_38 = arith.constant 0 : index
    %c0_39 = arith.constant 0 : index
    %c0_40 = arith.constant 0 : index
    %85 = vector.load %arg12[%c0_38, %c0_39, %c0_40] : memref<2x1x64xf32, #tpu.memory_space<vmem>>, vector<1x1x64xf32>
    %86 = vector.shape_cast %85 : vector<1x1x64xf32> to vector<1x64xf32>
    %87 = vector.broadcast %86 : vector<1x64xf32> to vector<16x64xf32>
    %88 = arith.addf %84, %87 : vector<16x64xf32>
    %cst_41 = arith.constant 5.000000e-01 : f32
    %89 = vector.broadcast %cst_41 : f32 to vector<16x64xf32>
    %90 = arith.mulf %89, %88 : vector<16x64xf32>
    %cst_42 = arith.constant 4.471500e-02 : f32
    %91 = vector.broadcast %cst_42 : f32 to vector<16x64xf32>
    %92 = arith.mulf %91, %88 : vector<16x64xf32>
    %93 = arith.mulf %92, %88 : vector<16x64xf32>
    %94 = arith.mulf %93, %88 : vector<16x64xf32>
    %95 = arith.addf %88, %94 : vector<16x64xf32>
    %cst_43 = arith.constant 0.797884583 : f32
    %96 = vector.broadcast %cst_43 : f32 to vector<16x64xf32>
    %97 = arith.mulf %96, %95 : vector<16x64xf32>
    %98 = math.tanh %97 : vector<16x64xf32>
    %cst_44 = arith.constant 1.000000e+00 : f32
    %99 = vector.broadcast %cst_44 : f32 to vector<16x64xf32>
    %100 = arith.addf %99, %98 : vector<16x64xf32>
    %101 = arith.mulf %90, %100 : vector<16x64xf32>
    %c0_45 = arith.constant 0 : index
    %c0_46 = arith.constant 0 : index
    %c0_47 = arith.constant 0 : index
    %102 = vector.load %arg13[%c0_45, %c0_46, %c0_47] : memref<2x64x32xf32, #tpu.memory_space<vmem>>, vector<1x64x32xf32>
    %103 = vector.shape_cast %102 : vector<1x64x32xf32> to vector<64x32xf32>
    %cst_48 = arith.constant dense<0.000000e+00> : vector<16x32xf32>
    %104 = tpu.matmul %101, %103, %cst_48 {dimension_numbers = #tpu.dot_dimension_numbers<[1], [0], [0], [1], [0, 0, 1, 1], [], []>} : vector<16x64xf32>, vector<64x32xf32>, vector<16x32xf32> -> vector<16x32xf32>
    %c0_49 = arith.constant 0 : index
    %c0_50 = arith.constant 0 : index
    %c0_51 = arith.constant 0 : index
    %105 = vector.load %arg14[%c0_49, %c0_50, %c0_51] : memref<2x1x32xf32, #tpu.memory_space<vmem>>, vector<1x1x32xf32>
    %106 = vector.shape_cast %105 : vector<1x1x32xf32> to vector<1x32xf32>
    %107 = vector.broadcast %106 : vector<1x32xf32> to vector<16x32xf32>
    %108 = arith.addf %104, %107 : vector<16x32xf32>
    %109 = arith.addf %81, %108 : vector<16x32xf32>
    %c0_52 = arith.constant 0 : index
    %c0_53 = arith.constant 0 : index
    %c0_54 = arith.constant 0 : index
    %110 = vector.load %arg15[%c0_52, %c0_53, %c0_54] : memref<2x1x32xf32, #tpu.memory_space<vmem>>, vector<1x1x32xf32>
    %111 = vector.shape_cast %110 : vector<1x1x32xf32> to vector<1x32xf32>
    %c0_55 = arith.constant 0 : index
    %c0_56 = arith.constant 0 : index
    %c0_57 = arith.constant 0 : index
    %112 = vector.load %arg16[%c0_55, %c0_56, %c0_57] : memref<2x1x32xf32, #tpu.memory_space<vmem>>, vector<1x1x32xf32>
    %113 = vector.shape_cast %112 : vector<1x1x32xf32> to vector<1x32xf32>
    %cst_58 = arith.constant dense<0.000000e+00> : vector<16xf32>
    %114 = vector.multi_reduction <add>, %109, %cst_58 [1] : vector<16x32xf32> to vector<16xf32>
    %115 = vector.shape_cast %114 : vector<16xf32> to vector<16x1xf32>
    %cst_59 = arith.constant 3.200000e+01 : f32
    %116 = vector.broadcast %cst_59 : f32 to vector<16x1xf32>
    %117 = arith.divf %115, %116 : vector<16x1xf32>
    %118 = vector.broadcast %117 : vector<16x1xf32> to vector<16x32xf32>
    %119 = arith.subf %109, %118 : vector<16x32xf32>
    %120 = arith.mulf %119, %119 : vector<16x32xf32>
    %cst_60 = arith.constant dense<0.000000e+00> : vector<16xf32>
    %121 = vector.multi_reduction <add>, %120, %cst_60 [1] : vector<16x32xf32> to vector<16xf32>
    %122 = vector.shape_cast %121 : vector<16xf32> to vector<16x1xf32>
    %cst_61 = arith.constant 3.200000e+01 : f32
    %123 = vector.broadcast %cst_61 : f32 to vector<16x1xf32>
    %124 = arith.divf %122, %123 : vector<16x1xf32>
    %125 = vector.broadcast %117 : vector<16x1xf32> to vector<16x32xf32>
    %126 = arith.subf %109, %125 : vector<16x32xf32>
    %cst_62 = arith.constant 9.99999996E-13 : f32
    %127 = vector.broadcast %cst_62 : f32 to vector<16x1xf32>
    %128 = arith.addf %124, %127 : vector<16x1xf32>
    %129 = math.rsqrt %128 : vector<16x1xf32>
    %130 = vector.broadcast %129 : vector<16x1xf32> to vector<16x32xf32>
    %131 = arith.mulf %126, %130 : vector<16x32xf32>
    %132 = vector.broadcast %111 : vector<1x32xf32> to vector<16x32xf32>
    %133 = arith.mulf %131, %132 : vector<16x32xf32>
    %134 = vector.broadcast %113 : vector<1x32xf32> to vector<16x32xf32>
    %135 = arith.addf %133, %134 : vector<16x32xf32>
    %c1 = arith.constant 1 : index
    %c0_63 = arith.constant 0 : index
    %c0_64 = arith.constant 0 : index
    %136 = vector.load %arg5[%c1, %c0_63, %c0_64] : memref<2x32x96xf32, #tpu.memory_space<vmem>>, vector<1x32x96xf32>
    %137 = vector.shape_cast %136 : vector<1x32x96xf32> to vector<32x96xf32>
    %cst_65 = arith.constant dense<0.000000e+00> : vector<16x96xf32>
    %138 = tpu.matmul %135, %137, %cst_65 {dimension_numbers = #tpu.dot_dimension_numbers<[1], [0], [0], [1], [0, 0, 1, 1], [], []>} : vector<16x32xf32>, vector<32x96xf32>, vector<16x96xf32> -> vector<16x96xf32>
    %c1_66 = arith.constant 1 : index
    %c0_67 = arith.constant 0 : index
    %c0_68 = arith.constant 0 : index
    %139 = vector.load %arg6[%c1_66, %c0_67, %c0_68] : memref<2x1x96xf32, #tpu.memory_space<vmem>>, vector<1x1x96xf32>
    %140 = vector.shape_cast %139 : vector<1x1x96xf32> to vector<1x96xf32>
    %141 = vector.broadcast %140 : vector<1x96xf32> to vector<16x96xf32>
    %142 = arith.addf %138, %141 : vector<16x96xf32>
    %143 = vector.extract_strided_slice %142 {offsets = [0, 0], sizes = [16, 16], strides = [1, 1]} : vector<16x96xf32> to vector<16x16xf32>
    %144 = vector.extract_strided_slice %142 {offsets = [0, 16], sizes = [16, 16], strides = [1, 1]} : vector<16x96xf32> to vector<16x16xf32>
    %145 = vector.shape_cast %143 : vector<16x16xf32> to vector<1x16x16xf32>
    %146 = vector.shape_cast %144 : vector<16x16xf32> to vector<1x16x16xf32>
    %147 = tpu.concatenate %145, %146 in 0 : vector<1x16x16xf32>, vector<1x16x16xf32> -> vector<2x16x16xf32>
    %148 = vector.extract_strided_slice %142 {offsets = [0, 32], sizes = [16, 16], strides = [1, 1]} : vector<16x96xf32> to vector<16x16xf32>
    %149 = vector.extract_strided_slice %142 {offsets = [0, 48], sizes = [16, 16], strides = [1, 1]} : vector<16x96xf32> to vector<16x16xf32>
    %150 = vector.shape_cast %148 : vector<16x16xf32> to vector<1x16x16xf32>
    %151 = vector.shape_cast %149 : vector<16x16xf32> to vector<1x16x16xf32>
    %152 = tpu.concatenate %150, %151 in 0 : vector<1x16x16xf32>, vector<1x16x16xf32> -> vector<2x16x16xf32>
    %153 = vector.extract_strided_slice %142 {offsets = [0, 64], sizes = [16, 16], strides = [1, 1]} : vector<16x96xf32> to vector<16x16xf32>
    %154 = vector.extract_strided_slice %142 {offsets = [0, 80], sizes = [16, 16], strides = [1, 1]} : vector<16x96xf32> to vector<16x16xf32>
    %155 = vector.shape_cast %153 : vector<16x16xf32> to vector<1x16x16xf32>
    %156 = vector.shape_cast %154 : vector<16x16xf32> to vector<1x16x16xf32>
    %157 = tpu.concatenate %155, %156 in 0 : vector<1x16x16xf32>, vector<1x16x16xf32> -> vector<2x16x16xf32>
    "tpu.trace_start"() <{level = 10 : i32, message = "hsd,htd->hst"}> : () -> ()
    %cst_69 = arith.constant dense<0.000000e+00> : vector<2x16x16xf32>
    %158 = tpu.matmul %147, %152, %cst_69 {dimension_numbers = #tpu.dot_dimension_numbers<[2], [2], [1], [1], [0, 0, 0, 1, 1, 1], [0], [0]>} : vector<2x16x16xf32>, vector<2x16x16xf32>, vector<2x16x16xf32> -> vector<2x16x16xf32>
    "tpu.trace_stop"() : () -> ()
    %cst_70 = arith.constant 2.500000e-01 : f32
    %159 = vector.broadcast %cst_70 : f32 to vector<2x16x16xf32>
    %160 = arith.mulf %158, %159 : vector<2x16x16xf32>
    %161 = vector.shape_cast %3 : vector<1x16xf32> to vector<1x1x16xf32>
    %162 = vector.broadcast %161 : vector<1x1x16xf32> to vector<2x16x16xf32>
    %163 = arith.addf %160, %162 : vector<2x16x16xf32>
    %cst_71 = arith.constant dense<0xFF800000> : vector<2x16xf32>
    %164 = vector.multi_reduction <maximumf>, %163, %cst_71 [2] : vector<2x16x16xf32> to vector<2x16xf32>
    %165 = vector.shape_cast %164 : vector<2x16xf32> to vector<2x16x1xf32>
    %166 = vector.broadcast %165 : vector<2x16x1xf32> to vector<2x16x16xf32>
    %167 = arith.subf %163, %166 : vector<2x16x16xf32>
    %168 = math.exp %167 : vector<2x16x16xf32>
    %cst_72 = arith.constant dense<0.000000e+00> : vector<2x16xf32>
    %169 = vector.multi_reduction <add>, %168, %cst_72 [2] : vector<2x16x16xf32> to vector<2x16xf32>
    %170 = vector.shape_cast %169 : vector<2x16xf32> to vector<2x16x1xf32>
    %171 = tpu.reciprocal %170 {approx = true} : vector<2x16x1xf32> -> vector<2x16x1xf32>
    %172 = vector.broadcast %171 : vector<2x16x1xf32> to vector<2x16x16xf32>
    %173 = arith.mulf %168, %172 : vector<2x16x16xf32>
    "tpu.trace_start"() <{level = 10 : i32, message = "hst,htd->hsd"}> : () -> ()
    %cst_73 = arith.constant dense<0.000000e+00> : vector<2x16x16xf32>
    %174 = tpu.matmul %173, %157, %cst_73 {dimension_numbers = #tpu.dot_dimension_numbers<[2], [1], [1], [2], [0, 0, 0, 1, 1, 2], [0], [0]>} : vector<2x16x16xf32>, vector<2x16x16xf32>, vector<2x16x16xf32> -> vector<2x16x16xf32>
    "tpu.trace_stop"() : () -> ()
    %175 = vector.extract_strided_slice %174 {offsets = [0, 0, 0], sizes = [1, 16, 16], strides = [1, 1, 1]} : vector<2x16x16xf32> to vector<1x16x16xf32>
    %176 = vector.shape_cast %175 : vector<1x16x16xf32> to vector<16x16xf32>
    %177 = vector.extract_strided_slice %174 {offsets = [1, 0, 0], sizes = [1, 16, 16], strides = [1, 1, 1]} : vector<2x16x16xf32> to vector<1x16x16xf32>
    %178 = vector.shape_cast %177 : vector<1x16x16xf32> to vector<16x16xf32>
    %179 = tpu.concatenate %176, %178 in 1 : vector<16x16xf32>, vector<16x16xf32> -> vector<16x32xf32>
    %c1_74 = arith.constant 1 : index
    %c0_75 = arith.constant 0 : index
    %c0_76 = arith.constant 0 : index
    %180 = vector.load %arg7[%c1_74, %c0_75, %c0_76] : memref<2x32x32xf32, #tpu.memory_space<vmem>>, vector<1x32x32xf32>
    %181 = vector.shape_cast %180 : vector<1x32x32xf32> to vector<32x32xf32>
    %cst_77 = arith.constant dense<0.000000e+00> : vector<16x32xf32>
    %182 = tpu.matmul %179, %181, %cst_77 {dimension_numbers = #tpu.dot_dimension_numbers<[1], [0], [0], [1], [0, 0, 1, 1], [], []>} : vector<16x32xf32>, vector<32x32xf32>, vector<16x32xf32> -> vector<16x32xf32>
    %c1_78 = arith.constant 1 : index
    %c0_79 = arith.constant 0 : index
    %c0_80 = arith.constant 0 : index
    %183 = vector.load %arg8[%c1_78, %c0_79, %c0_80] : memref<2x1x32xf32, #tpu.memory_space<vmem>>, vector<1x1x32xf32>
    %184 = vector.shape_cast %183 : vector<1x1x32xf32> to vector<1x32xf32>
    %185 = vector.broadcast %184 : vector<1x32xf32> to vector<16x32xf32>
    %186 = arith.addf %182, %185 : vector<16x32xf32>
    %187 = arith.addf %135, %186 : vector<16x32xf32>
    %c1_81 = arith.constant 1 : index
    %c0_82 = arith.constant 0 : index
    %c0_83 = arith.constant 0 : index
    %188 = vector.load %arg9[%c1_81, %c0_82, %c0_83] : memref<2x1x32xf32, #tpu.memory_space<vmem>>, vector<1x1x32xf32>
    %189 = vector.shape_cast %188 : vector<1x1x32xf32> to vector<1x32xf32>
    %c1_84 = arith.constant 1 : index
    %c0_85 = arith.constant 0 : index
    %c0_86 = arith.constant 0 : index
    %190 = vector.load %arg10[%c1_84, %c0_85, %c0_86] : memref<2x1x32xf32, #tpu.memory_space<vmem>>, vector<1x1x32xf32>
    %191 = vector.shape_cast %190 : vector<1x1x32xf32> to vector<1x32xf32>
    %cst_87 = arith.constant dense<0.000000e+00> : vector<16xf32>
    %192 = vector.multi_reduction <add>, %187, %cst_87 [1] : vector<16x32xf32> to vector<16xf32>
    %193 = vector.shape_cast %192 : vector<16xf32> to vector<16x1xf32>
    %cst_88 = arith.constant 3.200000e+01 : f32
    %194 = vector.broadcast %cst_88 : f32 to vector<16x1xf32>
    %195 = arith.divf %193, %194 : vector<16x1xf32>
    %196 = vector.broadcast %195 : vector<16x1xf32> to vector<16x32xf32>
    %197 = arith.subf %187, %196 : vector<16x32xf32>
    %198 = arith.mulf %197, %197 : vector<16x32xf32>
    %cst_89 = arith.constant dense<0.000000e+00> : vector<16xf32>
    %199 = vector.multi_reduction <add>, %198, %cst_89 [1] : vector<16x32xf32> to vector<16xf32>
    %200 = vector.shape_cast %199 : vector<16xf32> to vector<16x1xf32>
    %cst_90 = arith.constant 3.200000e+01 : f32
    %201 = vector.broadcast %cst_90 : f32 to vector<16x1xf32>
    %202 = arith.divf %200, %201 : vector<16x1xf32>
    %203 = vector.broadcast %195 : vector<16x1xf32> to vector<16x32xf32>
    %204 = arith.subf %187, %203 : vector<16x32xf32>
    %cst_91 = arith.constant 9.99999996E-13 : f32
    %205 = vector.broadcast %cst_91 : f32 to vector<16x1xf32>
    %206 = arith.addf %202, %205 : vector<16x1xf32>
    %207 = math.rsqrt %206 : vector<16x1xf32>
    %208 = vector.broadcast %207 : vector<16x1xf32> to vector<16x32xf32>
    %209 = arith.mulf %204, %208 : vector<16x32xf32>
    %210 = vector.broadcast %189 : vector<1x32xf32> to vector<16x32xf32>
    %211 = arith.mulf %209, %210 : vector<16x32xf32>
    %212 = vector.broadcast %191 : vector<1x32xf32> to vector<16x32xf32>
    %213 = arith.addf %211, %212 : vector<16x32xf32>
    %c1_92 = arith.constant 1 : index
    %c0_93 = arith.constant 0 : index
    %c0_94 = arith.constant 0 : index
    %214 = vector.load %arg11[%c1_92, %c0_93, %c0_94] : memref<2x32x64xf32, #tpu.memory_space<vmem>>, vector<1x32x64xf32>
    %215 = vector.shape_cast %214 : vector<1x32x64xf32> to vector<32x64xf32>
    %cst_95 = arith.constant dense<0.000000e+00> : vector<16x64xf32>
    %216 = tpu.matmul %213, %215, %cst_95 {dimension_numbers = #tpu.dot_dimension_numbers<[1], [0], [0], [1], [0, 0, 1, 1], [], []>} : vector<16x32xf32>, vector<32x64xf32>, vector<16x64xf32> -> vector<16x64xf32>
    %c1_96 = arith.constant 1 : index
    %c0_97 = arith.constant 0 : index
    %c0_98 = arith.constant 0 : index
    %217 = vector.load %arg12[%c1_96, %c0_97, %c0_98] : memref<2x1x64xf32, #tpu.memory_space<vmem>>, vector<1x1x64xf32>
    %218 = vector.shape_cast %217 : vector<1x1x64xf32> to vector<1x64xf32>
    %219 = vector.broadcast %218 : vector<1x64xf32> to vector<16x64xf32>
    %220 = arith.addf %216, %219 : vector<16x64xf32>
    %cst_99 = arith.constant 5.000000e-01 : f32
    %221 = vector.broadcast %cst_99 : f32 to vector<16x64xf32>
    %222 = arith.mulf %221, %220 : vector<16x64xf32>
    %cst_100 = arith.constant 4.471500e-02 : f32
    %223 = vector.broadcast %cst_100 : f32 to vector<16x64xf32>
    %224 = arith.mulf %223, %220 : vector<16x64xf32>
    %225 = arith.mulf %224, %220 : vector<16x64xf32>
    %226 = arith.mulf %225, %220 : vector<16x64xf32>
    %227 = arith.addf %220, %226 : vector<16x64xf32>
    %cst_101 = arith.constant 0.797884583 : f32
    %228 = vector.broadcast %cst_101 : f32 to vector<16x64xf32>
    %229 = arith.mulf %228, %227 : vector<16x64xf32>
    %230 = math.tanh %229 : vector<16x64xf32>
    %cst_102 = arith.constant 1.000000e+00 : f32
    %231 = vector.broadcast %cst_102 : f32 to vector<16x64xf32>
    %232 = arith.addf %231, %230 : vector<16x64xf32>
    %233 = arith.mulf %222, %232 : vector<16x64xf32>
    %c1_103 = arith.constant 1 : index
    %c0_104 = arith.constant 0 : index
    %c0_105 = arith.constant 0 : index
    %234 = vector.load %arg13[%c1_103, %c0_104, %c0_105] : memref<2x64x32xf32, #tpu.memory_space<vmem>>, vector<1x64x32xf32>
    %235 = vector.shape_cast %234 : vector<1x64x32xf32> to vector<64x32xf32>
    %cst_106 = arith.constant dense<0.000000e+00> : vector<16x32xf32>
    %236 = tpu.matmul %233, %235, %cst_106 {dimension_numbers = #tpu.dot_dimension_numbers<[1], [0], [0], [1], [0, 0, 1, 1], [], []>} : vector<16x64xf32>, vector<64x32xf32>, vector<16x32xf32> -> vector<16x32xf32>
    %c1_107 = arith.constant 1 : index
    %c0_108 = arith.constant 0 : index
    %c0_109 = arith.constant 0 : index
    %237 = vector.load %arg14[%c1_107, %c0_108, %c0_109] : memref<2x1x32xf32, #tpu.memory_space<vmem>>, vector<1x1x32xf32>
    %238 = vector.shape_cast %237 : vector<1x1x32xf32> to vector<1x32xf32>
    %239 = vector.broadcast %238 : vector<1x32xf32> to vector<16x32xf32>
    %240 = arith.addf %236, %239 : vector<16x32xf32>
    %241 = arith.addf %213, %240 : vector<16x32xf32>
    %c1_110 = arith.constant 1 : index
    %c0_111 = arith.constant 0 : index
    %c0_112 = arith.constant 0 : index
    %242 = vector.load %arg15[%c1_110, %c0_111, %c0_112] : memref<2x1x32xf32, #tpu.memory_space<vmem>>, vector<1x1x32xf32>
    %243 = vector.shape_cast %242 : vector<1x1x32xf32> to vector<1x32xf32>
    %c1_113 = arith.constant 1 : index
    %c0_114 = arith.constant 0 : index
    %c0_115 = arith.constant 0 : index
    %244 = vector.load %arg16[%c1_113, %c0_114, %c0_115] : memref<2x1x32xf32, #tpu.memory_space<vmem>>, vector<1x1x32xf32>
    %245 = vector.shape_cast %244 : vector<1x1x32xf32> to vector<1x32xf32>
    %cst_116 = arith.constant dense<0.000000e+00> : vector<16xf32>
    %246 = vector.multi_reduction <add>, %241, %cst_116 [1] : vector<16x32xf32> to vector<16xf32>
    %247 = vector.shape_cast %246 : vector<16xf32> to vector<16x1xf32>
    %cst_117 = arith.constant 3.200000e+01 : f32
    %248 = vector.broadcast %cst_117 : f32 to vector<16x1xf32>
    %249 = arith.divf %247, %248 : vector<16x1xf32>
    %250 = vector.broadcast %249 : vector<16x1xf32> to vector<16x32xf32>
    %251 = arith.subf %241, %250 : vector<16x32xf32>
    %252 = arith.mulf %251, %251 : vector<16x32xf32>
    %cst_118 = arith.constant dense<0.000000e+00> : vector<16xf32>
    %253 = vector.multi_reduction <add>, %252, %cst_118 [1] : vector<16x32xf32> to vector<16xf32>
    %254 = vector.shape_cast %253 : vector<16xf32> to vector<16x1xf32>
    %cst_119 = arith.constant 3.200000e+01 : f32
    %255 = vector.broadcast %cst_119 : f32 to vector<16x1xf32>
    %256 = arith.divf %254, %255 : vector<16x1xf32>
    %257 = vector.broadcast %249 : vector<16x1xf32> to vector<16x32xf32>
    %258 = arith.subf %241, %257 : vector<16x32xf32>
    %cst_120 = arith.constant 9.99999996E-13 : f32
    %259 = vector.broadcast %cst_120 : f32 to vector<16x1xf32>
    %260 = arith.addf %256, %259 : vector<16x1xf32>
    %261 = math.rsqrt %260 : vector<16x1xf32>
    %262 = vector.broadcast %261 : vector<16x1xf32> to vector<16x32xf32>
    %263 = arith.mulf %258, %262 : vector<16x32xf32>
    %264 = vector.broadcast %243 : vector<1x32xf32> to vector<16x32xf32>
    %265 = arith.mulf %263, %264 : vector<16x32xf32>
    %266 = vector.broadcast %245 : vector<1x32xf32> to vector<16x32xf32>
    %267 = arith.addf %265, %266 : vector<16x32xf32>
    %c0_121 = arith.constant 0 : index
    %c0_122 = arith.constant 0 : index
    %268 = vector.load %arg17[%c0_121, %c0_122] : memref<32x144xf32, #tpu.memory_space<vmem>>, vector<32x144xf32>
    %cst_123 = arith.constant dense<0.000000e+00> : vector<16x144xf32>
    %269 = tpu.matmul %267, %268, %cst_123 {dimension_numbers = #tpu.dot_dimension_numbers<[1], [0], [0], [1], [0, 0, 1, 1], [], []>} : vector<16x32xf32>, vector<32x144xf32>, vector<16x144xf32> -> vector<16x144xf32>
    %c0_124 = arith.constant 0 : index
    %c0_125 = arith.constant 0 : index
    %270 = vector.load %arg18[%c0_124, %c0_125] : memref<1x144xf32, #tpu.memory_space<vmem>>, vector<1x144xf32>
    %271 = vector.broadcast %270 : vector<1x144xf32> to vector<16x144xf32>
    %272 = arith.addf %269, %271 : vector<16x144xf32>
    %c0_126 = arith.constant 0 : index
    %c0_127 = arith.constant 0 : index
    %273 = vector.load %arg19[%c0_126, %c0_127] : memref<32x144xf32, #tpu.memory_space<vmem>>, vector<32x144xf32>
    %cst_128 = arith.constant dense<0.000000e+00> : vector<16x144xf32>
    %274 = tpu.matmul %267, %273, %cst_128 {dimension_numbers = #tpu.dot_dimension_numbers<[1], [0], [0], [1], [0, 0, 1, 1], [], []>} : vector<16x32xf32>, vector<32x144xf32>, vector<16x144xf32> -> vector<16x144xf32>
    %c0_129 = arith.constant 0 : index
    %c0_130 = arith.constant 0 : index
    %275 = vector.load %arg20[%c0_129, %c0_130] : memref<1x144xf32, #tpu.memory_space<vmem>>, vector<1x144xf32>
    %276 = vector.broadcast %275 : vector<1x144xf32> to vector<16x144xf32>
    %277 = arith.addf %274, %276 : vector<16x144xf32>
    %c0_131 = arith.constant 0 : index
    %c0_132 = arith.constant 0 : index
    %278 = vector.load %arg21[%c0_131, %c0_132] : memref<16x144xf32, #tpu.memory_space<vmem>>, vector<16x144xf32>
    %279 = arith.mulf %272, %278 : vector<16x144xf32>
    %c0_133 = arith.constant 0 : index
    %c0_134 = arith.constant 0 : index
    %280 = vector.load %arg22[%c0_133, %c0_134] : memref<16x144xf32, #tpu.memory_space<vmem>>, vector<16x144xf32>
    %281 = arith.mulf %277, %280 : vector<16x144xf32>
    %282 = arith.addf %279, %281 : vector<16x144xf32>
    %283 = vector.extract_strided_slice %282 {offsets = [0, 0], sizes = [16, 8], strides = [1, 1]} : vector<16x144xf32> to vector<16x8xf32>
    %284 = vector.extract_strided_slice %282 {offsets = [0, 16], sizes = [16, 8], strides = [1, 1]} : vector<16x144xf32> to vector<16x8xf32>
    %285 = vector.extract_strided_slice %282 {offsets = [0, 32], sizes = [16, 8], strides = [1, 1]} : vector<16x144xf32> to vector<16x8xf32>
    %286 = vector.extract_strided_slice %282 {offsets = [0, 48], sizes = [16, 8], strides = [1, 1]} : vector<16x144xf32> to vector<16x8xf32>
    %287 = vector.extract_strided_slice %282 {offsets = [0, 64], sizes = [16, 8], strides = [1, 1]} : vector<16x144xf32> to vector<16x8xf32>
    %288 = vector.extract_strided_slice %282 {offsets = [0, 80], sizes = [16, 8], strides = [1, 1]} : vector<16x144xf32> to vector<16x8xf32>
    %289 = vector.extract_strided_slice %282 {offsets = [0, 96], sizes = [16, 8], strides = [1, 1]} : vector<16x144xf32> to vector<16x8xf32>
    %290 = vector.extract_strided_slice %282 {offsets = [0, 112], sizes = [16, 8], strides = [1, 1]} : vector<16x144xf32> to vector<16x8xf32>
    %291 = vector.extract_strided_slice %282 {offsets = [0, 128], sizes = [16, 8], strides = [1, 1]} : vector<16x144xf32> to vector<16x8xf32>
    %292 = vector.shape_cast %283 : vector<16x8xf32> to vector<1x16x8xf32>
    %293 = vector.shape_cast %284 : vector<16x8xf32> to vector<1x16x8xf32>
    %294 = vector.shape_cast %285 : vector<16x8xf32> to vector<1x16x8xf32>
    %295 = vector.shape_cast %286 : vector<16x8xf32> to vector<1x16x8xf32>
    %296 = vector.shape_cast %287 : vector<16x8xf32> to vector<1x16x8xf32>
    %297 = vector.shape_cast %288 : vector<16x8xf32> to vector<1x16x8xf32>
    %298 = vector.shape_cast %289 : vector<16x8xf32> to vector<1x16x8xf32>
    %299 = vector.shape_cast %290 : vector<16x8xf32> to vector<1x16x8xf32>
    %300 = vector.shape_cast %291 : vector<16x8xf32> to vector<1x16x8xf32>
    %301 = tpu.concatenate %292, %293, %294, %295, %296, %297, %298, %299, %300 in 0 : vector<1x16x8xf32>, vector<1x16x8xf32>, vector<1x16x8xf32>, vector<1x16x8xf32>, vector<1x16x8xf32>, vector<1x16x8xf32>, vector<1x16x8xf32>, vector<1x16x8xf32>, vector<1x16x8xf32> -> vector<9x16x8xf32>
    %302 = vector.extract_strided_slice %282 {offsets = [0, 8], sizes = [16, 8], strides = [1, 1]} : vector<16x144xf32> to vector<16x8xf32>
    %303 = vector.extract_strided_slice %282 {offsets = [0, 24], sizes = [16, 8], strides = [1, 1]} : vector<16x144xf32> to vector<16x8xf32>
    %304 = vector.extract_strided_slice %282 {offsets = [0, 40], sizes = [16, 8], strides = [1, 1]} : vector<16x144xf32> to vector<16x8xf32>
    %305 = vector.extract_strided_slice %282 {offsets = [0, 56], sizes = [16, 8], strides = [1, 1]} : vector<16x144xf32> to vector<16x8xf32>
    %306 = vector.extract_strided_slice %282 {offsets = [0, 72], sizes = [16, 8], strides = [1, 1]} : vector<16x144xf32> to vector<16x8xf32>
    %307 = vector.extract_strided_slice %282 {offsets = [0, 88], sizes = [16, 8], strides = [1, 1]} : vector<16x144xf32> to vector<16x8xf32>
    %308 = vector.extract_strided_slice %282 {offsets = [0, 104], sizes = [16, 8], strides = [1, 1]} : vector<16x144xf32> to vector<16x8xf32>
    %309 = vector.extract_strided_slice %282 {offsets = [0, 120], sizes = [16, 8], strides = [1, 1]} : vector<16x144xf32> to vector<16x8xf32>
    %310 = vector.extract_strided_slice %282 {offsets = [0, 136], sizes = [16, 8], strides = [1, 1]} : vector<16x144xf32> to vector<16x8xf32>
    %311 = vector.shape_cast %302 : vector<16x8xf32> to vector<1x16x8xf32>
    %312 = vector.shape_cast %303 : vector<16x8xf32> to vector<1x16x8xf32>
    %313 = vector.shape_cast %304 : vector<16x8xf32> to vector<1x16x8xf32>
    %314 = vector.shape_cast %305 : vector<16x8xf32> to vector<1x16x8xf32>
    %315 = vector.shape_cast %306 : vector<16x8xf32> to vector<1x16x8xf32>
    %316 = vector.shape_cast %307 : vector<16x8xf32> to vector<1x16x8xf32>
    %317 = vector.shape_cast %308 : vector<16x8xf32> to vector<1x16x8xf32>
    %318 = vector.shape_cast %309 : vector<16x8xf32> to vector<1x16x8xf32>
    %319 = vector.shape_cast %310 : vector<16x8xf32> to vector<1x16x8xf32>
    %320 = tpu.concatenate %311, %312, %313, %314, %315, %316, %317, %318, %319 in 0 : vector<1x16x8xf32>, vector<1x16x8xf32>, vector<1x16x8xf32>, vector<1x16x8xf32>, vector<1x16x8xf32>, vector<1x16x8xf32>, vector<1x16x8xf32>, vector<1x16x8xf32>, vector<1x16x8xf32> -> vector<9x16x8xf32>
    "tpu.trace_start"() <{level = 10 : i32, message = "csd,ctd->cst"}> : () -> ()
    %cst_135 = arith.constant dense<0.000000e+00> : vector<9x16x16xf32>
    %321 = tpu.matmul %301, %320, %cst_135 {dimension_numbers = #tpu.dot_dimension_numbers<[2], [2], [1], [1], [0, 0, 0, 1, 1, 1], [0], [0]>} : vector<9x16x8xf32>, vector<9x16x8xf32>, vector<9x16x16xf32> -> vector<9x16x16xf32>
    "tpu.trace_stop"() : () -> ()
    %c0_136 = arith.constant 0 : index
    %c0_137 = arith.constant 0 : index
    %c0_138 = arith.constant 0 : index
    %322 = vector.load %arg4[%c0_136, %c0_137, %c0_138] : memref<1x16x1xf32, #tpu.memory_space<vmem>>, vector<1x16x1xf32>
    %323 = vector.shape_cast %322 : vector<1x16x1xf32> to vector<16x1xf32>
    %c0_139 = arith.constant 0 : index
    %c0_140 = arith.constant 0 : index
    %c0_141 = arith.constant 0 : index
    %324 = vector.load %arg3[%c0_139, %c0_140, %c0_141] : memref<1x1x16xf32, #tpu.memory_space<vmem>>, vector<1x1x16xf32>
    %325 = vector.shape_cast %324 : vector<1x1x16xf32> to vector<1x16xf32>
    %326 = vector.shape_cast %323 : vector<16x1xf32> to vector<1x16x1xf32>
    %327 = vector.broadcast %326 : vector<1x16x1xf32> to vector<9x16x16xf32>
    %328 = arith.mulf %321, %327 : vector<9x16x16xf32>
    %cst_142 = arith.constant 1.000000e+00 : f32
    %329 = vector.broadcast %cst_142 : f32 to vector<16x1xf32>
    %330 = arith.subf %329, %323 : vector<16x1xf32>
    %cst_143 = arith.constant -9.99999995E+11 : f32
    %331 = vector.broadcast %cst_143 : f32 to vector<16x1xf32>
    %332 = arith.mulf %331, %330 : vector<16x1xf32>
    %333 = vector.shape_cast %332 : vector<16x1xf32> to vector<1x16x1xf32>
    %334 = vector.broadcast %333 : vector<1x16x1xf32> to vector<9x16x16xf32>
    %335 = arith.addf %328, %334 : vector<9x16x16xf32>
    %336 = vector.shape_cast %325 : vector<1x16xf32> to vector<1x1x16xf32>
    %337 = vector.broadcast %336 : vector<1x1x16xf32> to vector<9x16x16xf32>
    %338 = arith.mulf %335, %337 : vector<9x16x16xf32>
    %cst_144 = arith.constant 1.000000e+00 : f32
    %339 = vector.broadcast %cst_144 : f32 to vector<1x16xf32>
    %340 = arith.subf %339, %325 : vector<1x16xf32>
    %cst_145 = arith.constant -9.99999995E+11 : f32
    %341 = vector.broadcast %cst_145 : f32 to vector<1x16xf32>
    %342 = arith.mulf %341, %340 : vector<1x16xf32>
    %343 = vector.shape_cast %342 : vector<1x16xf32> to vector<1x1x16xf32>
    %344 = vector.broadcast %343 : vector<1x1x16xf32> to vector<9x16x16xf32>
    %345 = arith.addf %338, %344 : vector<9x16x16xf32>
    %346 = tpu.iota {dimensions = array<i32: 0>} : vector<16x16xi32>
    %347 = tpu.iota {dimensions = array<i32: 1>} : vector<16x16xi32>
    %348 = arith.cmpi sgt, %346, %347 : vector<16x16xi32>
    %349 = arith.extui %348 : vector<16x16xi1> to vector<16x16xi32>
    %350 = arith.sitofp %349 : vector<16x16xi32> to vector<16x16xf32>
    %cst_146 = arith.constant 9.99999995E+11 : f32
    %351 = vector.broadcast %cst_146 : f32 to vector<16x16xf32>
    %352 = arith.mulf %350, %351 : vector<16x16xf32>
    %353 = vector.shape_cast %352 : vector<16x16xf32> to vector<1x16x16xf32>
    %354 = vector.broadcast %353 : vector<1x16x16xf32> to vector<9x16x16xf32>
    %355 = arith.subf %345, %354 : vector<9x16x16xf32>
    %cst_147 = arith.constant 0.353553385 : f32
    %356 = vector.broadcast %cst_147 : f32 to vector<9x16x16xf32>
    %357 = arith.mulf %355, %356 : vector<9x16x16xf32>
    %c0_148 = arith.constant 0 : index
    %c0_149 = arith.constant 0 : index
    %c0_150 = arith.constant 0 : index
    %c0_151 = arith.constant 0 : index
    %358 = vector.load %arg23[%c0_148, %c0_149, %c0_150, %c0_151] : memref<1x9x16x16xf32, #tpu.memory_space<vmem>>, vector<1x9x16x16xf32>
    %359 = vector.shape_cast %358 : vector<1x9x16x16xf32> to vector<9x16x16xf32>
    %360 = vector.shape_cast %357 : vector<9x16x16xf32> to vector<1x9x16x16xf32>
    tpu.vector_store %arg23[%c0_148, %c0_149, %c0_150, %c0_151], %360 {strides = array<i32>} : memref<1x9x16x16xf32, #tpu.memory_space<vmem>>, vector<1x9x16x16xf32>,
    return
  }
  func.func @transform_0(%arg0: i32) -> (i32, i32, i32) {
    %c0_i32 = arith.constant 0 : i32
    %c0_i32_0 = arith.constant 0 : i32
    %c0_i32_1 = arith.constant 0 : i32
    return %arg0, %c0_i32, %c0_i32_0 : i32, i32, i32
  }
  func.func @transform_1(%arg0: i32) -> (i32, i32, i32) {
    %c0_i32 = arith.constant 0 : i32
    %c0_i32_0 = arith.constant 0 : i32
    %c0_i32_1 = arith.constant 0 : i32
    return %arg0, %c0_i32, %c0_i32_0 : i32, i32, i32
  }
  func.func @transform_2(%arg0: i32) -> (i32, i32, i32) {
    %c0_i32 = arith.constant 0 : i32
    %c0_i32_0 = arith.constant 0 : i32
    %c0_i32_1 = arith.constant 0 : i32
    return %arg0, %c0_i32, %c0_i32_0 : i32, i32, i32
  }
  func.func @transform_3(%arg0: i32) -> (i32, i32, i32) {
    %c0_i32 = arith.constant 0 : i32
    %c0_i32_0 = arith.constant 0 : i32
    %c0_i32_1 = arith.constant 0 : i32
    return %arg0, %c0_i32, %c0_i32_0 : i32, i32, i32
  }
  func.func @transform_4(%arg0: i32) -> (i32, i32, i32) {
    %c0_i32 = arith.constant 0 : i32
    %c0_i32_0 = arith.constant 0 : i32
    %c0_i32_1 = arith.constant 0 : i32
    %c0_i32_2 = arith.constant 0 : i32
    return %c0_i32, %c0_i32_0, %c0_i32_1 : i32, i32, i32
  }
  func.func @transform_5(%arg0: i32) -> (i32, i32, i32) {
    %c0_i32 = arith.constant 0 : i32
    %c0_i32_0 = arith.constant 0 : i32
    %c0_i32_1 = arith.constant 0 : i32
    %c0_i32_2 = arith.constant 0 : i32
    return %c0_i32, %c0_i32_0, %c0_i32_1 : i32, i32, i32
  }
  func.func @transform_6(%arg0: i32) -> (i32, i32, i32) {
    %c0_i32 = arith.constant 0 : i32
    %c0_i32_0 = arith.constant 0 : i32
    %c0_i32_1 = arith.constant 0 : i32
    %c0_i32_2 = arith.constant 0 : i32
    return %c0_i32, %c0_i32_0, %c0_i32_1 : i32, i32, i32
  }
  func.func @transform_7(%arg0: i32) -> (i32, i32, i32) {
    %c0_i32 = arith.constant 0 : i32
    %c0_i32_0 = arith.constant 0 : i32
    %c0_i32_1 = arith.constant 0 : i32
    %c0_i32_2 = arith.constant 0 : i32
    return %c0_i32, %c0_i32_0, %c0_i32_1 : i32, i32, i32
  }
  func.func @transform_8(%arg0: i32) -> (i32, i32, i32) {
    %c0_i32 = arith.constant 0 : i32
    %c0_i32_0 = arith.constant 0 : i32
    %c0_i32_1 = arith.constant 0 : i32
    %c0_i32_2 = arith.constant 0 : i32
    return %c0_i32, %c0_i32_0, %c0_i32_1 : i32, i32, i32
  }
  func.func @transform_9(%arg0: i32) -> (i32, i32, i32) {
    %c0_i32 = arith.constant 0 : i32
    %c0_i32_0 = arith.constant 0 : i32
    %c0_i32_1 = arith.constant 0 : i32
    %c0_i32_2 = arith.constant 0 : i32
    return %c0_i32, %c0_i32_0, %c0_i32_1 : i32, i32, i32
  }
  func.func @transform_10(%arg0: i32) -> (i32, i32, i32) {
    %c0_i32 = arith.constant 0 : i32
    %c0_i32_0 = arith.constant 0 : i32
    %c0_i32_1 = arith.constant 0 : i32
    %c0_i32_2 = arith.constant 0 : i32
    return %c0_i32, %c0_i32_0, %c0_i32_1 : i32, i32, i32
  }
  func.func @transform_11(%arg0: i32) -> (i32, i32, i32) {
    %c0_i32 = arith.constant 0 : i32
    %c0_i32_0 = arith.constant 0 : i32
    %c0_i32_1 = arith.constant 0 : i32
    %c0_i32_2 = arith.constant 0 : i32
    return %c0_i32, %c0_i32_0, %c0_i32_1 : i32, i32, i32
  }
  func.func @transform_12(%arg0: i32) -> (i32, i32, i32) {
    %c0_i32 = arith.constant 0 : i32
    %c0_i32_0 = arith.constant 0 : i32
    %c0_i32_1 = arith.constant 0 : i32
    %c0_i32_2 = arith.constant 0 : i32
    return %c0_i32, %c0_i32_0, %c0_i32_1 : i32, i32, i32
  }
  func.func @transform_13(%arg0: i32) -> (i32, i32, i32) {
    %c0_i32 = arith.constant 0 : i32
    %c0_i32_0 = arith.constant 0 : i32
    %c0_i32_1 = arith.constant 0 : i32
    %c0_i32_2 = arith.constant 0 : i32
    return %c0_i32, %c0_i32_0, %c0_i32_1 : i32, i32, i32
  }
  func.func @transform_14(%arg0: i32) -> (i32, i32, i32) {
    %c0_i32 = arith.constant 0 : i32
    %c0_i32_0 = arith.constant 0 : i32
    %c0_i32_1 = arith.constant 0 : i32
    %c0_i32_2 = arith.constant 0 : i32
    return %c0_i32, %c0_i32_0, %c0_i32_1 : i32, i32, i32
  }
  func.func @transform_15(%arg0: i32) -> (i32, i32, i32) {
    %c0_i32 = arith.constant 0 : i32
    %c0_i32_0 = arith.constant 0 : i32
    %c0_i32_1 = arith.constant 0 : i32
    %c0_i32_2 = arith.constant 0 : i32
    return %c0_i32, %c0_i32_0, %c0_i32_1 : i32, i32, i32
  }
  func.func @transform_16(%arg0: i32) -> (i32, i32) {
    %c0_i32 = arith.constant 0 : i32
    %c0_i32_0 = arith.constant 0 : i32
    %c0_i32_1 = arith.constant 0 : i32
    return %c0_i32, %c0_i32_0 : i32, i32
  }
  func.func @transform_17(%arg0: i32) -> (i32, i32) {
    %c0_i32 = arith.constant 0 : i32
    %c0_i32_0 = arith.constant 0 : i32
    %c0_i32_1 = arith.constant 0 : i32
    return %c0_i32, %c0_i32_0 : i32, i32
  }
  func.func @transform_18(%arg0: i32) -> (i32, i32) {
    %c0_i32 = arith.constant 0 : i32
    %c0_i32_0 = arith.constant 0 : i32
    %c0_i32_1 = arith.constant 0 : i32
    return %c0_i32, %c0_i32_0 : i32, i32
  }
  func.func @transform_19(%arg0: i32) -> (i32, i32) {
    %c0_i32 = arith.constant 0 : i32
    %c0_i32_0 = arith.constant 0 : i32
    %c0_i32_1 = arith.constant 0 : i32
    return %c0_i32, %c0_i32_0 : i32, i32
  }
  func.func @transform_20(%arg0: i32) -> (i32, i32) {
    %c0_i32 = arith.constant 0 : i32
    %c0_i32_0 = arith.constant 0 : i32
    %c0_i32_1 = arith.constant 0 : i32
    return %c0_i32, %c0_i32_0 : i32, i32
  }
  func.func @transform_21(%arg0: i32) -> (i32, i32) {
    %c0_i32 = arith.constant 0 : i32
    %c0_i32_0 = arith.constant 0 : i32
    %c0_i32_1 = arith.constant 0 : i32
    return %c0_i32, %c0_i32_0 : i32, i32
  }
  func.func @transform_22(%arg0: i32) -> (i32, i32, i32, i32) {
    %c0_i32 = arith.constant 0 : i32
    %c0_i32_0 = arith.constant 0 : i32
    %c0_i32_1 = arith.constant 0 : i32
    %c0_i32_2 = arith.constant 0 : i32
    return %arg0, %c0_i32, %c0_i32_0, %c0_i32_1 : i32, i32, i32, i32
  }
}

</mosaic_0001>

<bundles_post_ra>
// kernel: tpu_custom_call.1
= control target key start
LH: loop header
LB: loop body
LE: loop exit
PB: predicated region body
PF: predicated region fallthrough
CT: control target
= control target key end

     0   :  { %s7021_s0 = inlined_call_operand.hbm [shape: f32[2,16,32], index: 0, kind: input, shape index: {}]   ;;  %s7022_s1 = inlined_call_operand.vmem [shape: f32[2,1,16], index: 1, kind: input, shape index: {}]   ;;  %s7023_s2 = inlined_call_operand.hbm [shape: f32[2,1,16], index: 2, kind: input, shape index: {}]   ;;  %s7024_s3 = inlined_call_operand.vmem [shape: f32[2,16,1], index: 3, kind: input, shape index: {}]   ;;  %s7025_s4 = inlined_call_operand.vmem [shape: f32[2,32,96], index: 4, kind: input, shape index: {}]   ;;  %s7026_s5 = inlined_call_operand.hbm [shape: f32[2,1,96], index: 5, kind: input, shape index: {}]   ;;  %s7027_s6 = inlined_call_operand.vmem [shape: f32[2,32,32], index: 6, kind: input, shape index: {}]   ;;  %s7028_s7 = inlined_call_operand.hbm [shape: f32[2,1,32], index: 7, kind: input, shape index: {}]   ;;  %s7029_s8 = inlined_call_operand.hbm [shape: f32[2,1,32], index: 8, kind: input, shape index: {}]   ;;  %s7030_s9 = inlined_call_operand.hbm [shape: f32[2,1,32], index: 9, kind: input, shape index: {}]   ;;  %s7031_s10 = inlined_call_operand.vmem [shape: f32[2,32,64], index: 10, kind: input, shape index: {}]   ;;  %s7032_s11 = inlined_call_operand.hbm [shape: f32[2,1,64], index: 11, kind: input, shape index: {}]   ;;  %s7033_s12 = inlined_call_operand.vmem [shape: f32[2,64,32], index: 12, kind: input, shape index: {}]   ;;  %s7034_s13 = inlined_call_operand.hbm [shape: f32[2,1,32], index: 13, kind: input, shape index: {}]   ;;  %s7035_s14 = inlined_call_operand.hbm [shape: f32[2,1,32], index: 14, kind: input, shape index: {}]   ;;  %s7036_s15 = inlined_call_operand.hbm [shape: f32[2,1,32], index: 15, kind: input, shape index: {}]   ;;  %s7037_s16 = inlined_call_operand.hbm [shape: f32[32,144], index: 16, kind: input, shape index: {}]   ;;  %s7038_s17 = inlined_call_operand.hbm [shape: f32[1,144], index: 17, kind: input, shape index: {}]   ;;  %s7039_s18 = inlined_call_operand.hbm [shape: f32[32,144], index: 18, kind: input, shape index: {}]   ;;  %s7040_s19 = inlined_call_operand.vmem [shape: f32[1,144], index: 19, kind: input, shape index: {}]   ;;  %s7041_s20 = inlined_call_operand.vmem [shape: f32[16,144], index: 20, kind: input, shape index: {}]   ;;  %s7042_s21 = inlined_call_operand.hbm [shape: f32[16,144], index: 21, kind: input, shape index: {}]   ;;  %s7043_s22 = inlined_call_operand.hbm [shape: f32[2,9,16,16], index: 22, kind: output, shape index: {}]  }
   0x1   :  { %7074 = sst [smem:[#allocation39_spill]] %s7021_s0 }
   0x2   :  { %7075 = sst [smem:[#allocation40_spill]] %s7022_s1 }
   0x3   :  { %7076 = sst [smem:[#allocation41_spill]] %s7023_s2 }
   0x4   :  { %7077 = sst [smem:[#allocation42_spill]] %s7024_s3 }
   0x5   :  { %7078 = sst [smem:[#allocation43_spill]] %s7025_s4 }
   0x6   :  { %7079 = sst [smem:[#allocation44_spill]] %s7026_s5 }
   0x7   :  { %7080 = sst [smem:[#allocation45_spill]] %s7027_s6 }
   0x8   :  { %7081 = sst [smem:[#allocation46_spill]] %s7028_s7 }
   0x9   :  { %7082 = sst [smem:[#allocation47_spill]] %s7029_s8 }
   0xa   :  { %7083 = sst [smem:[#allocation48_spill]] %s7030_s9 }
   0xb   :  { %7084 = sst [smem:[#allocation49_spill]] %s7031_s10 }
   0xc   :  { %7085 = sst [smem:[#allocation50_spill]] %s7032_s11 }
   0xd   :  { %7086 = sst [smem:[#allocation51_spill]] %s7033_s12 }
   0xe   :  { %7087 = sst [smem:[#allocation52_spill]] %s7034_s13 }
   0xf   :  { %7088 = sst [smem:[#allocation53_spill]] %s7035_s14 }
  0x10   :  { %7089 = sst [smem:[#allocation54_spill]] %s7040_s19 }
  0x11   :  { %7090 = sst [smem:[#allocation55_spill]] %s7041_s20 }
  0x12   :  { %7091 = sst [smem:[#allocation56_spill]] %s7043_s22 }
  0x13   :  { %27 = vsyncpa [#allocation3], 0 }
  0x14   :  { %29 = vsyncpa [#allocation3 + $0x1], 0 }
  0x15   :  { %30 = vsyncpa [#allocation6], 0 }
  0x16   :  { %32 = vsyncpa [#allocation6 + $0x1], 0 }
  0x17   :  { %33 = vsyncpa [#allocation9], 0 }
  0x18   :  { %34 = vsyncpa [#allocation12], 0 }
  0x19   :  { %35 = vsyncpa [#allocation15], 0 }
  0x1a   :  { %36 = vsyncpa [#allocation18], 0 }
  0x1b   :  { %37 = vsyncpa [#allocation21], 0 }
  0x1c   :  { %38 = vsyncpa [#allocation24], 0 }
  0x1d   :  { %39 = vsyncpa [#allocation4], 0 }
  0x1e   :  { %41 = vsyncpa [#allocation4 + $0x1], 0  ;;  %s5894_s3 = smov 0   ;;  %s5896_s28 = smov 0  }
  0x1f   :  { %s5898_s29 = smov 0   ;;  %s5900_s30 = smov 0  }
  0x20 LB: > { %7092 = sst [smem:[#allocation36_spill]] %s5733_s3  ;;  %s5747_s4 = smov [#allocation7]   ;;  %s5745_s30 = sphi %s5900_s30, %s7158_s30   ;;  %s5741_s29 = sphi %s5898_s29, %s7157_s29   ;;  %s5737_s28 = sphi %s5896_s28, %s7156_s28   ;;  %s5733_s3 = sphi %s5894_s3, %s7155_s3  }
  0x21   : > { %s575_s0 = sshll.u32 %s5747_s4, 4  ;;  %s5915_s23 = sadd.s32 4294967295, %s5745_s30   ;;  %s5920_s0 = int_to_ptr.vmem [resolvable:$true] %s575_s0 }
  0x22   : > { %7093 = sst [smem:[#allocation37_spill]] %s5915_s23  ;;  %p4222_p0 = scmp.ge.s32.totalorder %s5745_s30, 1 }
  0x23   : > { %p7058_p1 = scmp.eq.s32.totalorder %s5915_s23, 0  ;;  %p560_p2 = scmp.lt.s32.totalorder %s5745_s30, 3 }
  0x24   : > { %s5748_s5 = smov [#allocation8]   ;;  %s5749_s25 = smov [#allocation11]  }
  0x25   : > { %p5922_p3 = pnand %p4222_p0, %p560_p2  ;;  %s591_s24 = sshll.u32 %s5748_s5, 4  ;;  %s5935_s24 = int_to_ptr.vmem [resolvable:$true] %s591_s24 }
  0x26   : > { %s617_s26 = sshll.u32 %s5749_s25, 4  ;;  %s7097_s4 = sld [smem:[#allocation44_spill]]  ;;  %s5937_s26 = int_to_ptr.vmem [resolvable:$true] %s617_s26 }
  0x27   : > { %s7094_s1 = scalar_select %p5922_p3, 1, 0 }
  0x28   : > { %p4973_p5 = pneg %p5922_p3 }
  0x29   : > { %7095 = sst [smem:[#allocation38_spill]] %s7094_s1 }
  0x2a   : > { %p5931_p6 = pnand %p4973_p5, %p7058_p1 }
  0x2c   : > { %s5251_s22 = scalar_lea.hbm %s7097_s4, 32  ;;  %p5947_p8 = pneg %p5931_p6 }
  0x2d   : > { %p5252_p7 = scmp.ne.s32.totalorder %s7097_s4, %s5251_s22  ;;  %p5258_p11 = scmp.lt.u32.totalorder %s5251_s22, %s7097_s4 }
  0x2f   : > { %p5254_p9 = pnand %p5947_p8, %p5252_p7 }
  0x31   : > { %p5255_p10 = pneg %p5254_p9 }
  0x33   : > { %p5260_p12 = pnand %p5258_p11, %p5255_p10 }
  0x35   : > { %5263 = shalt.err (!%p5260_p12)
}
  0x36   : > { %s5264_s19 = scalar_lea.vmem %s5920_s0, 32  ;;  %p5272_p5 = scmp.lt.s32.totalorder %s5920_s0, %s5920_s0 }
  0x37   : > { %p5265_p13 = scmp.ne.s32.totalorder %s5920_s0, %s5264_s19  ;;  %p5273_p4 = scmp.lt.s32.totalorder %s5264_s19, %s5264_s19 }
  0x39   : > { %p5267_p0 = pnand %p5265_p13, %p5947_p8  ;;  %p5274_p7 = por %p5273_p4, %p5272_p5 }
  0x3b   : > { %p5268_p2 = pneg %p5267_p0 }
  0x3d   : > { %p5275_p9 = pnand %p5274_p7, %p5268_p2 }
  0x3f   : > { %5278 = shalt.err (!%p5275_p9)
}
  0x40   : > { %s5750_s20 = smov 16   ;;  %s5751_s12 = smov 1  }
  0x41   : > { %4976 = dma.hbm_to_vmem [thread:$0]  (!%p5931_p6), %s7097_s4, 32, %s5920_s0, [#allocation6], %s5750_s20, %s5750_s20, %s5751_s12  }
  0x42   : > { %s7099_s7 = sld [smem:[#allocation46_spill]] }
  0x48   : > { %s5279_s19 = scalar_lea.hbm %s7099_s7, 32 }
  0x49   : > { %p5280_p4 = scmp.ne.s32.totalorder %s7099_s7, %s5279_s19  ;;  %p5286_p12 = scmp.lt.u32.totalorder %s5279_s19, %s7099_s7 }
  0x4b   : > { %p5282_p10 = pnand %p5280_p4, %p5947_p8 }
  0x4d   : > { %p5283_p11 = pneg %p5282_p10 }
  0x4f   : > { %p5288_p13 = pnand %p5286_p12, %p5283_p11 }
  0x51   : > { %5291 = shalt.err (!%p5288_p13)
}
  0x52   : > { %s5292_s0 = scalar_lea.vmem %s5935_s24, 32  ;;  %p5300_p7 = scmp.lt.s32.totalorder %s5935_s24, %s5935_s24 }
  0x53   : > { %p5293_p0 = scmp.ne.s32.totalorder %s5935_s24, %s5292_s0  ;;  %p5301_p9 = scmp.lt.s32.totalorder %s5292_s0, %s5292_s0 }
  0x55   : > { %p5295_p2 = pnand %p5293_p0, %p5947_p8  ;;  %p5302_p4 = por %p5301_p9, %p5300_p7 }
  0x57   : > { %p5296_p5 = pneg %p5295_p2 }
  0x59   : > { %p5303_p10 = pnand %p5302_p4, %p5296_p5 }
  0x5b   : > { %5306 = shalt.err (!%p5303_p10)
}
  0x5c   : > { %4979 = dma.hbm_to_vmem [thread:$0]  (!%p5931_p6), %s7099_s7, 32, %s5935_s24, [#allocation9], %s5750_s20, %s5750_s20, %s5751_s12  }
  0x5d   : > { %s7100_s9 = sld [smem:[#allocation48_spill]] }
  0x63   : > { %s5307_s22 = scalar_lea.hbm %s7100_s9, 32 }
  0x64   : > { %p5308_p11 = scmp.ne.s32.totalorder %s7100_s9, %s5307_s22  ;;  %p5314_p0 = scmp.lt.u32.totalorder %s5307_s22, %s7100_s9 }
  0x66   : > { %p5310_p12 = pnand %p5308_p11, %p5947_p8 }
  0x68   : > { %p5311_p13 = pneg %p5310_p12 }
  0x6a   : > { %p5316_p2 = pnand %p5314_p0, %p5311_p13 }
  0x6c   : > { %5319 = shalt.err (!%p5316_p2)
}
  0x6d   : > { %s5320_s24 = scalar_lea.vmem %s5937_s26, 32  ;;  %p5328_p4 = scmp.lt.s32.totalorder %s5937_s26, %s5937_s26 }
  0x6e   : > { %p5321_p5 = scmp.ne.s32.totalorder %s5937_s26, %s5320_s24  ;;  %p5329_p10 = scmp.lt.s32.totalorder %s5320_s24, %s5320_s24 }
  0x70   : > { %p5323_p7 = pnand %p5321_p5, %p5947_p8  ;;  %p5330_p11 = por %p5329_p10, %p5328_p4 }
  0x72   : > { %p5324_p9 = pneg %p5323_p7 }
  0x74   : > { %p5331_p12 = pnand %p5330_p11, %p5324_p9 }
  0x76   : > { %5334 = shalt.err (!%p5331_p12)
}
  0x77   : > { %4985 = dma.hbm_to_vmem [thread:$0]  (!%p5931_p6), %s7100_s9, 32, %s5937_s26, [#allocation12], %s5750_s20, %s5750_s20, %s5751_s12  }
  0x78   : > { %s5752_s3 = smov [#allocation14]   ;;  %s5753_s1 = smov [#allocation17]  }
  0x79   : > { %s649_s23 = sshll.u32 %s5752_s3, 4  ;;  %s675_s22 = sshll.u32 %s5753_s1, 4  ;;  %s650_s23 = int_to_ptr.vmem [resolvable:$true] %s649_s23  ;;  %s676_s22 = int_to_ptr.vmem [resolvable:$true] %s675_s22 }
  0x7a   : > { %s7101_s13 = sld [smem:[#allocation52_spill]] }
  0x80   : > { %s5335_s25 = scalar_lea.hbm %s7101_s13, 32 }
  0x81   : > { %p5336_p13 = scmp.ne.s32.totalorder %s7101_s13, %s5335_s25  ;;  %p5342_p5 = scmp.lt.u32.totalorder %s5335_s25, %s7101_s13 }
  0x83   : > { %p5338_p0 = pnand %p5336_p13, %p5947_p8 }
  0x85   : > { %p5339_p2 = pneg %p5338_p0 }
  0x87   : > { %p5344_p7 = pnand %p5342_p5, %p5339_p2 }
  0x89   : > { %5347 = shalt.err (!%p5344_p7)
}
  0x8a   : > { %s5348_s26 = scalar_lea.vmem %s650_s23, 32  ;;  %p5356_p11 = scmp.lt.s32.totalorder %s650_s23, %s650_s23 }
  0x8b   : > { %p5349_p9 = scmp.ne.s32.totalorder %s650_s23, %s5348_s26  ;;  %p5357_p12 = scmp.lt.s32.totalorder %s5348_s26, %s5348_s26 }
  0x8d   : > { %p5351_p4 = pnand %p5349_p9, %p5947_p8  ;;  %p5358_p1 = por %p5357_p12, %p5356_p11 }
  0x8f   : > { %p5352_p10 = pneg %p5351_p4 }
  0x91   : > { %p5359_p3 = pnand %p5358_p1, %p5352_p10 }
  0x93   : > { %5362 = shalt.err (!%p5359_p3)
}
  0x94   : > { %4991 = dma.hbm_to_vmem [thread:$0]  (!%p5931_p6), %s7101_s13, 32, %s650_s23, [#allocation15], %s5750_s20, %s5750_s20, %s5751_s12  }
  0x95   : > { %s5363_s2 = scalar_lea.hbm %s7036_s15, 32 }
  0x96   : > { %p5364_p1 = scmp.ne.s32.totalorder %s7036_s15, %s5363_s2  ;;  %p5370_p0 = scmp.lt.u32.totalorder %s5363_s2, %s7036_s15 }
  0x98   : > { %p5366_p3 = pnand %p5364_p1, %p5947_p8 }
  0x9a   : > { %p5367_p13 = pneg %p5366_p3 }
  0x9c   : > { %p5372_p2 = pnand %p5370_p0, %p5367_p13 }
  0x9e   : > { %5375 = shalt.err (!%p5372_p2)
}
  0x9f   : > { %s5376_s0 = scalar_lea.vmem %s676_s22, 32  ;;  %p5384_p4 = scmp.lt.s32.totalorder %s676_s22, %s676_s22 }
  0xa0   : > { %p5377_p5 = scmp.ne.s32.totalorder %s676_s22, %s5376_s0  ;;  %p5385_p10 = scmp.lt.s32.totalorder %s5376_s0, %s5376_s0 }
  0xa2   : > { %p5379_p7 = pnand %p5377_p5, %p5947_p8  ;;  %p5386_p11 = por %p5385_p10, %p5384_p4 }
  0xa4   : > { %p5380_p9 = pneg %p5379_p7 }
  0xa6   : > { %p5387_p12 = pnand %p5386_p11, %p5380_p9 }
  0xa8   : > { %5390 = shalt.err (!%p5387_p12)
}
  0xa9   : > { %4997 = dma.hbm_to_vmem [thread:$0]  (!%p5931_p6), %s7036_s15, 32, %s676_s22, [#allocation18], %s5750_s20, %s5750_s20, %s5751_s12  }
  0xaa   : > { %s5754_s4 = smov [#allocation20]   ;;  %s5755_s3 = smov [#allocation10]  }
  0xab   : > { %s702_s10 = sshll.u32 %s5754_s4, 4  ;;  %s604_s1 = sshll.u32 %s5755_s3, 4  ;;  %s703_s10 = int_to_ptr.vmem [resolvable:$true] %s702_s10  ;;  %s605_s1 = int_to_ptr.vmem [resolvable:$true] %s604_s1 }
  0xac   : > { %s5391_s25 = scalar_lea.hbm %s7038_s17, 32 }
  0xad   : > { %p5392_p1 = scmp.ne.s32.totalorder %s7038_s17, %s5391_s25  ;;  %p5398_p0 = scmp.lt.u32.totalorder %s5391_s25, %s7038_s17 }
  0xaf   : > { %p5394_p3 = pnand %p5392_p1, %p5947_p8 }
  0xb1   : > { %p5395_p13 = pneg %p5394_p3 }
  0xb3   : > { %p5400_p2 = pnand %p5398_p0, %p5395_p13 }
  0xb5   : > { %5403 = shalt.err (!%p5400_p2)
}
  0xb6   : > { %s5404_s22 = scalar_lea.vmem %s703_s10, 32  ;;  %p5412_p4 = scmp.lt.s32.totalorder %s703_s10, %s703_s10 }
  0xb7   : > { %p5405_p5 = scmp.ne.s32.totalorder %s703_s10, %s5404_s22  ;;  %p5413_p10 = scmp.lt.s32.totalorder %s5404_s22, %s5404_s22 }
  0xb9   : > { %p5407_p7 = pnand %p5405_p5, %p5947_p8  ;;  %p5414_p11 = por %p5413_p10, %p5412_p4 }
  0xbb   : > { %p5408_p9 = pneg %p5407_p7 }
  0xbd   : > { %p5415_p12 = pnand %p5414_p11, %p5408_p9 }
  0xbf   : > { %5418 = shalt.err (!%p5415_p12)
}
  0xc0   : > { %5003 = dma.hbm_to_vmem [thread:$0]  (!%p5931_p6), %s7038_s17, 32, %s703_s10, [#allocation21]  }
  0xc1   : > { %s7102_s8 = sld [smem:[#allocation47_spill]] }
  0xc7   : > { %s5419_s27 = scalar_lea.hbm %s7102_s8, 32 }
  0xc8   : > { %p5420_p1 = scmp.ne.s32.totalorder %s7102_s8, %s5419_s27  ;;  %p5426_p0 = scmp.lt.u32.totalorder %s5419_s27, %s7102_s8 }
  0xca   : > { %p5422_p3 = pnand %p5420_p1, %p5947_p8 }
  0xcc   : > { %p5423_p13 = pneg %p5422_p3 }
  0xce   : > { %p5428_p2 = pnand %p5426_p0, %p5423_p13 }
  0xd0   : > { %5431 = shalt.err (!%p5428_p2)
}
  0xd1   : > { %s5432_s23 = scalar_lea.vmem %s605_s1, 32  ;;  %p5440_p4 = scmp.lt.s32.totalorder %s605_s1, %s605_s1 }
  0xd2   : > { %p5433_p5 = scmp.ne.s32.totalorder %s605_s1, %s5432_s23  ;;  %p5441_p10 = scmp.lt.s32.totalorder %s5432_s23, %s5432_s23 }
  0xd4   : > { %p5435_p7 = pnand %p5433_p5, %p5947_p8  ;;  %p5442_p11 = por %p5441_p10, %p5440_p4 }
  0xd6   : > { %p5436_p9 = pneg %p5435_p7 }
  0xd8   : > { %p5443_p12 = pnand %p5442_p11, %p5436_p9 }
  0xda   : > { %5446 = shalt.err (!%p5443_p12)
}
  0xdb   : > { %4982 = dma.hbm_to_vmem [thread:$0]  (!%p5931_p6), %s7102_s8, 32, %s605_s1, [#allocation9], %s5750_s20, %s5750_s20, %s5751_s12  }
  0xdc   : > { %s5756_s26 = smov [#allocation13]   ;;  %s5757_s3 = smov [#allocation16]  }
  0xdd   : > { %s633_s4 = sshll.u32 %s5756_s26, 4  ;;  %s662_s2 = sshll.u32 %s5757_s3, 4  ;;  %s634_s4 = int_to_ptr.vmem [resolvable:$true] %s633_s4  ;;  %s663_s2 = int_to_ptr.vmem [resolvable:$true] %s662_s2 }
  0xde   : > { %s7103_s11 = sld [smem:[#allocation50_spill]] }
  0xe4   : > { %s5447_s19 = scalar_lea.hbm %s7103_s11, 32 }
  0xe5   : > { %p5448_p1 = scmp.ne.s32.totalorder %s7103_s11, %s5447_s19  ;;  %p5454_p0 = scmp.lt.u32.totalorder %s5447_s19, %s7103_s11 }
  0xe7   : > { %p5450_p3 = pnand %p5448_p1, %p5947_p8 }
  0xe9   : > { %p5451_p13 = pneg %p5450_p3 }
  0xeb   : > { %p5456_p2 = pnand %p5454_p0, %p5451_p13 }
  0xed   : > { %5459 = shalt.err (!%p5456_p2)
}
  0xee   : > { %s5460_s1 = scalar_lea.vmem %s634_s4, 32  ;;  %p5468_p4 = scmp.lt.s32.totalorder %s634_s4, %s634_s4 }
  0xef   : > { %p5461_p5 = scmp.ne.s32.totalorder %s634_s4, %s5460_s1  ;;  %p5469_p10 = scmp.lt.s32.totalorder %s5460_s1, %s5460_s1 }
  0xf1   : > { %p5463_p7 = pnand %p5461_p5, %p5947_p8  ;;  %p5470_p11 = por %p5469_p10, %p5468_p4 }
  0xf3   : > { %p5464_p9 = pneg %p5463_p7 }
  0xf5   : > { %p5471_p12 = pnand %p5470_p11, %p5464_p9 }
  0xf7   : > { %5474 = shalt.err (!%p5471_p12)
}
  0xf8   : > { %4988 = dma.hbm_to_vmem [thread:$0]  (!%p5931_p6), %s7103_s11, 32, %s634_s4, [#allocation12], %s5750_s20, %s5750_s20, %s5751_s12  }
  0xf9   : > { %s7104_s14 = sld [smem:[#allocation53_spill]] }
  0xff   : > { %s5475_s25 = scalar_lea.hbm %s7104_s14, 32 }
 0x100   : > { %p5476_p1 = scmp.ne.s32.totalorder %s7104_s14, %s5475_s25  ;;  %p5482_p0 = scmp.lt.u32.totalorder %s5475_s25, %s7104_s14 }
 0x102   : > { %p5478_p3 = pnand %p5476_p1, %p5947_p8 }
 0x104   : > { %p5479_p13 = pneg %p5478_p3 }
 0x106   : > { %p5484_p2 = pnand %p5482_p0, %p5479_p13 }
 0x108   : > { %5487 = shalt.err (!%p5484_p2)
}
 0x109   : > { %s5488_s10 = scalar_lea.vmem %s663_s2, 32  ;;  %p5496_p4 = scmp.lt.s32.totalorder %s663_s2, %s663_s2 }
 0x10a   : > { %p5489_p5 = scmp.ne.s32.totalorder %s663_s2, %s5488_s10  ;;  %p5497_p10 = scmp.lt.s32.totalorder %s5488_s10, %s5488_s10 }
 0x10c   : > { %p5491_p7 = pnand %p5489_p5, %p5947_p8  ;;  %p5498_p11 = por %p5497_p10, %p5496_p4 }
 0x10e   : > { %p5492_p9 = pneg %p5491_p7 }
 0x110   : > { %p5499_p12 = pnand %p5498_p11, %p5492_p9 }
 0x112   : > { %5502 = shalt.err (!%p5499_p12)
}
 0x113   : > { %4994 = dma.hbm_to_vmem [thread:$0]  (!%p5931_p6), %s7104_s14, 32, %s663_s2, [#allocation15], %s5750_s20, %s5750_s20, %s5751_s12  }
 0x114   : > { %s5758_s22 = smov [#allocation19]   ;;  %s5503_s25 = scalar_lea.hbm %s7037_s16, 1024 }
 0x115   : > { %s688_s26 = sshll.u32 %s5758_s22, 4  ;;  %p5504_p1 = scmp.ne.s32.totalorder %s7037_s16, %s5503_s25  ;;  %s689_s26 = int_to_ptr.vmem [resolvable:$true] %s688_s26 }
 0x116   : > { %p5510_p0 = scmp.lt.u32.totalorder %s5503_s25, %s7037_s16 }
 0x117   : > { %p5506_p3 = pnand %p5504_p1, %p5947_p8 }
 0x119   : > { %p5507_p13 = pneg %p5506_p3 }
 0x11b   : > { %p5512_p2 = pnand %p5510_p0, %p5507_p13 }
 0x11d   : > { %5515 = shalt.err (!%p5512_p2)
}
 0x11e   : > { %s5516_s12 = scalar_lea.vmem %s689_s26, 1024  ;;  %p5524_p4 = scmp.lt.s32.totalorder %s689_s26, %s689_s26 }
 0x11f   : > { %p5517_p5 = scmp.ne.s32.totalorder %s689_s26, %s5516_s12  ;;  %p5525_p10 = scmp.lt.s32.totalorder %s5516_s12, %s5516_s12 }
 0x121   : > { %p5519_p7 = pnand %p5517_p5, %p5947_p8  ;;  %p5526_p11 = por %p5525_p10, %p5524_p4 }
 0x123   : > { %p5520_p9 = pneg %p5519_p7 }
 0x125   : > { %p5527_p12 = pnand %p5526_p11, %p5520_p9 }
 0x127   : > { %5530 = shalt.err (!%p5527_p12)
}
 0x128   : > { %s5759_s2 = smov 256   ;;  %s5760_s1 = smov [#allocation22]  }
 0x129   : > { %5000 = dma.hbm_to_vmem [thread:$0]  (!%p5931_p6), %s7037_s16, 1024, %s689_s26, [#allocation18], %s5759_s2, %s5759_s2, %s5750_s20  }
 0x12a   : > { %s712_s22 = sshll.u32 %s5760_s1, 4  ;;  %s5761_s3 = smov [#allocation23]   ;;  %s713_s22 = int_to_ptr.vmem [resolvable:$true] %s712_s22 }
 0x12b   : > { %s731_s27 = sshll.u32 %s5761_s3, 4  ;;  %s5531_s24 = scalar_lea.hbm %s7039_s18, 1024  ;;  %s732_s27 = int_to_ptr.vmem [resolvable:$true] %s731_s27 }
 0x12c   : > { %p5532_p1 = scmp.ne.s32.totalorder %s7039_s18, %s5531_s24  ;;  %p5538_p0 = scmp.lt.u32.totalorder %s5531_s24, %s7039_s18 }
 0x12e   : > { %p5534_p3 = pnand %p5532_p1, %p5947_p8 }
 0x130   : > { %p5535_p13 = pneg %p5534_p3 }
 0x132   : > { %p5540_p2 = pnand %p5538_p0, %p5535_p13 }
 0x134   : > { %5543 = shalt.err (!%p5540_p2)
}
 0x135   : > { %s5544_s26 = scalar_lea.vmem %s713_s22, 1024  ;;  %p5552_p4 = scmp.lt.s32.totalorder %s713_s22, %s713_s22 }
 0x136   : > { %p5545_p5 = scmp.ne.s32.totalorder %s713_s22, %s5544_s26  ;;  %p5553_p10 = scmp.lt.s32.totalorder %s5544_s26, %s5544_s26 }
 0x138   : > { %p5547_p7 = pnand %p5545_p5, %p5947_p8  ;;  %p5554_p11 = por %p5553_p10, %p5552_p4 }
 0x13a   : > { %p5548_p9 = pneg %p5547_p7 }
 0x13c   : > { %p5555_p12 = pnand %p5554_p11, %p5548_p9 }
 0x13e   : > { %5558 = shalt.err (!%p5555_p12)
}
 0x13f   : > { %5006 = dma.hbm_to_vmem [thread:$0]  (!%p5931_p6), %s7039_s18, 1024, %s713_s22, [#allocation21], %s5759_s2, %s5759_s2, %s5750_s20  }
 0x140   : > { %s5559_s19 = scalar_lea.hbm %s7042_s21, 512 }
 0x141   : > { %p5560_p1 = scmp.ne.s32.totalorder %s7042_s21, %s5559_s19  ;;  %p5566_p0 = scmp.lt.u32.totalorder %s5559_s19, %s7042_s21 }
 0x143   : > { %p5562_p3 = pnand %p5560_p1, %p5947_p8 }
 0x145   : > { %p5563_p13 = pneg %p5562_p3 }
 0x147   : > { %p5568_p2 = pnand %p5566_p0, %p5563_p13 }
 0x149   : > { %5571 = shalt.err (!%p5568_p2)
}
 0x14a   : > { %s5572_s10 = scalar_lea.vmem %s732_s27, 512  ;;  %p5580_p4 = scmp.lt.s32.totalorder %s732_s27, %s732_s27 }
 0x14b   : > { %p5573_p5 = scmp.ne.s32.totalorder %s732_s27, %s5572_s10  ;;  %p5581_p10 = scmp.lt.s32.totalorder %s5572_s10, %s5572_s10 }
 0x14d   : > { %p5575_p7 = pnand %p5573_p5, %p5947_p8  ;;  %p5582_p11 = por %p5581_p10, %p5580_p4 }
 0x14f   : > { %p5576_p9 = pneg %p5575_p7 }
 0x151   : > { %p5583_p12 = pnand %p5582_p11, %p5576_p9 }
 0x153   : > { %5586 = shalt.err (!%p5583_p12)
}
 0x154   : > { %s7105_s5 = sld [smem:[#allocation36_spill]]  ;;  %s7106_s4 = sld [smem:[#allocation37_spill]] }
 0x155   : > { %5009 = dma.hbm_to_vmem [thread:$0]  (!%p5931_p6), %s7042_s21, 512, %s732_s27, [#allocation24], %s5759_s2, %s5759_s2, %s5750_s20  }
 0x156   : > { %s4221_s6 = sadd.s32 4294967294, %s5745_s30   ;;  %s6211_s1 = sadd.s32 1, %s5745_s30  }
 0x157   : > { %s54_s3 = sadd.s32 1, %s5741_s29  ;;  %s51_s25 = ssub.s32 %s5745_s30, %s6211_s1 }
 0x158   : > { %p61_p8 = scmp.ne.s32.totalorder %s5741_s29, %s5737_s28  ;;  %p52_p1 = scmp.eq.s32.totalorder %s51_s25, 0 }
 0x159   : > { %p62_p3 = scmp.eq.s32.totalorder %s5745_s30, 0  ;;  %p553_p9 = scmp.eq.s32.totalorder %s4221_s6, 1 }
 0x15a   : > { %p67_p13 = scmp.ne.s32.totalorder %s5737_s28, %s7105_s5  ;;  %p547_p0 = scmp.eq.s32.totalorder %s7106_s4, 1 }
 0x15b   : > { %s6223_s19 = scalar_select %p52_p1, %s5741_s29, %s54_s3  }
 0x15c   : > { %p63_p2 = por %p62_p3, %p61_p8  ;;  %p7107_p5 = scmp.eq.s32.totalorder %s7106_s4, 0 }
 0x15d   : > { %p6231_p6 = por %p547_p0, %p61_p8  ;;  %p5033_p4 = scmp.lt.s32.totalorder %s5745_s30, 2 }
 0x15e   : > { %p6227_p7 = por %p7107_p5, %p67_p13  ;;  %s6237_s2 = sand.u32 1, %s5741_s29  }
 0x15f   : > { %s7109_s20 = scalar_select %p6231_p6, 1, 0 }
 0x160   : > { %s7108_s24 = scalar_select %p6227_p7, 1, 0 }
 0x161   : > { %p6239_p10 = por %p553_p9, %p67_p13  ;;  %s4236_s0 = sshll.u32 %s6237_s2, 4 }
 0x162   : > { %s4378_s23 = sshll.u32 %s5745_s30, 8  ;;  %s7111_s22 = sld [smem:[#allocation39_spill]] }
 0x163   : > { %s7110_s27 = scalar_select %p6239_p10, 1, 0 }
 0x164   : > { %s749_s5 = scalar_lea.vmem [#allocation2], %s4236_s0  ;;  %p6250_p11 = pnand %p5033_p4, %p63_p2 }
 0x165   : > { %s756_s4 = sshll.u32 %s749_s5, 4  ;;  %s6254_s4 = int_to_ptr.vmem [resolvable:$true] %s756_s4 }
 0x166   : > { %p5589_p8 = pneg %p6250_p11 }
 0x168   : > { %s6248_s26 = scalar_lea.hbm %s7111_s22, %s4378_s23  ;;  %s5592_s12 = scalar_lea.hbm %s7111_s22, 512 }
 0x169   : > { %s5587_s25 = scalar_lea.hbm %s6248_s26, 256  ;;  %p5593_p13 = scmp.lt.u32.totalorder %s6248_s26, %s7111_s22 }
 0x16a   : > { %p5588_p12 = scmp.ne.s32.totalorder %s6248_s26, %s5587_s25  ;;  %p5594_p0 = scmp.lt.u32.totalorder %s5592_s12, %s5587_s25 }
 0x16b   : > { %p5596_p5 = scmp.lt.u32.totalorder %s5587_s25, %s6248_s26 }
 0x16c   : > { %p5590_p1 = pnand %p5589_p8, %p5588_p12  ;;  %p5595_p2 = por %p5594_p0, %p5593_p13 }
 0x16e   : > { %p5591_p3 = pneg %p5590_p1  ;;  %p5597_p9 = por %p5596_p5, %p5595_p2 }
 0x170   : > { %p5598_p4 = pnand %p5597_p9, %p5591_p3 }
 0x172   : > { %5601 = shalt.err (!%p5598_p4)
}
 0x173   : > { %s5602_s3 = scalar_lea.vmem %s6254_s4, 256  ;;  %s5762_s23 = smov [#allocation2]  }
 0x174   : > { %p5603_p12 = scmp.ne.s32.totalorder %s6254_s4, %s5602_s3  ;;  %s5607_s0 = sshll.u32 %s5762_s23, 4  ;;  %s5608_s0 = int_to_ptr.vmem [resolvable:$false] %s5607_s0 }
 0x175   : > { %s5609_s10 = scalar_lea.vmem %s5608_s0, 512  ;;  %p5610_p6 = scmp.lt.s32.totalorder %s6254_s4, %s5608_s0 }
 0x176   : > { %p5605_p1 = pnand %p5603_p12, %p5589_p8  ;;  %p5611_p13 = scmp.lt.s32.totalorder %s5609_s10, %s5602_s3 }
 0x178   : > { %p5606_p10 = pneg %p5605_p1  ;;  %p5612_p0 = por %p5611_p13, %p5610_p6 }
 0x17a   : > { %p5613_p2 = pnand %p5612_p0, %p5606_p10 }
 0x17c   : > { %5616 = shalt.err (!%p5613_p2)
}
 0x17d   : > { %s5763_s25 = smov 128   ;;  %s5764_s12 = smov 8  }
 0x17e   : > { %s7113_s5 = scalar_lea.sflag [#allocation3], %s6237_s2  ;;  %s772_s23 = sand.u32 1, %s5745_s30  }
 0x17f   : > { %5013 = dma.hbm_to_vmem [thread:$0]  (!%p6250_p11), %s6248_s26, 256, %s6254_s4, %s7113_s5, %s5763_s25, %s5763_s25, %s5764_s12  }
 0x180   : > { %s4239_s7 = sshll.u32 %s5745_s30, 4  ;;  %s7114_s10 = sld [smem:[#allocation41_spill]] }
 0x181   : > { %s775_s9 = scalar_lea.vmem [#allocation5], %s6237_s2  ;;  %s773_s13 = scalar_lea.sflag [#allocation6], %s772_s23 }
 0x182   : > { %s782_s11 = sshll.u32 %s775_s9, 4  ;;  %s783_s11 = int_to_ptr.vmem [resolvable:$true] %s782_s11 }
 0x186   : > { %s6289_s8 = scalar_lea.hbm %s7114_s10, %s4239_s7  ;;  %s5622_s25 = scalar_lea.hbm %s7114_s10, 32 }
 0x187   : > { %s5617_s14 = scalar_lea.hbm %s6289_s8, 16  ;;  %p5623_p5 = scmp.lt.u32.totalorder %s6289_s8, %s7114_s10 }
 0x188   : > { %p5618_p6 = scmp.ne.s32.totalorder %s6289_s8, %s5617_s14  ;;  %p5624_p9 = scmp.lt.u32.totalorder %s5622_s25, %s5617_s14 }
 0x189   : > { %p5626_p12 = scmp.lt.u32.totalorder %s5617_s14, %s6289_s8 }
 0x18a   : > { %p5620_p10 = pnand %p5618_p6, %p5589_p8  ;;  %p5625_p4 = por %p5624_p9, %p5623_p5 }
 0x18c   : > { %p5621_p3 = pneg %p5620_p10  ;;  %p5627_p1 = por %p5626_p12, %p5625_p4 }
 0x18e   : > { %p5628_p13 = pnand %p5627_p1, %p5621_p3 }
 0x190   : > { %5631 = shalt.err (!%p5628_p13)
}
 0x191   : > { %s5632_s9 = scalar_lea.vmem %s783_s11, 16  ;;  %s5765_s2 = smov [#allocation5]  }
 0x192   : > { %p5633_p0 = scmp.ne.s32.totalorder %s783_s11, %s5632_s9  ;;  %s5637_s5 = sshll.u32 %s5765_s2, 4  ;;  %s5638_s5 = int_to_ptr.vmem [resolvable:$false] %s5637_s5 }
 0x193   : > { %s5639_s23 = scalar_lea.vmem %s5638_s5, 32  ;;  %p5640_p10 = scmp.lt.s32.totalorder %s783_s11, %s5638_s5 }
 0x194   : > { %p5635_p2 = pnand %p5633_p0, %p5589_p8  ;;  %p5641_p7 = scmp.lt.s32.totalorder %s5639_s23, %s5632_s9 }
 0x196   : > { %p5636_p6 = pneg %p5635_p2  ;;  %p5642_p5 = por %p5641_p7, %p5640_p10 }
 0x198   : > { %p5643_p9 = pnand %p5642_p5, %p5636_p6 }
 0x19a   : > { %5646 = shalt.err (!%p5643_p9)
}
 0x19b   : > { %5016 = dma.hbm_to_vmem [thread:$0]  (!%p6250_p11), %s6289_s8, 16, %s783_s11, %s773_s13  }
 0x19c   : > { %s7115_s14 = sld [smem:[#allocation38_spill]] }
 0x1a2   : > { %p7116_p3 = scmp.ne.s32.totalorder %s7115_s14, 0 }
 0x1a3   : > { %s6314_s0 = sand.u32 (!%p7116_p3), 1, %s5737_s28   ;;  %p7117_p7 = scmp.ne.s32.totalorder (!%p7116_p3), %s7108_s24, 0 }
 0x1a4   : > { %799 = sbr.rel (%p7116_p3) target bundleno = 6487 (0x1957), region = 108  ;;  %s4241_s3 = sshll.u32 (!%p7116_p3), %s6314_s0, 4 }
 0x1a5   : > { %s802_s26 = scalar_lea.sflag (!%p7116_p3), [#allocation3], %s6314_s0  ;;  %s6318_s4 = scalar_lea.vmem (!%p7116_p3), [#allocation2], %s4241_s3 }
 0x1ab   : > { %5692 = dma.done.wait (%p7117_p7), %s802_s26, 256  }
 0x1ac   : > { %5694 = vsyncadd (%p7117_p7), %s802_s26, 4294967040  ;;  %s7118_s6 = sld [smem:[#allocation37_spill]] }
 0x1b2   : > { %s810_s8 = sand.u32 1, %s7118_s6  }
 0x1b3   : > { %s811_s11 = scalar_lea.sflag [#allocation6], %s810_s8 }
 0x1b4   : > { %5696 = dma.done.wait (%p7117_p7), %s811_s11, 16  }
 0x1b5   : > { %5698 = vsyncadd (%p7117_p7), %s811_s11, 4294967280  ;;  %p7119_p11 = scmp.eq.s32.totalorder %s7118_s6, 0 }
 0x1b7   : > { %5700 = dma.done.wait (%p7119_p11), [#allocation6], 32   ;;  %p7120_p8 = pmov %p7119_p11 }
 0x1b9   : > { %5702 = vsyncadd (%p7120_p8), [#allocation6], 4294967264  ;;  %p7121_p4 = pmov %p7120_p8 }
 0x1bb   : > { %5704 = dma.done.wait (%p7121_p4), [#allocation9], 64   ;;  %p7122_p12 = pmov %p7121_p4 }
 0x1bc   : > { %p7123_p1 = pmov %p7121_p4 }
 0x1bd   : > { %5706 = vsyncadd (%p7122_p12), [#allocation9], 4294967232 }
 0x1be   : > { %5708 = dma.done.wait (%p7123_p1), [#allocation12], 64   ;;  %p7124_p13 = pmov %p7123_p1 }
 0x1bf   : > { %p7125_p0 = pmov %p7123_p1 }
 0x1c0   : > { %5710 = vsyncadd (%p7124_p13), [#allocation12], 4294967232 }
 0x1c1   : > { %5712 = dma.done.wait (%p7125_p0), [#allocation15], 64   ;;  %p7126_p2 = pmov %p7125_p0 }
 0x1c2   : > { %p7127_p6 = pmov %p7125_p0 }
 0x1c3   : > { %5714 = vsyncadd (%p7126_p2), [#allocation15], 4294967232 }
 0x1c4   : > { %5716 = dma.done.wait (%p7127_p6), [#allocation18], 1056   ;;  %p7128_p10 = pmov %p7125_p0 }
 0x1c5   : > { %p7129_p5 = pmov %p7125_p0 }
 0x1c6   : > { %5718 = vsyncadd (%p7128_p10), [#allocation18], 4294966240 }
 0x1c7   : > { %5720 = dma.done.wait (%p7129_p5), [#allocation21], 1056   ;;  %p7130_p9 = pmov %p7125_p0 }
 0x1c8   : > { %p7131_p3 = pmov %p7125_p0 }
 0x1c9   : > { %5722 = vsyncadd (%p7130_p9), [#allocation21], 4294966240 }
 0x1ca   : > { %5724 = dma.done.wait (%p7131_p3), [#allocation24], 512   ;;  %p7132_p7 = pmov %p7125_p0 }
 0x1cb   : > { %vm956_vm0 = vcmask 261120   ;;  %s7133_s7 = sld [smem:[#allocation43_spill]]  ;;  %v6371_v5 = vld [vmem:[%s6318_s4] sm:$0xff]  ;;  %v6376_v7 = vld [vmem:[%s6318_s4 + $0x8] sm:$0xff]  ;;  %vm1048_vm1 = vcmask 130048   ;;  %s7068_s3 = smov 112  }
 0x1cc   : > { %5726 = vsyncadd (%p7132_p7), [#allocation24], 4294966784  ;;  %4512 = vmatprep.mubr.msk.f32.mxu0 %vm956_vm0, %v6371_v5  ;;  %v4256_v8 = vld [vmem:[#allocation7] ss:$0 sm:$0xff]  ;;  %s7066_s26 = smov 96   ;;  %p934_p11 = scmp.lt.s32.totalorder %s7118_s6, 1 }
 0x1cd   : > { %vm6390_vm2 = vmpackc.low %vm1048_vm1, %vm1048_vm1  ;;  %s7136_s24 = sld [smem:[#allocation40_spill]]  ;;  %s7064_s12 = smov 64   ;;  %vm1725_vm3 = vcmask 523264   ;;  %vm3017_vm4 = vcmask 64512  }
 0x1ce   : > { %s6410_s4 = scalar_select %p934_p11, %s7118_s6, 1  ;;  %vm6743_vm5 = vmpackc.low %vm3017_vm4, %vm3017_vm4 }
 0x1cf   : > { %s7137_s5 = sld [smem:[#allocation45_spill]]  ;;  %s7062_s9 = smov 16  }
 0x1d0   : > { %s7138_s14 = sld [smem:[#allocation49_spill]]  ;;  %s7139_s2 = sld [smem:[#allocation51_spill]] }
 0x1d1   : > { %v945_v0 = vld [vmem:[%s7133_s7] sm:$0xff]  ;;  %v946_v1 = vld [vmem:[%s7133_s7 + $0x8] sm:$0xff]  ;;  %v947_v2 = vld [vmem:[%s7133_s7 + $0x10] sm:$0xff]  ;;  %s7140_s11 = smov 112   ;;  %s7144_s23 = sld [smem:[#allocation54_spill]] }
 0x1d2   : > { %v4727_v3 = vpack.c.bf16 %v946_v1, %v945_v0  ;;  %v948_v4 = vld [vmem:[%s7133_s7 + $0x18] sm:$0xff]  ;;  %s5772_s8 = smov 48   ;;  %s4917_s13 = smul.u32 144, %s6314_s0 }
 0x1d3   : > { %v4731_v6 = vpack.c.bf16 %v948_v4, %v947_v2  ;;  %s936_s25 = scalar_lea.vmem %s7136_s24, %s6410_s4  ;;  %s7146_s24 = sld [smem:[#allocation42_spill]] }
 0x1d4   : > { %4728 = vmatprep.subr.bf16.mxu0 %v4727_v3  ;;  %v6416_v27 = vld [vmem:[%s936_s25] ss:$0 sm:$0xff]  ;;  %s4918_s10 = smul.u32 2304, %s7118_s6  ;;  %s3980_s6 = scalar_lea.sflag [#allocation4], %s6314_s0 }
 0x1d5   : > { %4730 = vmatpush3.bf16.msra.mxu0 %v4727_v3  ;;  %p7151_p4 = scmp.ne.s32.totalorder %s7109_s20, 0 }
 0x1d6   : > { %4732 = vmatprep.subr.bf16.mxu0 %v4731_v6 }
 0x1d9   : > { %4734 = vmatpush3.bf16.msra.mxu0 %v4731_v6 }
 0x1dc   : > { %4513 = vmatmul.mubr.msk.f32.vlgmr.msra.gmra.mrb[0].mxu0 %vm956_vm0, %v6376_v7 }
 0x2af   : > { %v4514_v9 = vpop.f32.mrb[0].mxu0 }
 0x2b0   : > { %v1035_v10 = vadd.f32 %v4514_v9, %v4256_v8  ;;  %v1029_v11 = vpop.f32.mrb[1].mxu0 }
 0x2b1   : > { %v1030_v12 = vadd.f32 %v4256_v8, %v1029_v11 }
 0x2b3   : > { %1040 = vrot.lane.b32.xlu0 %v1030_v12, %s7068_s3  ;;  %4519 = vmatprep.mubr.msk.f32.mxu1 %vm1048_vm1, %v1030_v12  ;;  %v6382_v13 = vpack.i.bf16 %v1035_v10, %v1030_v12 }
 0x2b5   : > { %5109 = vrot.lane.b32.xlu1 %v6382_v13, %s7066_s26 }
 0x2b7   : > { %1042 = vrot.lane.b32.xlu0 %v1035_v10, %s7068_s3  ;;  %s7142_s3 = smov 64  }
 0x325   : > { %v1041_v14 = vpop.permute.xlu0 %1040 }
 0x326   : > { %4526 = vmatprep.mubr.msk.f32.mxu0 %vm1048_vm1, %v1041_v14 }
 0x327   : > { %v5110_v15 = vpop.permute.xlu1 %5109 }
 0x328   : > { %v5112_v16 = vunpack.i.h.bf16 %v5110_v15  ;;  %v5111_v17 = vunpack.i.l.bf16 %v5110_v15 }
 0x329   : > { %v1043_v18 = vpop.permute.xlu0 %1042 }
 0x32a   : > { %v6394_v20 = vpack.i.bf16 %v1043_v18, %v1041_v14  ;;  %v4735_v21 = vpack.c.bf16 %v5112_v16, %v5111_v17 }
 0x32c   : > { %4737 = vmatprep.subr.msk.bf16.mxu1 %vm6390_vm2, %v4735_v21  ;;  %5114 = vrot.lane.b32.xlu1 %v6394_v20, %s7066_s26  ;;  %s7143_s26 = smov 16  }
 0x32d   : > { %4740 = vmatpush3.bf16.xpose.msk.msra.mxu1 %vm6390_vm2, %v4735_v21 }
 0x334   : > { %4520 = vmatmul.mubr.msk.f32.vlgmr.msra.gmra.mrb[0].mxu1 %vm1048_vm1, %v1035_v10 }
 0x39e   : > { %v5115_v22 = vpop.permute.xlu1 %5114 }
 0x39f   : > { %v5117_v23 = vunpack.i.h.bf16 %v5115_v22  ;;  %v5116_v24 = vunpack.i.l.bf16 %v5115_v22  ;;  %v1461_v22 = vld [vmem:[%s7137_s5] sm:$0xff] }
 0x3a1   : > { %v4741_v25 = vpack.c.bf16 %v5117_v23, %v5116_v24  ;;  %v1462_v23 = vld [vmem:[%s7137_s5 + $0x8] sm:$0xff] }
 0x3a2   : > { %v4755_v24 = vpack.c.bf16 %v1462_v23, %v1461_v22  ;;  %v1715_v22 = vld [vmem:[%s7139_s2 + $0x28] sm:$0xff] }
 0x3a3   : > { %4743 = vmatprep.subr.msk.bf16.mxu0 %vm6390_vm2, %v4741_v25 }
 0x3a4   : > { %4746 = vmatpush3.bf16.xpose.msk.msra.mxu0 %vm6390_vm2, %v4741_v25  ;;  %v1463_v25 = vld [vmem:[%s7137_s5 + $0x10] sm:$0xff] }
 0x3a5   : > { %4756 = vmatprep.subr.bf16.mxu0 %v4755_v24 }
 0x3ab   : > { %4527 = vmatmul.mubr.msk.f32.vlgmr.msra.gmra.mrb[2].mxu0 %vm1048_vm1, %v1043_v18 }
 0x3ac   : > { %4758 = vmatpush3.bf16.msra.mxu0 %v4755_v24  ;;  %v1716_v24 = vld [vmem:[%s7139_s2 + $0x30] sm:$0xff] }
 0x407   : > { %v4521_v26 = vpop.f32.mrb[0].mxu1 }
 0x408   : > { %v1220_v28 = vmul.f32 0.25, %v4521_v26  ;;  %v1123_v29 = vpop.f32.mrb[1].mxu1  ;;  %v1464_v26 = vld [vmem:[%s7137_s5 + $0x18] sm:$0xff] }
 0x409   : > { %v1219_v30 = vmul.f32 0.25, %v1123_v29 }
 0x40a   : > { %v1230_v31 = vadd.f32 %v6416_v27, %v1220_v28  ;;  %v4759_v28 = vpack.c.bf16 %v1464_v26, %v1463_v25  ;;  %v1717_v25 = vld [vmem:[%s7139_s2 + $0x38] sm:$0xff] }
 0x40b   : > { %v1229_v32 = vadd.f32 %v6416_v27, %v1219_v30  ;;  %v4783_v26 = vpack.c.bf16 %v1717_v25, %v1716_v24  ;;  %v4284_v24 = vld [vmem:[#allocation17] ss:$0 sm:$0xff] }
 0x40c   : > { %v1236_v33 = vsel %vm1048_vm1, %v1230_v31, -inf  ;;  %4760 = vmatprep.subr.bf16.mxu0 %v4759_v28 }
 0x40d   : > { %1237 = vmax.xlane.f32.xlu1 %v1236_v33  ;;  %v1233_v34 = vsel %vm1048_vm1, %v1229_v32, -inf  ;;  %4762 = vmatpush3.bf16.msra.mxu0 %v4759_v28  ;;  %v4277_v28 = vld [vmem:[#allocation13] ss:$0 sm:$0xff] }
 0x40e   : > { %1234 = vmax.xlane.f32.xlu0 %v1233_v34 }
 0x47e   : > { %v4528_v35 = vpop.f32.mrb[2].mxu0 }
 0x47f   : > { %v1210_v36 = vpop.f32.mrb[3].mxu0  ;;  %v1222_v37 = vmul.f32 0.25, %v4528_v35 }
 0x480   : > { %v1221_v38 = vmul.f32 0.25, %v1210_v36 }
 0x481   : > { %v1232_v41 = vadd.f32 %v6416_v27, %v1222_v37  ;;  %v4272_v37 = vld [vmem:[#allocation8] ss:$0 sm:$0xff] }
 0x482   : > { %v1231_v39 = vadd.f32 %v6416_v27, %v1221_v38 }
 0x483   : > { %v1242_v42 = vsel %vm1048_vm1, %v1232_v41, -inf }
 0x484   : > { %v1239_v40 = vsel %vm1048_vm1, %v1231_v39, -inf }
 0x485   : > { %1240 = vmax.xlane.f32.xlu0 %v1239_v40 }
 0x489   : > { %1243 = vmax.xlane.f32.xlu0 %v1242_v42 }
 0x49a   : > { %v1238_v43 = vpop.xlane.xlu1 %1237 }
 0x49b   : > { %v1246_v44 = vsub.f32 %v1230_v31, %v1238_v43  ;;  %v1235_v45 = vpop.xlane.xlu0 %1234 }
 0x49c   : > { %v1245_v46 = vsub.f32 %v1229_v32, %v1235_v45 }
 0x49d   : > { %v1251_v47 = vmul.f32 1.442695, %v1246_v44 }
 0x49e   : > { %v1249_v48 = vmul.f32 1.442695, %v1245_v46 }
 0x49f   : > { %5195 = vpow2.f32 %v1251_v47 }
 0x4a0   : > { %5197 = vpow2.f32 %v1249_v48 }
 0x4a9   : > { %v5196_v49 = vpop.eup %5195 }
 0x4aa   : > { %v5198_v50 = vpop.eup %5197  ;;  %v1260_v51 = vsel %vm1048_vm1, %v5196_v49, 0.0 }
 0x4ab   : > { %1261 = vadd.xlane.f32.xlu0 %v1260_v51  ;;  %v1257_v52 = vsel %vm1048_vm1, %v5198_v50, 0.0 }
 0x4ac   : > { %1258 = vadd.xlane.f32.xlu1 %v1257_v52 }
 0x512   : > { %v1241_v53 = vpop.xlane.xlu0 %1240 }
 0x513   : > { %v1247_v54 = vsub.f32 %v1231_v39, %v1241_v53 }
 0x515   : > { %v1253_v55 = vmul.f32 1.442695, %v1247_v54 }
 0x516   : > { %v1244_v56 = vpop.xlane.xlu0 %1243 }
 0x517   : > { %5199 = vpow2.f32 %v1253_v55  ;;  %v1248_v57 = vsub.f32 %v1232_v41, %v1244_v56  ;;  %v1601_v55 = vld [vmem:[%s7138_s14 + $0x8] sm:$0xff] }
 0x519   : > { %v1255_v58 = vmul.f32 1.442695, %v1248_v57  ;;  %v1602_v57 = vld [vmem:[%s7138_s14 + $0x10] sm:$0xff] }
 0x51b   : > { %5201 = vpow2.f32 %v1255_v58  ;;  %v1603_v58 = vld [vmem:[%s7138_s14 + $0x18] sm:$0xff] }
 0x521   : > { %v5200_v59 = vpop.eup %5199 }
 0x522   : > { %v1263_v60 = vsel %vm1048_vm1, %v5200_v59, 0.0 }
 0x523   : > { %1264 = vadd.xlane.f32.xlu1 %v1263_v60 }
 0x525   : > { %v5202_v61 = vpop.eup %5201 }
 0x526   : > { %v1266_v62 = vsel %vm1048_vm1, %v5202_v61, 0.0 }
 0x527   : > { %1267 = vadd.xlane.f32.xlu0 %v1266_v62 }
 0x534   : > { %5119 = vrot.lane.b32.xlu1 %v6382_v13, %s7064_s12 }
 0x538   : > { %v1262_v2 = vpop.xlane.xlu0 %1261 }
 0x539   : > { %v1259_v63 = vpop.xlane.xlu1 %1258 }
 0x53a   : > { %5203 = vrcp.f32 %v1259_v63 }
 0x53b   : > { %5205 = vrcp.f32 %v1262_v2 }
 0x53d   : > { %5124 = vrot.lane.b32.xlu0 %v6394_v20, %s7064_s12  ;;  %s7141_s12 = smov 96  }
 0x544   : > { %v5204_v0 = vpop.eup %5203 }
 0x545   : > { %v1273_v1 = vmul.f32 %v5204_v0, %v5198_v50  ;;  %v5206_v11 = vpop.eup %5205 }
 0x546   : > { %v1274_v16 = vmul.f32 %v5206_v11, %v5196_v49 }
 0x547   : > { %4533 = vmatprep.mubr.msk.f32.mxu1 %vm1048_vm1, %v1273_v1 }
 0x5b0   : > { %v1265_v3 = vpop.xlane.xlu1 %1264 }
 0x5b1   : > { %5207 = vrcp.f32 %v1265_v3  ;;  %v4275_v3 = vld [vmem:[#allocation10] ss:$0 sm:$0xff] }
 0x5b4   : > { %v5120_v4 = vpop.permute.xlu1 %5119  ;;  %v1268_v6 = vpop.xlane.xlu0 %1267 }
 0x5b5   : > { %v5122_v8 = vunpack.i.h.bf16 %v5120_v4  ;;  %v5121_v9 = vunpack.i.l.bf16 %v5120_v4  ;;  %5209 = vrcp.f32 %v1268_v6  ;;  %v4276_v6 = vld [vmem:[#allocation11] ss:$0 sm:$0xff] }
 0x5b7   : > { %v4747_v10 = vpack.c.bf16 %v5122_v8, %v5121_v9 }
 0x5b8   : > { %v5125_v12 = vpop.permute.xlu0 %5124 }
 0x5b9   : > { %v5127_v13 = vunpack.i.h.bf16 %v5125_v12  ;;  %v5126_v14 = vunpack.i.l.bf16 %v5125_v12  ;;  %4748 = vmatprep.subr.bf16.mxu1 %v4747_v10 }
 0x5ba   : > { %4750 = vmatpush3.bf16.msra.mxu1 %v4747_v10 }
 0x5bb   : > { %v5208_v15 = vpop.eup %5207  ;;  %v4751_v17 = vpack.c.bf16 %v5127_v13, %v5126_v14  ;;  %v1710_v14 = vld [vmem:[%s7139_s2] sm:$0xff] }
 0x5bc   : > { %v1275_v18 = vmul.f32 %v5208_v15, %v5200_v59  ;;  %v4767_v59 = vpack.c.bf16 %v1603_v58, %v1602_v57  ;;  %v1711_v15 = vld [vmem:[%s7139_s2 + $0x8] sm:$0xff] }
 0x5bd   : > { %4534 = vmatmul.mubr.msk.f32.vlgmr.msra.gmra.mrb[2].mxu1 %vm1048_vm1, %v1274_v16  ;;  %4752 = vmatprep.subr.bf16.mxu1 %v4751_v17  ;;  %v4771_v16 = vpack.c.bf16 %v1711_v15, %v1710_v14 }
 0x5be   : > { %4754 = vmatpush3.bf16.msra.mxu1 %v4751_v17  ;;  %4540 = vmatprep.mubr.msk.f32.mxu1 %vm1048_vm1, %v1275_v18  ;;  %v1712_v17 = vld [vmem:[%s7139_s2 + $0x10] sm:$0xff]  ;;  %v1713_v18 = vld [vmem:[%s7139_s2 + $0x18] sm:$0xff] }
 0x5bf   : > { %v5210_v20 = vpop.eup %5209  ;;  %4772 = vmatprep.subr.bf16.mxu0 %v4771_v16 }
 0x5c0   : > { %v1276_v21 = vmul.f32 %v5210_v20, %v5202_v61  ;;  %v1714_v20 = vld [vmem:[%s7139_s2 + $0x20] sm:$0xff] }
 0x5c1   : > { %v4779_v23 = vpack.c.bf16 %v1715_v22, %v1714_v20  ;;  %v4283_v20 = vld [vmem:[#allocation16] ss:$0 sm:$0xff] }
 0x5c2   : > { %4541 = vmatmul.mubr.msk.f32.vlgmr.msra.gmra.mrb[4].mxu1 %vm1048_vm1, %v1276_v21  ;;  %v4775_v21 = vpack.c.bf16 %v1713_v18, %v1712_v17 }
 0x690   : > { %v4535_v29 = vpop.f32.mrb[2].mxu1 }
 0x691   : > { %v1355_v30 = vpop.f32.mrb[3].mxu1 }
 0x695   : > { %v4542_v31 = vpop.f32.mrb[4].mxu1 }
 0x696   : > { %v1442_v32 = vpop.f32.mrb[5].mxu1 }
 0x697   : > { %1453 = vrot.lane.b32.xlu1 %v1442_v32, %s7062_s9 }
 0x69b   : > { %1455 = vrot.lane.b32.xlu1 %v4542_v31, %s7062_s9  ;;  %s6852_s9 = scalar_lea.vmem [#allocation25], %s4917_s13 }
 0x709   : > { %v1454_v33 = vpop.permute.xlu1 %1453 }
 0x70a   : > { %v1459_v34 = vsel %vm1048_vm1, %v1355_v30, %v1454_v33 }
 0x70b   : > { %4551 = vmatprep.mubr.msk.f32.mxu0 %vm956_vm0, %v1459_v34 }
 0x70d   : > { %v1456_v35 = vpop.permute.xlu1 %1455 }
 0x70e   : > { %v1460_v36 = vsel %vm1048_vm1, %v4535_v29, %v1456_v35 }
 0x70f   : > { %4552 = vmatmul.mubr.msk.f32.vlgmr.msra.gmra.mrb[4].mxu0 %vm956_vm0, %v1460_v36 }
 0x710   : > { %4774 = vmatpush3.bf16.msra.mxu0 %v4771_v16 }
 0x711   : > { %4776 = vmatprep.subr.bf16.mxu0 %v4775_v21 }
 0x714   : > { %4778 = vmatpush3.bf16.msra.mxu0 %v4775_v21 }
 0x715   : > { %4780 = vmatprep.subr.bf16.mxu0 %v4779_v23 }
 0x718   : > { %4782 = vmatpush3.bf16.msra.mxu0 %v4779_v23 }
 0x719   : > { %4784 = vmatprep.subr.bf16.mxu0 %v4783_v26 }
 0x71c   : > { %4786 = vmatpush3.bf16.msra.mxu0 %v4783_v26 }
 0x7e2   : > { %v4553_v38 = vpop.f32.mrb[4].mxu0 }
 0x7e3   : > { %v1550_v39 = vadd.f32 %v4553_v38, %v4272_v37  ;;  %v1544_v40 = vpop.f32.mrb[5].mxu0 }
 0x7e4   : > { %v1545_v41 = vadd.f32 %v4272_v37, %v1544_v40 }
 0x7e5   : > { %v1554_v42 = vadd.f32 %v1550_v39, %v6376_v7 }
 0x7e6   : > { %v1553_v43 = vadd.f32 %v1545_v41, %v6371_v5  ;;  %v1600_v5 = vld [vmem:[%s7138_s14] sm:$0xff] }
 0x7e7   : > { %v1560_v44 = vsel %vm956_vm0, %v1554_v42, 0.0  ;;  %v4763_v56 = vpack.c.bf16 %v1601_v55, %v1600_v5 }
 0x7e8   : > { %1561 = vadd.xlane.f32.xlu1 %v1560_v44  ;;  %v1557_v45 = vsel %vm956_vm0, %v1553_v43, 0.0 }
 0x7e9   : > { %1558 = vadd.xlane.f32.xlu0 %v1557_v45  ;;  %4764 = vmatprep.subr.bf16.mxu1 %v4763_v56 }
 0x7ea   : > { %4766 = vmatpush3.bf16.msra.mxu1 %v4763_v56 }
 0x7eb   : > { %4768 = vmatprep.subr.bf16.mxu1 %v4767_v59 }
 0x7ee   : > { %4770 = vmatpush3.bf16.msra.mxu1 %v4767_v59 }
 0x875   : > { %v1562_v46 = vpop.xlane.xlu1 %1561 }
 0x876   : > { %v1565_v47 = vmul.f32 0.03125, %v1562_v46  ;;  %v1559_v48 = vpop.xlane.xlu0 %1558 }
 0x877   : > { %v1564_v49 = vmul.f32 0.03125, %v1559_v48 }
 0x878   : > { %v1567_v50 = vsub.f32 %v1554_v42, %v1565_v47 }
 0x879   : > { %v1566_v51 = vsub.f32 %v1553_v43, %v1564_v49 }
 0x87a   : > { %v1569_v54 = vmul.f32 %v1567_v50, %v1567_v50 }
 0x87b   : > { %v1568_v52 = vmul.f32 %v1566_v51, %v1566_v51 }
 0x87c   : > { %v1573_v7 = vsel %vm956_vm0, %v1569_v54, 0.0 }
 0x87d   : > { %v1570_v53 = vsel %vm956_vm0, %v1568_v52, 0.0 }
 0x87e   : > { %1571 = vadd.xlane.f32.xlu0 %v1570_v53 }
 0x882   : > { %1574 = vadd.xlane.f32.xlu0 %v1573_v7 }
 0x90b   : > { %v1572_v60 = vpop.xlane.xlu0 %1571 }
 0x90c   : > { %v1576_v61 = vmul.f32 0.03125, %v1572_v60 }
 0x90e   : > { %v1578_v62 = vadd.f32 1e-12, %v1576_v61 }
 0x90f   : > { %v1575_v63 = vpop.xlane.xlu0 %1574 }
 0x910   : > { %5211 = vrsqrt.f32 %v1578_v62  ;;  %v1577_v0 = vmul.f32 0.03125, %v1575_v63 }
 0x912   : > { %v1579_v1 = vadd.f32 1e-12, %v1577_v0 }
 0x914   : > { %5213 = vrsqrt.f32 %v1579_v1 }
 0x91a   : > { %v5212_v2 = vpop.eup %5211 }
 0x91b   : > { %v1582_v4 = vmul.f32 %v5212_v2, %v1566_v51  ;;  %v4280_v51 = vld [vmem:[#allocation14] ss:$0 sm:$0xff] }
 0x91d   : > { %v1590_v8 = vmul.f32 %v4275_v3, %v1582_v4  ;;  %v4285_v4 = vld [vmem:[%s7133_s7 + $0x20] sm:$0xff] }
 0x91e   : > { %v5214_v9 = vpop.eup %5213 }
 0x91f   : > { %v1583_v10 = vmul.f32 %v5214_v9, %v1567_v50  ;;  %v1598_v11 = vadd.f32 %v4276_v6, %v1590_v8  ;;  %v4287_v9 = vld [vmem:[%s7133_s7 + $0x30] sm:$0xff] }
 0x921   : > { %v1591_v12 = vmul.f32 %v4275_v3, %v1583_v10  ;;  %4562 = vmatprep.mubr.msk.f32.mxu1 %vm956_vm0, %v1598_v11  ;;  %v4288_v10 = vld [vmem:[%s7133_s7 + $0x38] sm:$0xff] }
 0x923   : > { %v1599_v13 = vadd.f32 %v4276_v6, %v1591_v12  ;;  %v4286_v6 = vld [vmem:[%s7133_s7 + $0x28] sm:$0xff]  ;;  %s7145_s7 = sld [smem:[#allocation55_spill]] }
 0x924   : > { %v4787_v8 = vpack.c.bf16 %v4286_v6, %v4285_v4 }
 0x925   : > { %4563 = vmatmul.mubr.msk.f32.vlgmr.msra.gmra.mrb[6].mxu1 %vm956_vm0, %v1599_v13 }
 0x926   : > { %4788 = vmatprep.subr.bf16.mxu1 %v4787_v8 }
 0x927   : > { %4790 = vmatpush3.bf16.msra.mxu1 %v4787_v8 }
 0x9f8   : > { %v4564_v29 = vpop.f32.mrb[6].mxu1 }
 0x9f9   : > { %v1689_v30 = vadd.f32 %v4564_v29, %v4277_v28  ;;  %v1683_v31 = vpop.f32.mrb[7].mxu1 }
 0x9fa   : > { %v1684_v32 = vadd.f32 %v4277_v28, %v1683_v31 }
 0x9fb   : > { %v1695_v33 = vmul.f32 0.044715, %v1689_v30  ;;  %v1693_v48 = vmul.f32 0.5, %v1689_v30 }
 0x9fc   : > { %v1694_v34 = vmul.f32 0.044715, %v1684_v32  ;;  %v1692_v46 = vmul.f32 0.5, %v1684_v32 }
 0x9fd   : > { %v1697_v35 = vmul.f32 %v1695_v33, %v1689_v30 }
 0x9fe   : > { %v1696_v36 = vmul.f32 %v1694_v34, %v1684_v32 }
 0x9ff   : > { %v1699_v37 = vmul.f32 %v1697_v35, %v1689_v30 }
 0xa00   : > { %v1698_v38 = vmul.f32 %v1696_v36, %v1684_v32 }
 0xa01   : > { %v1701_v39 = vadd.f32 %v1699_v37, %v1689_v30  ;;  %v4289_v30 = vld [vmem:[#allocation7 + $0x1] ss:$0 sm:$0xff] }
 0xa02   : > { %v1700_v40 = vadd.f32 %v1698_v38, %v1684_v32 }
 0xa03   : > { %v1703_v41 = vmul.f32 0.7978846, %v1701_v39 }
 0xa04   : > { %v1702_v42 = vmul.f32 0.7978846, %v1700_v40 }
 0xa05   : > { %5215 = vtanh.f32 %v1703_v41 }
 0xa06   : > { %5217 = vtanh.f32 %v1702_v42 }
 0xa0f   : > { %v5216_v43 = vpop.eup %5215 }
 0xa10   : > { %v5218_v44 = vpop.eup %5217  ;;  %v1707_v45 = vadd.f32 1.0, %v5216_v43 }
 0xa11   : > { %v1706_v47 = vadd.f32 1.0, %v5218_v44 }
 0xa12   : > { %v1709_v50 = vmul.f32 %v1707_v45, %v1693_v48 }
 0xa13   : > { %v1708_v49 = vmul.f32 %v1706_v47, %v1692_v46 }
 0xa15   : > { %4581 = vmatprep.mubr.msk.f32.mxu0 %vm1725_vm3, %v1708_v49 }
 0xa16   : > { %4582 = vmatmul.mubr.msk.f32.vlgmr.msra.gmra.mrb[6].mxu0 %vm1725_vm3, %v1709_v50 }
 0xae9   : > { %v4583_v52 = vpop.f32.mrb[6].mxu0 }
 0xaea   : > { %v1804_v53 = vadd.f32 %v4583_v52, %v4280_v51  ;;  %v1798_v54 = vpop.f32.mrb[7].mxu0 }
 0xaeb   : > { %v1799_v7 = vadd.f32 %v4280_v51, %v1798_v54 }
 0xaec   : > { %v1808_v5 = vadd.f32 %v1804_v53, %v1599_v13 }
 0xaed   : > { %v1807_v55 = vadd.f32 %v1799_v7, %v1598_v11  ;;  %v4791_v11 = vpack.c.bf16 %v4288_v10, %v4287_v9 }
 0xaee   : > { %v1814_v56 = vsel %vm956_vm0, %v1808_v5, 0.0 }
 0xaef   : > { %1815 = vadd.xlane.f32.xlu0 %v1814_v56  ;;  %v1811_v57 = vsel %vm956_vm0, %v1807_v55, 0.0  ;;  %4792 = vmatprep.subr.bf16.mxu1 %v4791_v11 }
 0xaf0   : > { %1812 = vadd.xlane.f32.xlu1 %v1811_v57  ;;  %4794 = vmatpush3.bf16.msra.mxu1 %v4791_v11 }
 0xb7c   : > { %v1816_v58 = vpop.xlane.xlu0 %1815 }
 0xb7d   : > { %v1818_v59 = vmul.f32 0.03125, %v1816_v58  ;;  %v1813_v60 = vpop.xlane.xlu1 %1812 }
 0xb7e   : > { %v1817_v61 = vmul.f32 0.03125, %v1813_v60 }
 0xb7f   : > { %v1820_v62 = vsub.f32 %v1808_v5, %v1818_v59 }
 0xb80   : > { %v1819_v63 = vsub.f32 %v1807_v55, %v1817_v61 }
 0xb81   : > { %v1822_v0 = vmul.f32 %v1820_v62, %v1820_v62 }
 0xb82   : > { %v1821_v1 = vmul.f32 %v1819_v63, %v1819_v63 }
 0xb83   : > { %v1826_v2 = vsel %vm956_vm0, %v1822_v0, 0.0 }
 0xb84   : > { %1827 = vadd.xlane.f32.xlu0 %v1826_v2  ;;  %v1823_v3 = vsel %vm956_vm0, %v1821_v1, 0.0 }
 0xb85   : > { %1824 = vadd.xlane.f32.xlu1 %v1823_v3 }
 0xc11   : > { %v1828_v12 = vpop.xlane.xlu0 %1827 }
 0xc12   : > { %v1830_v13 = vmul.f32 0.03125, %v1828_v12  ;;  %v1825_v14 = vpop.xlane.xlu1 %1824 }
 0xc13   : > { %v1829_v15 = vmul.f32 0.03125, %v1825_v14 }
 0xc14   : > { %v1832_v16 = vadd.f32 1e-12, %v1830_v13 }
 0xc15   : > { %v1831_v17 = vadd.f32 1e-12, %v1829_v15 }
 0xc16   : > { %5219 = vrsqrt.f32 %v1832_v16 }
 0xc17   : > { %5221 = vrsqrt.f32 %v1831_v17 }
 0xc20   : > { %v5220_v18 = vpop.eup %5219 }
 0xc21   : > { %v5222_v21 = vpop.eup %5221  ;;  %v1836_v22 = vmul.f32 %v5220_v18, %v1820_v62 }
 0xc22   : > { %v1835_v23 = vmul.f32 %v5222_v21, %v1819_v63 }
 0xc23   : > { %v1844_v25 = vmul.f32 %v4283_v20, %v1836_v22 }
 0xc24   : > { %v1843_v26 = vmul.f32 %v4283_v20, %v1835_v23 }
 0xc25   : > { %v6520_v29 = vadd.f32 %v4284_v24, %v1844_v25 }
 0xc26   : > { %v6518_v28 = vadd.f32 %v4284_v24, %v1843_v26 }
 0xc28   : > { %4592 = vmatprep.mubr.msk.f32.mxu1 %vm956_vm0, %v6518_v28 }
 0xc29   : > { %4593 = vmatmul.mubr.msk.f32.vlgmr.msra.gmra.mrb[8].mxu1 %vm956_vm0, %v6520_v29 }
 0xcfc   : > { %v4594_v31 = vpop.f32.mrb[8].mxu1 }
 0xcfd   : > { %v1944_v32 = vadd.f32 %v4594_v31, %v4289_v30  ;;  %v1938_v33 = vpop.f32.mrb[9].mxu1 }
 0xcfe   : > { %v1939_v34 = vadd.f32 %v4289_v30, %v1938_v33 }
 0xcff   : > { %1951 = vrot.lane.b32.xlu0 %v1944_v32, %s7140_s11 }
 0xd00   : > { %1949 = vrot.lane.b32.xlu1 %v1939_v34, %s7140_s11  ;;  %4599 = vmatprep.mubr.msk.f32.mxu1 %vm1048_vm1, %v1939_v34  ;;  %v6529_v35 = vpack.i.bf16 %v1944_v32, %v1939_v34 }
 0xd04   : > { %5129 = vrot.lane.b32.xlu1 %v6529_v35, %s7141_s12 }
 0xd71   : > { %v1952_v36 = vpop.permute.xlu0 %1951 }
 0xd72   : > { %v1950_v37 = vpop.permute.xlu1 %1949 }
 0xd73   : > { %v6533_v38 = vpack.i.bf16 %v1952_v36, %v1950_v37  ;;  %4606 = vmatprep.mubr.msk.f32.mxu0 %vm1048_vm1, %v1950_v37 }
 0xd75   : > { %5134 = vrot.lane.b32.xlu1 %v6533_v38, %s7141_s12 }
 0xd76   : > { %v5130_v39 = vpop.permute.xlu1 %5129 }
 0xd77   : > { %v5132_v40 = vunpack.i.h.bf16 %v5130_v39  ;;  %v5131_v41 = vunpack.i.l.bf16 %v5130_v39 }
 0xd79   : > { %v4795_v42 = vpack.c.bf16 %v5132_v40, %v5131_v41  ;;  %v4304_v41 = vld [vmem:[%s7137_s5 + $0x20] sm:$0xff] }
 0xd7b   : > { %4797 = vmatprep.subr.msk.bf16.mxu1 %vm6390_vm2, %v4795_v42 }
 0xd7c   : > { %4800 = vmatpush3.bf16.xpose.msk.msra.mxu1 %vm6390_vm2, %v4795_v42  ;;  %v4305_v42 = vld [vmem:[%s7137_s5 + $0x28] sm:$0xff] }
 0xd83   : > { %4600 = vmatmul.mubr.msk.f32.vlgmr.msra.gmra.mrb[10].mxu1 %vm1048_vm1, %v1944_v32 }
 0xde7   : > { %v5135_v43 = vpop.permute.xlu1 %5134 }
 0xde8   : > { %v5137_v44 = vunpack.i.h.bf16 %v5135_v43  ;;  %v5136_v45 = vunpack.i.l.bf16 %v5135_v43  ;;  %v4815_v43 = vpack.c.bf16 %v4305_v42, %v4304_v41  ;;  %v4326_v41 = vld [vmem:[%s7139_s2 + $0x70] sm:$0xff]  ;;  %v4327_v42 = vld [vmem:[%s7139_s2 + $0x78] sm:$0xff] }
 0xdea   : > { %v4801_v46 = vpack.c.bf16 %v5137_v44, %v5136_v45  ;;  %v4306_v44 = vld [vmem:[%s7137_s5 + $0x30] sm:$0xff]  ;;  %v4307_v45 = vld [vmem:[%s7137_s5 + $0x38] sm:$0xff]  ;;  %s5773_s5 = smov 32  }
 0xdec   : > { %4803 = vmatprep.subr.msk.bf16.mxu0 %vm6390_vm2, %v4801_v46 }
 0xded   : > { %4806 = vmatpush3.bf16.xpose.msk.msra.mxu0 %vm6390_vm2, %v4801_v46  ;;  %v4819_v46 = vpack.c.bf16 %v4307_v45, %v4306_v44  ;;  %v4317_v44 = vld [vmem:[#allocation13 + $0x1] ss:$0 sm:$0xff] }
 0xdee   : > { %4816 = vmatprep.subr.bf16.mxu0 %v4815_v43 }
 0xdf4   : > { %4607 = vmatmul.mubr.msk.f32.vlgmr.msra.gmra.mrb[8].mxu0 %vm1048_vm1, %v1952_v36 }
 0xdf5   : > { %4818 = vmatpush3.bf16.msra.mxu0 %v4815_v43  ;;  %v4843_v43 = vpack.c.bf16 %v4327_v42, %v4326_v41 }
 0xdf6   : > { %4820 = vmatprep.subr.bf16.mxu0 %v4819_v46 }
 0xdf9   : > { %4822 = vmatpush3.bf16.msra.mxu0 %v4819_v46 }
 0xe56   : > { %v4601_v47 = vpop.f32.mrb[10].mxu1 }
 0xe57   : > { %v2128_v48 = vmul.f32 0.25, %v4601_v47  ;;  %v2031_v49 = vpop.f32.mrb[11].mxu1 }
 0xe58   : > { %v2127_v50 = vmul.f32 0.25, %v2031_v49 }
 0xe59   : > { %v2132_v51 = vadd.f32 %v6416_v27, %v2128_v48 }
 0xe5a   : > { %v2131_v52 = vadd.f32 %v6416_v27, %v2127_v50 }
 0xe5b   : > { %v2138_v53 = vsel %vm1048_vm1, %v2132_v51, -inf }
 0xe5c   : > { %2139 = vmax.xlane.f32.xlu1 %v2138_v53  ;;  %v2135_v54 = vsel %vm1048_vm1, %v2131_v52, -inf }
 0xe5d   : > { %2136 = vmax.xlane.f32.xlu0 %v2135_v54 }
 0xec7   : > { %v4608_v7 = vpop.f32.mrb[8].mxu0 }
 0xec8   : > { %v2118_v5 = vpop.f32.mrb[9].mxu0  ;;  %v2130_v19 = vmul.f32 0.25, %v4608_v7  ;;  %v4308_v7 = vld [vmem:[#allocation8 + $0x1] ss:$0 sm:$0xff] }
 0xec9   : > { %v2129_v55 = vmul.f32 0.25, %v2118_v5 }
 0xeca   : > { %v2134_v58 = vadd.f32 %v6416_v27, %v2130_v19 }
 0xecb   : > { %v2133_v56 = vadd.f32 %v6416_v27, %v2129_v55 }
 0xecc   : > { %v2144_v59 = vsel %vm1048_vm1, %v2134_v58, -inf }
 0xecd   : > { %v2141_v57 = vsel %vm1048_vm1, %v2133_v56, -inf }
 0xece   : > { %2142 = vmax.xlane.f32.xlu0 %v2141_v57 }
 0xed2   : > { %2145 = vmax.xlane.f32.xlu0 %v2144_v59 }
 0xee9   : > { %v2140_v60 = vpop.xlane.xlu1 %2139 }
 0xeea   : > { %v2148_v61 = vsub.f32 %v2132_v51, %v2140_v60  ;;  %v2137_v62 = vpop.xlane.xlu0 %2136 }
 0xeeb   : > { %v2147_v63 = vsub.f32 %v2131_v52, %v2137_v62 }
 0xeec   : > { %v2153_v0 = vmul.f32 1.442695, %v2148_v61 }
 0xeed   : > { %v2151_v1 = vmul.f32 1.442695, %v2147_v63 }
 0xeee   : > { %5223 = vpow2.f32 %v2153_v0 }
 0xeef   : > { %5225 = vpow2.f32 %v2151_v1 }
 0xef8   : > { %v5224_v2 = vpop.eup %5223 }
 0xef9   : > { %v5226_v3 = vpop.eup %5225  ;;  %v2162_v4 = vsel %vm1048_vm1, %v5224_v2, 0.0 }
 0xefa   : > { %2163 = vadd.xlane.f32.xlu0 %v2162_v4  ;;  %v2159_v6 = vsel %vm1048_vm1, %v5226_v3, 0.0 }
 0xefb   : > { %2160 = vadd.xlane.f32.xlu1 %v2159_v6 }
 0xf5b   : > { %v2143_v27 = vpop.xlane.xlu0 %2142 }
 0xf5c   : > { %v2149_v8 = vsub.f32 %v2133_v56, %v2143_v27  ;;  %v4314_v27 = vld [vmem:[%s7138_s14 + $0x28] sm:$0xff] }
 0xf5e   : > { %v2155_v9 = vmul.f32 1.442695, %v2149_v8 }
 0xf5f   : > { %v2146_v10 = vpop.xlane.xlu0 %2145 }
 0xf60   : > { %5227 = vpow2.f32 %v2155_v9  ;;  %v2150_v11 = vsub.f32 %v2134_v58, %v2146_v10  ;;  %v4315_v9 = vld [vmem:[%s7138_s14 + $0x30] sm:$0xff]  ;;  %v4316_v10 = vld [vmem:[%s7138_s14 + $0x38] sm:$0xff] }
 0xf62   : > { %v2157_v12 = vmul.f32 1.442695, %v2150_v11  ;;  %v4827_v11 = vpack.c.bf16 %v4316_v10, %v4315_v9 }
 0xf64   : > { %5229 = vpow2.f32 %v2157_v12 }
 0xf6a   : > { %v5228_v13 = vpop.eup %5227 }
 0xf6b   : > { %v2165_v14 = vsel %vm1048_vm1, %v5228_v13, 0.0 }
 0xf6c   : > { %2166 = vadd.xlane.f32.xlu1 %v2165_v14 }
 0xf6e   : > { %v5230_v15 = vpop.eup %5229 }
 0xf6f   : > { %v2168_v16 = vsel %vm1048_vm1, %v5230_v15, 0.0 }
 0xf70   : > { %2169 = vadd.xlane.f32.xlu0 %v2168_v16 }
 0xf7d   : > { %5139 = vrot.lane.b32.xlu1 %v6529_v35, %s7142_s3 }
 0xf86   : > { %5144 = vrot.lane.b32.xlu0 %v6533_v38, %s7142_s3 }
 0xf87   : > { %v2164_v21 = vpop.xlane.xlu0 %2163 }
 0xf88   : > { %v2161_v17 = vpop.xlane.xlu1 %2160 }
 0xf89   : > { %5231 = vrcp.f32 %v2161_v17 }
 0xf8a   : > { %5233 = vrcp.f32 %v2164_v21 }
 0xf93   : > { %v5232_v18 = vpop.eup %5231 }
 0xf94   : > { %v2175_v20 = vmul.f32 %v5232_v18, %v5226_v3  ;;  %v5234_v31 = vpop.eup %5233 }
 0xf95   : > { %v2176_v36 = vmul.f32 %v5234_v31, %v5224_v2 }
 0xf96   : > { %4613 = vmatprep.mubr.msk.f32.mxu1 %vm1048_vm1, %v2175_v20  ;;  %v4311_v20 = vld [vmem:[#allocation10 + $0x1] ss:$0 sm:$0xff] }
 0xff9   : > { %v2167_v22 = vpop.xlane.xlu1 %2166 }
 0xffa   : > { %5235 = vrcp.f32 %v2167_v22  ;;  %v4312_v22 = vld [vmem:[#allocation11 + $0x1] ss:$0 sm:$0xff] }
 0xffd   : > { %v5140_v23 = vpop.permute.xlu1 %5139  ;;  %v2170_v24 = vpop.xlane.xlu0 %2169 }
 0xffe   : > { %v5142_v25 = vunpack.i.h.bf16 %v5140_v23  ;;  %v5141_v26 = vunpack.i.l.bf16 %v5140_v23  ;;  %5237 = vrcp.f32 %v2170_v24 }
0x1000   : > { %v4807_v30 = vpack.c.bf16 %v5142_v25, %v5141_v26 }
0x1001   : > { %v5145_v32 = vpop.permute.xlu0 %5144 }
0x1002   : > { %v5147_v33 = vunpack.i.h.bf16 %v5145_v32  ;;  %v5146_v34 = vunpack.i.l.bf16 %v5145_v32  ;;  %4808 = vmatprep.subr.bf16.mxu1 %v4807_v30  ;;  %v4320_v32 = vld [vmem:[%s7139_s2 + $0x40] sm:$0xff] }
0x1003   : > { %4810 = vmatpush3.bf16.msra.mxu1 %v4807_v30 }
0x1004   : > { %v5236_v35 = vpop.eup %5235  ;;  %v4811_v37 = vpack.c.bf16 %v5147_v33, %v5146_v34  ;;  %v4321_v33 = vld [vmem:[%s7139_s2 + $0x48] sm:$0xff] }
0x1005   : > { %v2177_v38 = vmul.f32 %v5236_v35, %v5228_v13  ;;  %v4831_v34 = vpack.c.bf16 %v4321_v33, %v4320_v32  ;;  %v4322_v35 = vld [vmem:[%s7139_s2 + $0x50] sm:$0xff]  ;;  %v2769_v32 = vld [vmem:[#allocation19 + $0x30] sm:$0xff] }
0x1006   : > { %4614 = vmatmul.mubr.msk.f32.vlgmr.msra.gmra.mrb[12].mxu1 %vm1048_vm1, %v2176_v36  ;;  %4812 = vmatprep.subr.bf16.mxu1 %v4811_v37  ;;  %v4323_v36 = vld [vmem:[%s7139_s2 + $0x58] sm:$0xff] }
0x1007   : > { %4814 = vmatpush3.bf16.msra.mxu1 %v4811_v37  ;;  %4620 = vmatprep.mubr.msk.f32.mxu1 %vm1048_vm1, %v2177_v38  ;;  %v4324_v37 = vld [vmem:[%s7139_s2 + $0x60] sm:$0xff]  ;;  %v4835_v38 = vpack.c.bf16 %v4323_v36, %v4322_v35  ;;  %v5770_v35 = vmov 0.0   ;;  %v2869_v36 = vld [vmem:[#allocation22 + $0x18] sm:$0xff] }
0x1008   : > { %v5238_v39 = vpop.eup %5237  ;;  %4832 = vmatprep.subr.bf16.mxu0 %v4831_v34  ;;  %v2867_v33 = vld [vmem:[#allocation22 + $0x8] sm:$0xff] }
0x1009   : > { %v2178_v40 = vmul.f32 %v5238_v39, %v5230_v15  ;;  %v4325_v39 = vld [vmem:[%s7139_s2 + $0x68] sm:$0xff] }
0x100b   : > { %4621 = vmatmul.mubr.msk.f32.vlgmr.msra.gmra.mrb[14].mxu1 %vm1048_vm1, %v2178_v40  ;;  %v4839_v40 = vpack.c.bf16 %v4325_v39, %v4324_v37  ;;  %v4855_v37 = vpack.c.bf16 %v2869_v36, %v2867_v33 }
0x10d9   : > { %v4615_v47 = vpop.f32.mrb[12].mxu1 }
0x10da   : > { %v2257_v48 = vpop.f32.mrb[13].mxu1 }
0x10de   : > { %v4622_v49 = vpop.f32.mrb[14].mxu1 }
0x10df   : > { %v2344_v50 = vpop.f32.mrb[15].mxu1 }
0x10e0   : > { %2355 = vrot.lane.b32.xlu1 %v2344_v50, %s7143_s26 }
0x10e4   : > { %2357 = vrot.lane.b32.xlu1 %v4622_v49, %s7143_s26 }
0x1152   : > { %v2356_v51 = vpop.permute.xlu1 %2355 }
0x1153   : > { %v2361_v52 = vsel %vm1048_vm1, %v2257_v48, %v2356_v51 }
0x1154   : > { %4631 = vmatprep.mubr.msk.f32.mxu0 %vm956_vm0, %v2361_v52 }
0x1156   : > { %v2358_v53 = vpop.permute.xlu1 %2357 }
0x1157   : > { %v2362_v54 = vsel %vm1048_vm1, %v4615_v47, %v2358_v53 }
0x1158   : > { %4632 = vmatmul.mubr.msk.f32.vlgmr.msra.gmra.mrb[10].mxu0 %vm956_vm0, %v2362_v54 }
0x1159   : > { %4834 = vmatpush3.bf16.msra.mxu0 %v4831_v34 }
0x115a   : > { %4836 = vmatprep.subr.bf16.mxu0 %v4835_v38 }
0x115d   : > { %4838 = vmatpush3.bf16.msra.mxu0 %v4835_v38 }
0x115e   : > { %4840 = vmatprep.subr.bf16.mxu0 %v4839_v40 }
0x1161   : > { %4842 = vmatpush3.bf16.msra.mxu0 %v4839_v40 }
0x1162   : > { %4844 = vmatprep.subr.bf16.mxu0 %v4843_v43 }
0x1165   : > { %4846 = vmatpush3.bf16.msra.mxu0 %v4843_v43 }
0x122b   : > { %v4633_v5 = vpop.f32.mrb[10].mxu0 }
0x122c   : > { %v2454_v19 = vadd.f32 %v4633_v5, %v4308_v7  ;;  %v2448_v55 = vpop.f32.mrb[11].mxu0 }
0x122d   : > { %v2449_v56 = vadd.f32 %v4308_v7, %v2448_v55 }
0x122e   : > { %v2458_v57 = vadd.f32 %v2454_v19, %v6520_v29 }
0x122f   : > { %v2457_v58 = vadd.f32 %v2449_v56, %v6518_v28  ;;  %v4313_v28 = vld [vmem:[%s7138_s14 + $0x20] sm:$0xff]  ;;  %s3993_s14 = sshll.u32 %s6852_s9, 4  ;;  %s6973_s14 = int_to_ptr.vmem [resolvable:$true] %s3993_s14 }
0x1230   : > { %v2466_v59 = vsel %vm956_vm0, %v2458_v57, 0.0  ;;  %v4823_v8 = vpack.c.bf16 %v4314_v27, %v4313_v28 }
0x1231   : > { %2467 = vadd.xlane.f32.xlu1 %v2466_v59  ;;  %v2463_v60 = vsel %vm956_vm0, %v2457_v58, 0.0 }
0x1232   : > { %2464 = vadd.xlane.f32.xlu0 %v2463_v60  ;;  %4824 = vmatprep.subr.bf16.mxu1 %v4823_v8 }
0x1233   : > { %4826 = vmatpush3.bf16.msra.mxu1 %v4823_v8 }
0x1234   : > { %4828 = vmatprep.subr.bf16.mxu1 %v4827_v11 }
0x1237   : > { %4830 = vmatpush3.bf16.msra.mxu1 %v4827_v11 }
0x12be   : > { %v2468_v61 = vpop.xlane.xlu1 %2467 }
0x12bf   : > { %v2470_v62 = vmul.f32 0.03125, %v2468_v61  ;;  %v2465_v63 = vpop.xlane.xlu0 %2464 }
0x12c0   : > { %v2469_v0 = vmul.f32 0.03125, %v2465_v63 }
0x12c1   : > { %v2472_v1 = vsub.f32 %v2458_v57, %v2470_v62 }
0x12c2   : > { %v2471_v2 = vsub.f32 %v2457_v58, %v2469_v0  ;;  %v4328_v0 = vld [vmem:[#allocation14 + $0x1] ss:$0 sm:$0xff] }
0x12c3   : > { %v2474_v6 = vmul.f32 %v2472_v1, %v2472_v1 }
0x12c4   : > { %v2473_v3 = vmul.f32 %v2471_v2, %v2471_v2 }
0x12c5   : > { %v2478_v29 = vsel %vm956_vm0, %v2474_v6, 0.0 }
0x12c6   : > { %v2475_v4 = vsel %vm956_vm0, %v2473_v3, 0.0 }
0x12c7   : > { %2476 = vadd.xlane.f32.xlu0 %v2475_v4 }
0x12cb   : > { %2479 = vadd.xlane.f32.xlu0 %v2478_v29 }
0x1354   : > { %v2477_v12 = vpop.xlane.xlu0 %2476 }
0x1355   : > { %v2481_v13 = vmul.f32 0.03125, %v2477_v12 }
0x1357   : > { %v2483_v14 = vadd.f32 1e-12, %v2481_v13 }
0x1358   : > { %v2480_v15 = vpop.xlane.xlu0 %2479 }
0x1359   : > { %5239 = vrsqrt.f32 %v2483_v14  ;;  %v2482_v16 = vmul.f32 0.03125, %v2480_v15 }
0x135b   : > { %v2484_v17 = vadd.f32 1e-12, %v2482_v16 }
0x135d   : > { %5241 = vrsqrt.f32 %v2484_v17 }
0x1363   : > { %v5240_v18 = vpop.eup %5239 }
0x1364   : > { %v2487_v21 = vmul.f32 %v5240_v18, %v2471_v2  ;;  %v2764_v18 = vld [vmem:[#allocation19 + $0x8] sm:$0xff] }
0x1366   : > { %v2495_v23 = vmul.f32 %v4311_v20, %v2487_v21 }
0x1367   : > { %v5242_v24 = vpop.eup %5241 }
0x1368   : > { %v2488_v25 = vmul.f32 %v5242_v24, %v2472_v1  ;;  %v2503_v26 = vadd.f32 %v4312_v22, %v2495_v23  ;;  %v2765_v23 = vld [vmem:[#allocation19 + $0x10] sm:$0xff] }
0x136a   : > { %v2496_v30 = vmul.f32 %v4311_v20, %v2488_v25  ;;  %4642 = vmatprep.mubr.msk.f32.mxu1 %vm956_vm0, %v2503_v26  ;;  %v2766_v20 = vld [vmem:[#allocation19 + $0x18] sm:$0xff]  ;;  %v2768_v25 = vld [vmem:[#allocation19 + $0x28] sm:$0xff] }
0x136b   : > { %v4847_v21 = vpack.c.bf16 %v2766_v20, %v2764_v18 }
0x136c   : > { %v2504_v31 = vadd.f32 %v4312_v22, %v2496_v30  ;;  %v2763_v22 = vld [vmem:[#allocation19] sm:$0xff] }
0x136d   : > { %v4849_v24 = vpack.c.bf16 %v2765_v23, %v2763_v22  ;;  %4848 = vmatprep.subr.bf16.mxu1 %v4847_v21 }
0x136e   : > { %4643 = vmatmul.mubr.msk.f32.vlgmr.msra.gmra.mrb[16].mxu1 %vm956_vm0, %v2504_v31 }
0x136f   : > { %4850 = vmatpush1.bf16.msra.mxu1 %v4849_v24  ;;  %2853 = vmatprep.mubr.f32.mxu1 %v5770_v35  ;;  %v2965_v24 = vld [vmem:[%s7145_s7 + $0x10] sm:$0xff] }
0x1441   : > { %v4644_v45 = vpop.f32.mrb[16].mxu1 }
0x1442   : > { %v2596_v46 = vadd.f32 %v4644_v45, %v4317_v44  ;;  %v2590_v47 = vpop.f32.mrb[17].mxu1 }
0x1443   : > { %v2591_v48 = vadd.f32 %v4317_v44, %v2590_v47 }
0x1444   : > { %v2602_v49 = vmul.f32 0.044715, %v2596_v46  ;;  %v2600_v61 = vmul.f32 0.5, %v2596_v46 }
0x1445   : > { %v2601_v50 = vmul.f32 0.044715, %v2591_v48  ;;  %v2599_v59 = vmul.f32 0.5, %v2591_v48 }
0x1446   : > { %v2604_v51 = vmul.f32 %v2602_v49, %v2596_v46  ;;  %v2868_v49 = vld [vmem:[#allocation22 + $0x10] sm:$0xff] }
0x1447   : > { %v2603_v52 = vmul.f32 %v2601_v50, %v2591_v48 }
0x1448   : > { %v2606_v53 = vmul.f32 %v2604_v51, %v2596_v46  ;;  %v4332_v51 = vld [vmem:[#allocation17 + $0x1] ss:$0 sm:$0xff] }
0x1449   : > { %v2605_v54 = vmul.f32 %v2603_v52, %v2591_v48  ;;  %v2871_v52 = vld [vmem:[#allocation22 + $0x28] sm:$0xff] }
0x144a   : > { %v2608_v7 = vadd.f32 %v2606_v53, %v2596_v46  ;;  %v4331_v46 = vld [vmem:[#allocation16 + $0x1] ss:$0 sm:$0xff] }
0x144b   : > { %v2607_v5 = vadd.f32 %v2605_v54, %v2591_v48  ;;  %v2866_v48 = vld [vmem:[#allocation22] sm:$0xff]  ;;  %v2873_v53 = vld [vmem:[#allocation22 + $0x38] sm:$0xff] }
0x144c   : > { %v2610_v19 = vmul.f32 0.7978846, %v2608_v7  ;;  %v4857_v7 = vpack.c.bf16 %v2868_v49, %v2866_v48 }
0x144d   : > { %v2609_v55 = vmul.f32 0.7978846, %v2607_v5 }
0x144e   : > { %5243 = vtanh.f32 %v2610_v19  ;;  %v4859_v19 = vpack.c.bf16 %v2873_v53, %v2871_v52 }
0x144f   : > { %5245 = vtanh.f32 %v2609_v55 }
0x1458   : > { %v5244_v56 = vpop.eup %5243 }
0x1459   : > { %v5246_v57 = vpop.eup %5245  ;;  %v2614_v58 = vadd.f32 1.0, %v5244_v56  ;;  %v2870_v56 = vld [vmem:[#allocation22 + $0x20] sm:$0xff] }
0x145a   : > { %v2613_v60 = vadd.f32 1.0, %v5246_v57  ;;  %v2872_v57 = vld [vmem:[#allocation22 + $0x30] sm:$0xff] }
0x145b   : > { %v2616_v63 = vmul.f32 %v2614_v58, %v2600_v61  ;;  %v4861_v58 = vpack.c.bf16 %v2872_v57, %v2870_v56 }
0x145c   : > { %v2615_v62 = vmul.f32 %v2613_v60, %v2599_v59  ;;  %v2773_v60 = vlaneseq }
0x145e   : > { %4661 = vmatprep.mubr.msk.f32.mxu0 %vm1725_vm3, %v2615_v62  ;;  %v6645_v61 = vshrl.u32 %v2773_v60, 7 }
0x145f   : > { %4662 = vmatmul.mubr.msk.f32.vlgmr.msra.gmra.mrb[12].mxu0 %vm1725_vm3, %v2616_v63  ;;  %v2771_v63 = vld [vmem:[#allocation20] sm:$0x3] }
0x1460   : > { %v6648_v62 = vsub.s32 0, %v6645_v61 }
0x1532   : > { %v4663_v1 = vpop.f32.mrb[12].mxu0 }
0x1533   : > { %v2712_v2 = vadd.f32 %v4663_v1, %v4328_v0  ;;  %v2706_v3 = vpop.f32.mrb[13].mxu0  ;;  %v2779_v1 = vsub.s32 1, %v6645_v61 }
0x1534   : > { %v2707_v4 = vadd.f32 %v4328_v0, %v2706_v3  ;;  %v2874_v3 = vld [vmem:[%s7144_s23] sm:$0x3]  ;;  %s5771_s23 = smov 80  }
0x1535   : > { %v2716_v6 = vadd.f32 %v2712_v2, %v2504_v31  ;;  %v2767_v31 = vld [vmem:[#allocation19 + $0x20] sm:$0xff] }
0x1536   : > { %v2715_v29 = vadd.f32 %v2707_v4, %v2503_v26  ;;  %v2770_v26 = vld [vmem:[#allocation19 + $0x38] sm:$0xff]  ;;  %v4853_v34 = vpack.c.bf16 %v2769_v32, %v2767_v31  ;;  %v2776_v4 = vrot.slane %v2771_v63, %v6648_v62  ;;  %v2966_v32 = vld [vmem:[%s7145_s7 + $0x18] sm:$0xff] }
0x1537   : > { %v2724_v28 = vsel %vm956_vm0, %v2716_v6, 0.0  ;;  %v4851_v30 = vpack.c.bf16 %v2770_v26, %v2768_v25  ;;  %v2973_v31 = vld [vmem:[#allocation23 + $0x10] sm:$0xff] }
0x1538   : > { %2725 = vadd.xlane.f32.xlu0 %v2724_v28  ;;  %v2721_v27 = vsel %vm956_vm0, %v2715_v29, 0.0 }
0x1539   : > { %2722 = vadd.xlane.f32.xlu1 %v2721_v27  ;;  %4852 = vmatprep.subr.bf16.mxu1 %v4851_v30  ;;  %v2879_v27 = vrot.slane %v2874_v3, %v6648_v62 }
0x153a   : > { %4854 = vmatpush1.bf16.msra.mxu1 %v4853_v34 }
0x153b   : > { %4856 = vmatprep.subr.bf16.mxu1 %v4855_v37  ;;  %v2974_v37 = vld [vmem:[#allocation23 + $0x18] sm:$0xff] }
0x15c5   : > { %v2726_v8 = vpop.xlane.xlu0 %2725 }
0x15c6   : > { %v2728_v9 = vmul.f32 0.03125, %v2726_v8  ;;  %v2723_v10 = vpop.xlane.xlu1 %2722  ;;  %v2883_v8 = vrot.slane %v2874_v3, %v2779_v1 }
0x15c7   : > { %v2727_v11 = vmul.f32 0.03125, %v2723_v10  ;;  %v2963_v10 = vld [vmem:[%s7145_s7] sm:$0xff] }
0x15c8   : > { %v2730_v12 = vsub.f32 %v2716_v6, %v2728_v9  ;;  %v2780_v6 = vrot.slane %v2771_v63, %v2779_v1 }
0x15c9   : > { %v2729_v13 = vsub.f32 %v2715_v29, %v2727_v11 }
0x15ca   : > { %v2732_v14 = vmul.f32 %v2730_v12, %v2730_v12 }
0x15cb   : > { %v2731_v15 = vmul.f32 %v2729_v13, %v2729_v13 }
0x15cc   : > { %v2736_v16 = vsel %vm956_vm0, %v2732_v14, 0.0  ;;  %v2964_v14 = vld [vmem:[%s7145_s7 + $0x8] sm:$0xff] }
0x15cd   : > { %2737 = vadd.xlane.f32.xlu0 %v2736_v16  ;;  %v2733_v17 = vsel %vm956_vm0, %v2731_v15, 0.0 }
0x15ce   : > { %2734 = vadd.xlane.f32.xlu1 %v2733_v17  ;;  %v2972_v17 = vld [vmem:[#allocation23 + $0x8] sm:$0xff] }
0x165a   : > { %v2738_v38 = vpop.xlane.xlu0 %2737 }
0x165b   : > { %v2740_v39 = vmul.f32 0.03125, %v2738_v38  ;;  %v2735_v40 = vpop.xlane.xlu1 %2734 }
0x165c   : > { %v2739_v41 = vmul.f32 0.03125, %v2735_v40 }
0x165d   : > { %v2742_v42 = vadd.f32 1e-12, %v2740_v39 }
0x165e   : > { %v2741_v43 = vadd.f32 1e-12, %v2739_v41 }
0x165f   : > { %5247 = vrsqrt.f32 %v2742_v42 }
0x1660   : > { %5249 = vrsqrt.f32 %v2741_v43 }
0x1669   : > { %v5248_v44 = vpop.eup %5247 }
0x166a   : > { %v5250_v45 = vpop.eup %5249  ;;  %v2746_v50 = vmul.f32 %v5248_v44, %v2730_v12 }
0x166b   : > { %v2745_v47 = vmul.f32 %v5250_v45, %v2729_v13  ;;  %v2971_v13 = vld [vmem:[#allocation23] sm:$0xff] }
0x166c   : > { %v2754_v55 = vmul.f32 %v4331_v46, %v2746_v50 }
0x166d   : > { %v2753_v54 = vmul.f32 %v4331_v46, %v2745_v47  ;;  %v5775_v47 = vmov 0  }
0x166e   : > { %v2762_v59 = vadd.f32 %v4332_v51, %v2754_v55  ;;  %5193 = vset.pattern.permute.xlu1 %v5775_v47  ;;  %5194 = vset.pattern.permute.xlu0 %v5775_v47 }
0x166f   : > { %v2761_v5 = vadd.f32 %v4332_v51, %v2753_v54 }
0x1671   : > { %4333 = vmatmul.mubr.msk.f32.vlgmr.msra.gmra.mrb[18].mxu1 %vm956_vm0, %v2761_v5 }
0x1672   : > { %4858 = vmatpush1.bf16.msra.mxu1 %v4857_v7  ;;  %2859 = vmatprep.mubr.f32.mxu1 %v5770_v35 }
0x1673   : > { %4860 = vmatprep.subr.bf16.mxu1 %v4859_v19 }
0x1675   : > { %4334 = vmatmul.mubr.msk.f32.gmra.mrb[20].mxu1 %vm956_vm0, %v2762_v59 }
0x1676   : > { %4862 = vmatpush1.bf16.msra.mxu1 %v4861_v58  ;;  %2950 = vmatprep.mubr.f32.mxu1 %v5770_v35 }
0x1679   : > { %4335 = vmatmul.mubr.msk.f32.vlgmr.msra.gmra.mrb[22].mxu1 %vm956_vm0, %v2761_v5 }
0x167a   : > { %2956 = vmatprep.mubr.f32.mxu1 %v5770_v35 }
0x167d   : > { %4336 = vmatmul.mubr.msk.f32.gmra.mrb[24].mxu1 %vm956_vm0, %v2762_v59 }
0x1744   : > { %v2855_v0 = vpop.f32.mrb[18].mxu1 }
0x1745   : > { %v2857_v2 = vpop.f32.mrb[19].mxu1  ;;  %v2856_v9 = vadd.f32 %v2855_v0, %v2776_v4 }
0x1746   : > { %v2858_v11 = vadd.f32 %v2857_v2, %v2780_v6 }
0x1747   : > { %v2967_v20 = vmul.f32 %v2963_v10, %v2856_v9 }
0x1748   : > { %v2861_v29 = vpop.f32.mrb[20].mxu1  ;;  %v2968_v23 = vmul.f32 %v2964_v14, %v2858_v11 }
0x1749   : > { %v2863_v28 = vpop.f32.mrb[21].mxu1  ;;  %v2862_v21 = vadd.f32 %v2861_v29, %v2776_v4 }
0x174a   : > { %v2864_v25 = vadd.f32 %v2863_v28, %v2780_v6 }
0x174b   : > { %v2969_v40 = vmul.f32 %v2965_v24, %v2862_v21 }
0x174c   : > { %v2952_v12 = vpop.f32.mrb[22].mxu1  ;;  %v2970_v42 = vmul.f32 %v2966_v32, %v2864_v25 }
0x174d   : > { %v2953_v15 = vadd.f32 %v2952_v12, %v2879_v27  ;;  %v2954_v16 = vpop.f32.mrb[23].mxu1 }
0x174e   : > { %v2955_v18 = vadd.f32 %v2954_v16, %v2883_v8 }
0x174f   : > { %v2975_v22 = vmul.f32 %v2971_v13, %v2953_v15 }
0x1750   : > { %v2976_v26 = vmul.f32 %v2972_v17, %v2955_v18  ;;  %v2958_v30 = vpop.f32.mrb[24].mxu1 }
0x1751   : > { %v2979_v33 = vadd.f32 %v2975_v22, %v2967_v20  ;;  %v2959_v34 = vadd.f32 %v2958_v30, %v2879_v27  ;;  %v2960_v36 = vpop.f32.mrb[25].mxu1 }
0x1752   : > { %v6668_v38 = vadd.f32 %v2976_v26, %v2968_v23  ;;  %v2961_v39 = vadd.f32 %v2960_v36, %v2883_v8 }
0x1753   : > { %v2977_v41 = vmul.f32 %v2973_v31, %v2959_v34  ;;  %2985 = vrot.lane.b32.xlu1 %v2979_v33, %s7140_s11  ;;  %4668 = vmatprep.mubr.msk.f32.mxu0 %vm3017_vm4, %v2979_v33 }
0x1754   : > { %v2978_v43 = vmul.f32 %v2974_v37, %v2961_v39 }
0x1755   : > { %v6672_v44 = vadd.f32 %v2977_v41, %v2969_v40 }
0x1756   : > { %v6674_v45 = vadd.f32 %v2978_v43, %v2970_v42 }
0x1757   : > { %2987 = vrot.lane.b32.xlu0 %v6672_v44, %s7140_s11  ;;  %2989 = vrot.lane.b32.xlu1 %v2979_v33, %s7141_s12  ;;  %v5148_v46 = vpack.i.bf16 %v6672_v44, %v2979_v33  ;;  %s5774_s11 = smov 120  }
0x1758   : > { %v5188_v8 = vpack.i.bf16 %v6674_v45, %v6668_v38 }
0x175b   : > { %2993 = vrot.lane.b32.xlu0 %v2979_v33, %s5771_s23  ;;  %2991 = vrot.lane.b32.xlu1 %v6672_v44, %s7141_s12  ;;  %s4379_s12 = sshll.u32 %s6410_s4, 4  ;;  %s7149_s4 = scalar_lea.vmem [#allocation5], %s6314_s0 }
0x175c   : > { %s941_s25 = scalar_lea.vmem %s7146_s24, %s4379_s12  ;;  %s5647_s12 = scalar_lea.vmem %s6973_s14, 2304 }
0x175d   : > { %v3799_v6 = vld [vmem:[%s941_s25] sm:$0xff]  ;;  %v3800_v12 = vld [vmem:[%s941_s25 + $0x8] sm:$0xff]  ;;  %p5648_p8 = scmp.ne.s32.totalorder %s6973_s14, %s5647_s12 }
0x175e   : > { %v3830_v11 = vsub.f32 1.0, %v3799_v6  ;;  %v3831_v14 = vsub.f32 1.0, %v3800_v12 }
0x175f   : > { %2997 = vrot.lane.b32.xlu0 %v2979_v33, %s7142_s3  ;;  %2995 = vrot.lane.b32.xlu1 %v6672_v44, %s5771_s23  ;;  %p5649_p12 = pnand %p5648_p8, %p7151_p4 }
0x1760   : > { %v3832_v13 = vmul.f32 -1e+12, %v3830_v11  ;;  %v3833_v15 = vmul.f32 -1e+12, %v3831_v14 }
0x1761   : > { %p5650_p1 = pneg %p5649_p12 }
0x1763   : > { %3001 = vrot.lane.b32.xlu0 %v2979_v33, %s5772_s8  ;;  %2999 = vrot.lane.b32.xlu1 %v6672_v44, %s7142_s3  ;;  %s5776_s3 = smov [#allocation25]  }
0x1767   : > { %3005 = vrot.lane.b32.xlu0 %v2979_v33, %s5773_s5  ;;  %3003 = vrot.lane.b32.xlu1 %v6672_v44, %s5772_s8 }
0x176b   : > { %3009 = vrot.lane.b32.xlu0 %v2979_v33, %s7143_s26  ;;  %3007 = vrot.lane.b32.xlu1 %v6672_v44, %s5773_s5  ;;  %s7150_s5 = sld [smem:[#allocation56_spill]] }
0x176f   : > { %5149 = vrot.lane.b32.xlu0 %v5148_v46, %s5774_s11  ;;  %3011 = vrot.lane.b32.xlu1 %v6672_v44, %s7143_s26  ;;  %s5651_s26 = sshll.u32 %s5776_s3, 4  ;;  %s5652_s26 = int_to_ptr.vmem [resolvable:$false] %s5651_s26 }
0x1770   : > { %s5653_s24 = scalar_lea.vmem %s5652_s26, 4608  ;;  %p5654_p13 = scmp.lt.s32.totalorder %s6973_s14, %s5652_s26 }
0x1771   : > { %p5655_p0 = scmp.lt.s32.totalorder %s5653_s24, %s5647_s12 }
0x1773   : > { %p5656_p2 = por %p5655_p0, %p5654_p13 }
0x1775   : > { %p5657_p6 = pnand %p5656_p2, %p5650_p1 }
0x17c5   : > { %v2986_v48 = vpop.permute.xlu1 %2985 }
0x17c6   : > { %4675 = vmatprep.mubr.msk.f32.mxu1 %vm3017_vm4, %v2986_v48 }
0x17c9   : > { %v6693_v49 = vpop.permute.xlu0 %2987  ;;  %v2990_v50 = vpop.permute.xlu1 %2989 }
0x17ca   : > { %v5153_v51 = vpack.i.bf16 %v6693_v49, %v2986_v48 }
0x17cc   : > { %5154 = vrot.lane.b32.xlu1 %v5153_v51, %s5774_s11 }
0x17cd   : > { %v6697_v52 = vpop.permute.xlu0 %2993  ;;  %v6699_v53 = vpop.permute.xlu1 %2991 }
0x17ce   : > { %v5158_v54 = vpack.i.bf16 %v6699_v53, %v2990_v50 }
0x17d0   : > { %5159 = vrot.lane.b32.xlu0 %v5158_v54, %s5774_s11 }
0x17d1   : > { %v6703_v7 = vpop.permute.xlu0 %2997  ;;  %v6705_v5 = vpop.permute.xlu1 %2995 }
0x17d2   : > { %v5163_v19 = vpack.i.bf16 %v6705_v5, %v6697_v52 }
0x17d4   : > { %5164 = vrot.lane.b32.xlu1 %v5163_v19, %s5774_s11 }
0x17d5   : > { %v6710_v55 = vpop.permute.xlu0 %3001  ;;  %v6712_v56 = vpop.permute.xlu1 %2999 }
0x17d6   : > { %v5168_v57 = vpack.i.bf16 %v6712_v56, %v6703_v7 }
0x17d8   : > { %5169 = vrot.lane.b32.xlu0 %v5168_v57, %s5774_s11  ;;  %v3916_v57 = vand.u32 127, %v2773_v60 }
0x17d9   : > { %v6717_v58 = vpop.permute.xlu0 %3005  ;;  %v6719_v59 = vpop.permute.xlu1 %3003 }
0x17da   : > { %v5173_v63 = vpack.i.bf16 %v6719_v59, %v6710_v55  ;;  %vm3917_vm7 = vcmp.gt.s32.totalorder %v6645_v61, %v3916_v57 }
0x17dc   : > { %5174 = vrot.lane.b32.xlu1 %v5173_v63, %s5774_s11 }
0x17dd   : > { %v6725_v0 = vpop.permute.xlu0 %3009  ;;  %v6727_v1 = vpop.permute.xlu1 %3007 }
0x17de   : > { %v5178_v2 = vpack.i.bf16 %v6727_v1, %v6717_v58 }
0x17e0   : > { %5179 = vrot.lane.b32.xlu0 %v5178_v2, %s5774_s11 }
0x17e1   : > { %v5150_v3 = vpop.permute.xlu0 %5149  ;;  %v6735_v4 = vpop.permute.xlu1 %3011 }
0x17e2   : > { %v5152_v29 = vunpack.i.h.bf16 %v5150_v3  ;;  %v5151_v28 = vunpack.i.l.bf16 %v5150_v3  ;;  %v5183_v27 = vpack.i.bf16 %v6735_v4, %v6725_v0 }
0x17e4   : > { %v4863_v10 = vpack.c.bf16 %v5152_v29, %v5151_v28  ;;  %5189 = vrot.lane.b32.xlu0 %v5188_v8, %s5774_s11  ;;  %5184 = vrot.lane.b32.xlu1 %v5183_v27, %s5774_s11  ;;  %s6971_s11 = scalar_lea.hbm %s7150_s5, %s4918_s10 }
0x17e6   : > { %4865 = vmatprep.subr.msk.bf16.mxu0 %vm6743_vm5, %v4863_v10 }
0x17e7   : > { %4868 = vmatpush3.bf16.xpose.msk.msra.mxu0 %vm6743_vm5, %v4863_v10 }
0x17e8   : > { %3804 = vperm.xlu1 %5193, %v3799_v6   ;;  %3809 = vperm.xlu0 %5194, %v3800_v12  }
0x17ec   : > { %3836 = vperm.xlu1 %5193, %v3832_v13  }
0x17ee   : > { %4669 = vmatmul.mubr.msk.f32.vlgmr.msra.gmra.mrb[14].mxu0 %vm3017_vm4, %v6672_v44 }
0x17ef   : > { %4682 = vmatprep.mubr.msk.f32.mxu0 %vm3017_vm4, %v2990_v50 }
0x17f0   : > { %3841 = vperm.xlu1 %5193, %v3833_v15  }
0x183e   : > { %v5155_v16 = vpop.permute.xlu1 %5154 }
0x183f   : > { %v5157_v17 = vunpack.i.h.bf16 %v5155_v16  ;;  %v5156_v18 = vunpack.i.l.bf16 %v5155_v16 }
0x1841   : > { %v4869_v20 = vpack.c.bf16 %v5157_v17, %v5156_v18 }
0x1842   : > { %v5160_v21 = vpop.permute.xlu0 %5159 }
0x1843   : > { %v5162_v22 = vunpack.i.h.bf16 %v5160_v21  ;;  %v5161_v23 = vunpack.i.l.bf16 %v5160_v21  ;;  %4871 = vmatprep.subr.msk.bf16.mxu1 %vm6743_vm5, %v4869_v20 }
0x1844   : > { %4874 = vmatpush3.bf16.xpose.msk.msra.mxu1 %vm6743_vm5, %v4869_v20 }
0x1845   : > { %v4875_v24 = vpack.c.bf16 %v5162_v22, %v5161_v23 }
0x1846   : > { %v5165_v25 = vpop.permute.xlu1 %5164 }
0x1847   : > { %v5167_v26 = vunpack.i.h.bf16 %v5165_v25  ;;  %v5166_v30 = vunpack.i.l.bf16 %v5165_v25  ;;  %4877 = vmatprep.subr.msk.bf16.mxu0 %vm6743_vm5, %v4875_v24 }
0x1848   : > { %4880 = vmatpush3.bf16.xpose.msk.msra.mxu0 %vm6743_vm5, %v4875_v24 }
0x1849   : > { %v4881_v31 = vpack.c.bf16 %v5167_v26, %v5166_v30 }
0x184a   : > { %v5170_v32 = vpop.permute.xlu0 %5169 }
0x184b   : > { %v5172_v33 = vunpack.i.h.bf16 %v5170_v32  ;;  %v5171_v34 = vunpack.i.l.bf16 %v5170_v32  ;;  %4676 = vmatmul.mubr.msk.f32.vlgmr.msra.gmra.mrb[26].mxu1 %vm3017_vm4, %v6693_v49  ;;  %4883 = vmatprep.subr.msk.bf16.mxu1 %vm6743_vm5, %v4881_v31 }
0x184c   : > { %4886 = vmatpush3.bf16.xpose.msk.msra.mxu1 %vm6743_vm5, %v4881_v31  ;;  %4689 = vmatprep.mubr.msk.f32.mxu1 %vm3017_vm4, %v6697_v52 }
0x184d   : > { %v4887_v36 = vpack.c.bf16 %v5172_v33, %v5171_v34 }
0x184e   : > { %v5175_v37 = vpop.permute.xlu1 %5174 }
0x184f   : > { %v5177_v39 = vunpack.i.h.bf16 %v5175_v37  ;;  %v5176_v40 = vunpack.i.l.bf16 %v5175_v37  ;;  %4683 = vmatmul.mubr.msk.f32.vlgmr.msra.gmra.mrb[16].mxu0 %vm3017_vm4, %v6699_v53  ;;  %4889 = vmatprep.subr.msk.bf16.mxu0 %vm6743_vm5, %v4887_v36 }
0x1850   : > { %4892 = vmatpush3.bf16.xpose.msk.msra.mxu0 %vm6743_vm5, %v4887_v36  ;;  %4696 = vmatprep.mubr.msk.f32.mxu0 %vm3017_vm4, %v6703_v7 }
0x1851   : > { %v4893_v41 = vpack.c.bf16 %v5177_v39, %v5176_v40 }
0x1852   : > { %v5180_v42 = vpop.permute.xlu0 %5179 }
0x1853   : > { %v5182_v43 = vunpack.i.h.bf16 %v5180_v42  ;;  %v5181_v44 = vunpack.i.l.bf16 %v5180_v42  ;;  %4690 = vmatmul.mubr.msk.f32.vlgmr.msra.gmra.mrb[28].mxu1 %vm3017_vm4, %v6705_v5  ;;  %4895 = vmatprep.subr.msk.bf16.mxu1 %vm6743_vm5, %v4893_v41  ;;  %v3801_v5 = vld [vmem:[%s7149_s4] sm:$0x1] }
0x1854   : > { %4898 = vmatpush3.bf16.xpose.msk.msra.mxu1 %vm6743_vm5, %v4893_v41  ;;  %4703 = vmatprep.mubr.msk.f32.mxu1 %vm3017_vm4, %v6710_v55  ;;  %v3886_v55 = vsub.f32 1.0, %v3801_v5  ;;  %v6830_v63 = vrot.slane %v3801_v5, %v6648_v62 }
0x1855   : > { %v4899_v46 = vpack.c.bf16 %v5182_v43, %v5181_v44 }
0x1856   : > { %v5190_v47 = vpop.permute.xlu0 %5189  ;;  %v5185_v48 = vpop.permute.xlu1 %5184 }
0x1857   : > { %v5192_v49 = vunpack.i.h.bf16 %v5190_v47  ;;  %v5191_v50 = vunpack.i.l.bf16 %v5190_v47  ;;  %v5187_v51 = vunpack.i.h.bf16 %v5185_v48  ;;  %v5186_v52 = vunpack.i.l.bf16 %v5185_v48  ;;  %4697 = vmatmul.mubr.msk.f32.vlgmr.msra.gmra.mrb[18].mxu0 %vm3017_vm4, %v6712_v56  ;;  %4901 = vmatprep.subr.msk.bf16.mxu0 %vm6743_vm5, %v4899_v46 }
0x1858   : > { %4904 = vmatpush3.bf16.xpose.msk.msra.mxu0 %vm6743_vm5, %v4899_v46  ;;  %4710 = vmatprep.mubr.msk.f32.mxu0 %vm3017_vm4, %v6717_v58  ;;  %v3914_v56 = vadd.s32 8, %v6645_v61 }
0x1859   : > { %v4911_v53 = vpack.c.bf16 %v5192_v49, %v5191_v50  ;;  %v4905_v54 = vpack.c.bf16 %v5187_v51, %v5186_v52 }
0x185a   : > { %vm3918_vm6 = vcmp.gt.s32.totalorder %v3914_v56, %v3916_v57 }
0x185b   : > { %4704 = vmatmul.mubr.msk.f32.vlgmr.msra.gmra.mrb[30].mxu1 %vm3017_vm4, %v6719_v59  ;;  %4907 = vmatprep.subr.msk.bf16.mxu1 %vm6743_vm5, %v4905_v54  ;;  %v4374_v2 = vsel %vm3918_vm6, 1.0, %v5770_v35 }
0x185c   : > { %4913 = vmatprep.subr.msk.bf16.mxu0 %vm6743_vm5, %v4911_v53  ;;  %4910 = vmatpush3.bf16.xpose.msk.msra.mxu1 %vm6743_vm5, %v4905_v54  ;;  %v6841_v29 = vmul.f32 1e+12, %v4374_v2 }
0x185d   : > { %4717 = vmatprep.mubr.msk.f32.mxu1 %vm3017_vm4, %v6725_v0 }
0x185f   : > { %4711 = vmatmul.mubr.msk.f32.vlgmr.msra.gmra.mrb[20].mxu0 %vm3017_vm4, %v6727_v1 }
0x1860   : > { %4916 = vmatpush3.bf16.xpose.msk.msra.mxu0 %vm6743_vm5, %v4911_v53  ;;  %4724 = vmatprep.mubr.msk.f32.mxu0 %vm3017_vm4, %v6668_v38  ;;  %v3887_v38 = vmul.f32 -1e+12, %v3886_v55 }
0x1862   : > { %v6836_v3 = vrot.slane %v3887_v38, %v6648_v62 }
0x1863   : > { %4718 = vmatmul.mubr.msk.f32.vlgmr.msra.gmra.mrb[32].mxu1 %vm3017_vm4, %v6735_v4  ;;  %v4373_v4 = vsel %vm3917_vm7, 1.0, %v5770_v35 }
0x1864   : > { %v6844_v27 = vmul.f32 1e+12, %v4373_v4 }
0x1867   : > { %4725 = vmatmul.mubr.msk.f32.vlgmr.msra.gmra.mrb[22].mxu0 %vm3017_vm4, %v6674_v45  ;;  %v6816_v7 = vpop.permute.xlu1 %3804  ;;  %v6824_v58 = vpop.permute.xlu0 %3809 }
0x186b   : > { %v6820_v19 = vpop.permute.xlu1 %3836 }
0x186f   : > { %v6827_v45 = vpop.permute.xlu1 %3841 }
0x18c1   : > { %v4670_v59 = vpop.f32.mrb[14].mxu0 }
0x18c2   : > { %v3813_v0 = vmul.f32 %v4670_v59, %v6824_v58  ;;  %v3092_v1 = vpop.f32.mrb[15].mxu0 }
0x18c3   : > { %v3812_v60 = vmul.f32 %v6816_v7, %v3092_v1 }
0x18c4   : > { %v3845_v61 = vadd.f32 %v6827_v45, %v3813_v0 }
0x18c5   : > { %v3844_v6 = vadd.f32 %v6820_v19, %v3812_v60 }
0x18c6   : > { %v3869_v28 = vmul.f32 %v6830_v63, %v3845_v61 }
0x18c7   : > { %v3868_v8 = vmul.f32 %v6830_v63, %v3844_v6 }
0x18c8   : > { %v3895_v9 = vadd.f32 %v6836_v3, %v3869_v28 }
0x18c9   : > { %v3894_v62 = vadd.f32 %v6836_v3, %v3868_v8 }
0x18ca   : > { %v3926_v10 = vsub.f32 %v3895_v9, %v6841_v29 }
0x18cb   : > { %v3925_v35 = vsub.f32 %v3894_v62, %v6844_v27 }
0x18cc   : > { %v3944_v11 = vmul.f32 0.35355338, %v3926_v10 }
0x18cd   : > { %v3943_v12 = vmul.f32 0.35355338, %v3925_v35 }
0x18ce   : > { %3962 = vst.msk [vmem:[%s6852_s9 + $0x8] sm:$0xff] %vm1048_vm1, %v3944_v11 }
0x18cf   : > { %3961 = vst.msk [vmem:[%s6852_s9] sm:$0xff] %vm1048_vm1, %v3943_v12 }
0x191e   : > { %v4677_v13 = vpop.f32.mrb[26].mxu1 }
0x191f   : > { %v3815_v14 = vmul.f32 %v4677_v13, %v6824_v58  ;;  %v3179_v15 = vpop.f32.mrb[27].mxu1 }
0x1920   : > { %v3814_v16 = vmul.f32 %v6816_v7, %v3179_v15 }
0x1921   : > { %v3847_v17 = vadd.f32 %v6827_v45, %v3815_v14 }
0x1922   : > { %v3846_v18 = vadd.f32 %v6820_v19, %v3814_v16  ;;  %v4684_v20 = vpop.f32.mrb[16].mxu0 }
0x1923   : > { %v3871_v21 = vmul.f32 %v6830_v63, %v3847_v17  ;;  %v3817_v22 = vmul.f32 %v4684_v20, %v6824_v58  ;;  %v3266_v23 = vpop.f32.mrb[17].mxu0 }
0x1924   : > { %v3870_v24 = vmul.f32 %v6830_v63, %v3846_v18  ;;  %v3816_v25 = vmul.f32 %v6816_v7, %v3266_v23 }
0x1925   : > { %v3897_v26 = vadd.f32 %v6836_v3, %v3871_v21  ;;  %v3849_v30 = vadd.f32 %v6827_v45, %v3817_v22 }
0x1926   : > { %v3896_v31 = vadd.f32 %v6836_v3, %v3870_v24  ;;  %v3848_v32 = vadd.f32 %v6820_v19, %v3816_v25  ;;  %v4691_v33 = vpop.f32.mrb[28].mxu1 }
0x1927   : > { %v3928_v34 = vsub.f32 %v3897_v26, %v6841_v29  ;;  %v3873_v36 = vmul.f32 %v6830_v63, %v3849_v30  ;;  %v3819_v37 = vmul.f32 %v4691_v33, %v6824_v58  ;;  %v3353_v39 = vpop.f32.mrb[29].mxu1 }
0x1928   : > { %v3927_v40 = vsub.f32 %v3896_v31, %v6844_v27  ;;  %v3872_v41 = vmul.f32 %v6830_v63, %v3848_v32  ;;  %v3818_v42 = vmul.f32 %v6816_v7, %v3353_v39 }
0x1929   : > { %v3946_v43 = vmul.f32 0.35355338, %v3928_v34  ;;  %v3899_v44 = vadd.f32 %v6836_v3, %v3873_v36  ;;  %v3851_v46 = vadd.f32 %v6827_v45, %v3819_v37 }
0x192a   : > { %v3945_v47 = vmul.f32 0.35355338, %v3927_v40  ;;  %v3898_v48 = vadd.f32 %v6836_v3, %v3872_v41  ;;  %v3850_v49 = vadd.f32 %v6820_v19, %v3818_v42  ;;  %v4698_v50 = vpop.f32.mrb[18].mxu0 }
0x192b   : > { %3964 = vst.msk [vmem:[%s6852_s9 + $0x18] sm:$0xff] %vm1048_vm1, %v3946_v43  ;;  %v3930_v51 = vsub.f32 %v3899_v44, %v6841_v29  ;;  %v3875_v52 = vmul.f32 %v6830_v63, %v3851_v46  ;;  %v3821_v53 = vmul.f32 %v4698_v50, %v6824_v58  ;;  %v3440_v54 = vpop.f32.mrb[19].mxu0 }
0x192c   : > { %3963 = vst.msk [vmem:[%s6852_s9 + $0x10] sm:$0xff] %vm1048_vm1, %v3945_v47  ;;  %v3929_v5 = vsub.f32 %v3898_v48, %v6844_v27  ;;  %v3874_v55 = vmul.f32 %v6830_v63, %v3850_v49  ;;  %v3820_v56 = vmul.f32 %v6816_v7, %v3440_v54 }
0x192d   : > { %v3948_v57 = vmul.f32 0.35355338, %v3930_v51  ;;  %v3901_v38 = vadd.f32 %v6836_v3, %v3875_v52  ;;  %v3853_v59 = vadd.f32 %v6827_v45, %v3821_v53 }
0x192e   : > { %v3947_v0 = vmul.f32 0.35355338, %v3929_v5  ;;  %v3900_v1 = vadd.f32 %v6836_v3, %v3874_v55  ;;  %v3852_v2 = vadd.f32 %v6820_v19, %v3820_v56  ;;  %v4705_v60 = vpop.f32.mrb[30].mxu1 }
0x192f   : > { %3966 = vst.msk [vmem:[%s6852_s9 + $0x28] sm:$0xff] %vm1048_vm1, %v3948_v57  ;;  %v3932_v4 = vsub.f32 %v3901_v38, %v6841_v29  ;;  %v3877_v61 = vmul.f32 %v6830_v63, %v3853_v59  ;;  %v3823_v6 = vmul.f32 %v4705_v60, %v6824_v58  ;;  %v3527_v28 = vpop.f32.mrb[31].mxu1 }
0x1930   : > { %3965 = vst.msk [vmem:[%s6852_s9 + $0x20] sm:$0xff] %vm1048_vm1, %v3947_v0  ;;  %v3931_v8 = vsub.f32 %v3900_v1, %v6844_v27  ;;  %v3876_v9 = vmul.f32 %v6830_v63, %v3852_v2  ;;  %v3822_v62 = vmul.f32 %v6816_v7, %v3527_v28 }
0x1931   : > { %v3950_v10 = vmul.f32 0.35355338, %v3932_v4  ;;  %v3903_v35 = vadd.f32 %v6836_v3, %v3877_v61  ;;  %v3855_v11 = vadd.f32 %v6827_v45, %v3823_v6 }
0x1932   : > { %v3949_v12 = vmul.f32 0.35355338, %v3931_v8  ;;  %v3902_v13 = vadd.f32 %v6836_v3, %v3876_v9  ;;  %v3854_v14 = vadd.f32 %v6820_v19, %v3822_v62  ;;  %v4712_v15 = vpop.f32.mrb[20].mxu0 }
0x1933   : > { %3968 = vst.msk [vmem:[%s6852_s9 + $0x38] sm:$0xff] %vm1048_vm1, %v3950_v10  ;;  %v3934_v16 = vsub.f32 %v3903_v35, %v6841_v29  ;;  %v3879_v17 = vmul.f32 %v6830_v63, %v3855_v11  ;;  %v3825_v18 = vmul.f32 %v4712_v15, %v6824_v58  ;;  %v3614_v20 = vpop.f32.mrb[21].mxu0 }
0x1934   : > { %3967 = vst.msk [vmem:[%s6852_s9 + $0x30] sm:$0xff] %vm1048_vm1, %v3949_v12  ;;  %v3933_v21 = vsub.f32 %v3902_v13, %v6844_v27  ;;  %v3878_v22 = vmul.f32 %v6830_v63, %v3854_v14  ;;  %v3824_v23 = vmul.f32 %v6816_v7, %v3614_v20 }
0x1935   : > { %v3952_v24 = vmul.f32 0.35355338, %v3934_v16  ;;  %v3905_v25 = vadd.f32 %v6836_v3, %v3879_v17  ;;  %v3857_v26 = vadd.f32 %v6827_v45, %v3825_v18 }
0x1936   : > { %v3951_v30 = vmul.f32 0.35355338, %v3933_v21  ;;  %v3904_v31 = vadd.f32 %v6836_v3, %v3878_v22  ;;  %v3856_v32 = vadd.f32 %v6820_v19, %v3824_v23  ;;  %v4719_v33 = vpop.f32.mrb[32].mxu1 }
0x1937   : > { %3970 = vst.msk [vmem:[%s6852_s9 + $0x48] sm:$0xff] %vm1048_vm1, %v3952_v24  ;;  %v3936_v34 = vsub.f32 %v3905_v25, %v6841_v29  ;;  %v3881_v36 = vmul.f32 %v6830_v63, %v3857_v26  ;;  %v3827_v37 = vmul.f32 %v4719_v33, %v6824_v58  ;;  %v3701_v39 = vpop.f32.mrb[33].mxu1 }
0x1938   : > { %3969 = vst.msk [vmem:[%s6852_s9 + $0x40] sm:$0xff] %vm1048_vm1, %v3951_v30  ;;  %v3935_v40 = vsub.f32 %v3904_v31, %v6844_v27  ;;  %v3880_v41 = vmul.f32 %v6830_v63, %v3856_v32  ;;  %v3826_v42 = vmul.f32 %v6816_v7, %v3701_v39 }
0x1939   : > { %v3954_v43 = vmul.f32 0.35355338, %v3936_v34  ;;  %v3907_v44 = vadd.f32 %v6836_v3, %v3881_v36  ;;  %v3859_v46 = vadd.f32 %v6827_v45, %v3827_v37 }
0x193a   : > { %v3953_v47 = vmul.f32 0.35355338, %v3935_v40  ;;  %v3906_v48 = vadd.f32 %v6836_v3, %v3880_v41  ;;  %v3858_v49 = vadd.f32 %v6820_v19, %v3826_v42  ;;  %v4726_v50 = vpop.f32.mrb[22].mxu0 }
0x193b   : > { %3972 = vst.msk [vmem:[%s6852_s9 + $0x58] sm:$0xff] %vm1048_vm1, %v3954_v43  ;;  %v3938_v51 = vsub.f32 %v3907_v44, %v6841_v29  ;;  %v3883_v52 = vmul.f32 %v6830_v63, %v3859_v46  ;;  %v3829_v53 = vmul.f32 %v4726_v50, %v6824_v58  ;;  %v3790_v54 = vpop.f32.mrb[23].mxu0 }
0x193c   : > { %3971 = vst.msk [vmem:[%s6852_s9 + $0x50] sm:$0xff] %vm1048_vm1, %v3953_v47  ;;  %v3937_v5 = vsub.f32 %v3906_v48, %v6844_v27  ;;  %v3882_v55 = vmul.f32 %v6830_v63, %v3858_v49  ;;  %v3828_v56 = vmul.f32 %v6816_v7, %v3790_v54 }
0x193d   : > { %v3956_v57 = vmul.f32 0.35355338, %v3938_v51  ;;  %v3909_v38 = vadd.f32 %v6836_v3, %v3883_v52  ;;  %v3861_v59 = vadd.f32 %v6827_v45, %v3829_v53 }
0x193e   : > { %v3955_v0 = vmul.f32 0.35355338, %v3937_v5  ;;  %v3908_v58 = vadd.f32 %v6836_v3, %v3882_v55  ;;  %v3860_v1 = vadd.f32 %v6820_v19, %v3828_v56 }
0x193f   : > { %3974 = vst.msk [vmem:[%s6852_s9 + $0x68] sm:$0xff] %vm1048_vm1, %v3956_v57  ;;  %v3940_v2 = vsub.f32 %v3909_v38, %v6841_v29  ;;  %v3885_v60 = vmul.f32 %v6830_v63, %v3861_v59 }
0x1940   : > { %3973 = vst.msk [vmem:[%s6852_s9 + $0x60] sm:$0xff] %vm1048_vm1, %v3955_v0  ;;  %v3939_v7 = vsub.f32 %v3908_v58, %v6844_v27  ;;  %v3884_v45 = vmul.f32 %v6830_v63, %v3860_v1 }
0x1941   : > { %v3958_v4 = vmul.f32 0.35355338, %v3940_v2  ;;  %v3911_v61 = vadd.f32 %v6836_v3, %v3885_v60 }
0x1942   : > { %v3957_v19 = vmul.f32 0.35355338, %v3939_v7  ;;  %v3910_v6 = vadd.f32 %v6836_v3, %v3884_v45 }
0x1943   : > { %3976 = vst.msk [vmem:[%s6852_s9 + $0x78] sm:$0xff] %vm1048_vm1, %v3958_v4  ;;  %v3942_v28 = vsub.f32 %v3911_v61, %v6841_v29 }
0x1944   : > { %3975 = vst.msk [vmem:[%s6852_s9 + $0x70] sm:$0xff] %vm1048_vm1, %v3957_v19  ;;  %v3941_v8 = vsub.f32 %v3910_v6, %v6844_v27 }
0x1945   : > { %v3960_v63 = vmul.f32 0.35355338, %v3942_v28 }
0x1946   : > { %v3959_v3 = vmul.f32 0.35355338, %v3941_v8 }
0x1947   : > { %3978 = vst.msk [vmem:[%s6852_s9 + $0x88] sm:$0xff] %vm1048_vm1, %v3960_v63 }
0x1948   : > { %3977 = vst.msk [vmem:[%s6852_s9 + $0x80] sm:$0xff] %vm1048_vm1, %v3959_v3 }
0x1949   : > { %5660 = shalt.err (!%p5657_p6)
}
0x194a   : > { %s5661_s25 = scalar_lea.hbm %s6971_s11, 2304  ;;  %s5665_s9 = scalar_lea.hbm %s7150_s5, 4608 }
0x194b   : > { %p5662_p10 = scmp.ne.s32.totalorder %s6971_s11, %s5661_s25  ;;  %p5666_p3 = scmp.lt.u32.totalorder %s6971_s11, %s7150_s5 }
0x194c   : > { %p5667_p7 = scmp.lt.u32.totalorder %s5665_s9, %s5661_s25  ;;  %p5669_p8 = scmp.lt.u32.totalorder %s5661_s25, %s6971_s11 }
0x194d   : > { %p5663_p5 = pnand %p5662_p10, %p7151_p4 }
0x194e   : > { %p5668_p11 = por %p5667_p7, %p5666_p3 }
0x194f   : > { %p5664_p9 = pneg %p5663_p5 }
0x1950   : > { %p5670_p12 = por %p5669_p8, %p5668_p11 }
0x1952   : > { %p5671_p1 = pnand %p5670_p12, %p5664_p9 }
0x1954   : > { %5674 = shalt.err (!%p5671_p1)
}
0x1955   : > { %s5777_s8 = smov 128   ;;  %s5778_s12 = smov 8  }
0x1956   : > { %4971 = dma.vmem_to_hbm [thread:$0]  (%p7151_p4), %s6973_s14, 2304, %s6971_s11, %s3980_s6, %s5777_s8, %s5777_s8, %s5778_s12  }
0x1957 PF: > { %s7152_s3 = sld [smem:[#allocation36_spill]]  ;;  %p7153_p13 = scmp.ne.s32.totalorder %s7110_s27, 0 }
0x1958   : > { %p7154_p0 = scmp.ge.s32.totalorder %s5745_s30, 2 }
0x195a   : > { %p5018_p2 = pnand %p7154_p0, %p7153_p13 }
0x195d   : > { %s4008_s26 = sand.u32 1, %s7152_s3  }
0x195e   : > { %s4009_s24 = scalar_lea.sflag [#allocation4], %s4008_s26 }
0x195f   : > { %5728 = dma.done.wait (!%p5018_p2), %s4009_s24, 2304  }
0x1960   : > { %5730 = vsyncadd (!%p5018_p2), %s4009_s24, 4294964992  ;;  %p44_p6 = scmp.ge.s32.totalorder %s6211_s1, 4   ;;  %s7155_s3 = smov %s5737_s28 }
0x1961   : > { %s7156_s28 = smov %s5741_s29  ;;  %s7157_s29 = smov %s6223_s19 }
0x1962   : > { %s7158_s30 = smov %s6211_s1  ;;  %46 = sbr.rel (!%p44_p6) target bundleno = 32 (0x20), region = 232 }
0x1969   :  { %4014 = vsyncpa [#allocation3], 1 }
0x196a   :  { %4016 = vsyncpa [#allocation3 + $0x1], 1 }
0x196b   :  { %4017 = vsyncpa [#allocation6], 1 }
0x196c   :  { %4019 = vsyncpa [#allocation6 + $0x1], 1 }
0x196d   :  { %4020 = vsyncpa [#allocation9], 1 }
0x196e   :  { %4021 = vsyncpa [#allocation12], 1 }
0x196f   :  { %4022 = vsyncpa [#allocation15], 1 }
0x1970   :  { %4023 = vsyncpa [#allocation18], 1 }
0x1971   :  { %4024 = vsyncpa [#allocation21], 1 }
0x1972   :  { %4025 = vsyncpa [#allocation24], 1 }
0x1973   :  { %4026 = vsyncpa [#allocation4], 1 }
0x1974   :  { %4028 = vsyncpa [#allocation4 + $0x1], 1 }

</bundles_post_ra>
